<compile_context>
chip_gen: v6e
topology: v6e:2x2x1
jax: 0.10.0
libtpu: 0.0.40
codegen_flags: <defaults>
</compile_context>

<pallas_src>
import functools

import jax
import jax.numpy as jnp
import numpy as np
from jax import lax
from jax.experimental import pallas as pl
from jax.experimental.pallas import tpu as pltpu

LANE = 128


def _round_up(x, m):
    return ((x + m - 1) // m) * m


# ----------------------------- Pallas kernel --------------------------------


def _fused_seq2seq_kernel(
    xe_ref, ewih_ref, ewhh_ref, eb_ref,          # encoder: x_emb [T_in,Hp], W_ih [Hp,4Hp], W_hh [Hp,4Hp], b [1,4Hp]
    xd_ref, dwih_ref, dwhh_ref, db_ref,          # decoder LSTM params (same layout)
    wout_ref, bout_ref,                          # projection: [Hp,Vp], [1,Vp]
    out_ref, hT_ref, cT_ref,                     # outputs: [T_dec,Vp], [1,Hp], [1,Hp]
    egx_ref, dgx_ref, hs_ref,                    # VMEM scratches
):
    Hp = ewhh_ref.shape[0]
    T_in = xe_ref.shape[0]
    T_dec = xd_ref.shape[0]

    # ---- hoisted input-side matmuls (one batched MXU op each, off the serial chain)
    egx_ref[...] = (
        jnp.dot(xe_ref[...], ewih_ref[...], preferred_element_type=jnp.float32)
        + eb_ref[...]
    )
    dgx_ref[...] = (
        jnp.dot(xd_ref[...], dwih_ref[...], preferred_element_type=jnp.float32)
        + db_ref[...]
    )

    ewhh = ewhh_ref[...]
    dwhh = dwhh_ref[...]

    def cell(gates_x_t, h, c, whh):
        # gates: [1, 4Hp]; each gate block is a whole-vreg (Hp=128-lane) slice.
        gates = gates_x_t + jnp.dot(h, whh, preferred_element_type=jnp.float32)
        i = jax.nn.sigmoid(gates[:, 0 * Hp : 1 * Hp])
        f = jax.nn.sigmoid(gates[:, 1 * Hp : 2 * Hp])
        g = jnp.tanh(gates[:, 2 * Hp : 3 * Hp])
        o = jax.nn.sigmoid(gates[:, 3 * Hp : 4 * Hp])
        c_new = f * c + i * g
        h_new = o * jnp.tanh(c_new)
        return h_new, c_new

    # ---- encoder recurrence
    def enc_step(t, carry):
        h, c = carry
        return cell(egx_ref[pl.ds(t, 1), :], h, c, ewhh)

    h0 = jnp.zeros((1, Hp), jnp.float32)
    c0 = jnp.zeros((1, Hp), jnp.float32)
    h, c = lax.fori_loop(0, T_in, enc_step, (h0, c0), unroll=True)

    # ---- decoder recurrence; stash h_t for the deferred projection
    def dec_step(t, carry):
        h, c = carry
        h, c = cell(dgx_ref[pl.ds(t, 1), :], h, c, dwhh)
        hs_ref[pl.ds(t, 1), :] = h  # [1, 128] lane-dense store to VMEM scratch
        return (h, c)

    h, c = lax.fori_loop(0, T_dec, dec_step, (h, c), unroll=True)
    hT_ref[...] = h
    cT_ref[...] = c

    # ---- deferred projection + log-softmax: one matmul, one lane-dense store
    logits = (
        jnp.dot(hs_ref[...], wout_ref[...], preferred_element_type=jnp.float32)
        + bout_ref[...]
    )  # [T_dec, Vp]; padded vocab lanes carry bias -1e30 -> exp underflows to 0
    m = jnp.max(logits, axis=-1, keepdims=True)
    lse = jnp.log(jnp.sum(jnp.exp(logits - m), axis=-1, keepdims=True)) + m
    out_ref[...] = logits - lse


# ------------------------------ JAX wrappers ----------------------------------

_VMEM = functools.partial(pl.BlockSpec, memory_space=pltpu.MemorySpace.VMEM)


def run_seq2seq(x_enc, ewih, ewhh, eb, x_dec, dwih, dwhh, db, wout, bout):
    T_in, Hp = x_enc.shape
    T_dec = x_dec.shape[0]
    Vp = wout.shape[1]
    return pl.pallas_call(
        _fused_seq2seq_kernel,
        out_shape=(
            jax.ShapeDtypeStruct((T_dec, Vp), jnp.float32),  # log-probs (padded V)
            jax.ShapeDtypeStruct((1, Hp), jnp.float32),      # final h
            jax.ShapeDtypeStruct((1, Hp), jnp.float32),      # final c
        ),
        in_specs=[_VMEM()] * 10,
        out_specs=(_VMEM(), _VMEM(), _VMEM()),
        scratch_shapes=[
            pltpu.VMEM((T_in, 4 * Hp), jnp.float32),   # encoder hoisted input gates
            pltpu.VMEM((T_dec, 4 * Hp), jnp.float32),  # decoder hoisted input gates
            pltpu.VMEM((T_dec, Hp), jnp.float32),      # decoder hidden states
        ],
    )(x_enc, ewih, ewhh, eb, x_dec, dwih, dwhh, db, wout, bout)


def init_params(key, vocab_in, vocab_out, hidden):
    """Deterministic synthetic parameters (PyTorch shapes, pre-transposed [H,4H])."""
    ks = jax.random.split(key, 10)
    s = 0.1
    return {
        # encoder: Embedding(vocab_in, H) + LSTM(H, H)
        "enc_emb": jax.random.normal(ks[0], (vocab_in, hidden), jnp.float32) * s,
        "enc_wih": jax.random.normal(ks[1], (hidden, 4 * hidden), jnp.float32) * s,
        "enc_whh": jax.random.normal(ks[2], (hidden, 4 * hidden), jnp.float32) * s,
        "enc_b": jax.random.normal(ks[3], (1, 4 * hidden), jnp.float32) * s,
        # decoder: Embedding(vocab_out, H) + LSTM(H, H) + Linear(H, vocab_out)
        "dec_emb": jax.random.normal(ks[4], (vocab_out, hidden), jnp.float32) * s,
        "dec_wih": jax.random.normal(ks[5], (hidden, 4 * hidden), jnp.float32) * s,
        "dec_whh": jax.random.normal(ks[6], (hidden, 4 * hidden), jnp.float32) * s,
        "dec_b": jax.random.normal(ks[7], (1, 4 * hidden), jnp.float32) * s,
        "dec_wout": jax.random.normal(ks[8], (hidden, vocab_out), jnp.float32) * s,
        "dec_bout": jax.random.normal(ks[9], (1, vocab_out), jnp.float32) * s,
    }


def pad_params(params, lane=LANE):
    """Pad hidden/vocab dims to the 128-lane width so gate slices and the final
    store are vreg-aligned. Zero padding is mathematically neutral for the LSTM
    (padded lanes stay exactly zero); padded vocab bias is -1e30 so padded logits
    vanish under log-softmax."""
    H = params["enc_wih"].shape[0]
    V = params["dec_wout"].shape[1]
    Hp = _round_up(H, lane)
    Vp = _round_up(V, lane)

    def pad_gates(w, rows_p):
        # w: [R, 4H] -> [rows_p, 4*Hp] with gate block k placed at columns [k*Hp, k*Hp+H)
        R = w.shape[0]
        out = jnp.zeros((rows_p, 4 * Hp), jnp.float32)
        for k in range(4):
            out = out.at[:R, k * Hp : k * Hp + H].set(w[:, k * H : (k + 1) * H])
        return out

    pp = {
        "enc_emb": jnp.pad(params["enc_emb"], ((0, 0), (0, Hp - H))),
        "enc_wih": pad_gates(params["enc_wih"], Hp),
        "enc_whh": pad_gates(params["enc_whh"], Hp),
        "enc_b": pad_gates(params["enc_b"], 1),
        "dec_emb": jnp.pad(params["dec_emb"], ((0, 0), (0, Hp - H))),
        "dec_wih": pad_gates(params["dec_wih"], Hp),
        "dec_whh": pad_gates(params["dec_whh"], Hp),
        "dec_b": pad_gates(params["dec_b"], 1),
        "dec_wout": jnp.pad(params["dec_wout"], ((0, Hp - H), (0, Vp - V))),
        "dec_bout": jnp.pad(
            params["dec_bout"], ((0, 0), (0, Vp - V)), constant_values=-1e30
        ),
    }
    return pp, (H, V, Hp, Vp)


def seq2seq_forward(pp, dims, input_tokens, target_tokens):
    """input_tokens: [T_in] int32, target_tokens: [T_dec] int32.
    Returns decoder_output [1, T_dec, vocab_out] of log-probabilities and the
    decoder's final (hidden_state, cell_state), each [1, 1, H]."""
    H, V, _, _ = dims
    # Embedding lookups (glue); padded tables -> rows already [*, Hp].
    # TODO(synk): could move the gather in-kernel via PrefetchScalarGridSpec scalar
    # prefetch of token ids; kept as JAX glue (modest win at these sizes).
    x_enc = pp["enc_emb"][input_tokens]   # [T_in, Hp]
    x_dec = pp["dec_emb"][target_tokens]  # [T_dec, Hp]

    logp_p, h_p, c_p = run_seq2seq(
        x_enc, pp["enc_wih"], pp["enc_whh"], pp["enc_b"],
        x_dec, pp["dec_wih"], pp["dec_whh"], pp["dec_b"],
        pp["dec_wout"], pp["dec_bout"],
    )
    logp = logp_p[:, :V]      # slice padded vocab back
    h = h_p[:, :H]
    c = c_p[:, :H]
    # batch_first=True, batch=1 -> [1, T_dec, V]; state -> [n_layers=1, 1, H]
    return logp[None], (h[None], c[None])


# --------------------------- pure-JAX reference -------------------------------


def _ref_lstm(x, wih, whh, b, h0, c0, H):
    def step(carry, x_t):
        h, c = carry
        g = x_t[None] @ wih + h @ whh + b
        i = jax.nn.sigmoid(g[:, 0:H])
        f = jax.nn.sigmoid(g[:, H : 2 * H])
        gg = jnp.tanh(g[:, 2 * H : 3 * H])
        o = jax.nn.sigmoid(g[:, 3 * H : 4 * H])
        c = f * c + i * gg
        h = o * jnp.tanh(c)
        return (h, c), h[0]

    (h, c), hs = lax.scan(step, (h0, c0), x)
    return hs, h, c


def seq2seq_reference(params, input_tokens, target_tokens):
    H = params["enc_wih"].shape[0]
    x_enc = params["enc_emb"][input_tokens]
    x_dec = params["dec_emb"][target_tokens]
    z = jnp.zeros((1, H), jnp.float32)
    _, h_e, c_e = _ref_lstm(
        x_enc, params["enc_wih"], params["enc_whh"], params["enc_b"], z, z, H
    )
    hs, h_d, c_d = _ref_lstm(
        x_dec, params["dec_wih"], params["dec_whh"], params["dec_b"], h_e, c_e, H
    )
    logits = hs @ params["dec_wout"] + params["dec_bout"]
    return jax.nn.log_softmax(logits, axis=-1)[None], (h_d[None], c_d[None])


# ----------------------------------- main --------------------------------------

if __name__ == "__main__":
    key = jax.random.PRNGKey(0)

    VOCAB_IN = 16    # len(char2index)  (SOS + tokens)
    VOCAB_OUT = 16   # len(tokens)
    HIDDEN = 64      # hidden_size=64 in the module
    T_IN = 10        # len('_' + sentence + '_')
    T_DEC = 10

    k_tok_in, k_tok_tgt, k_params = jax.random.split(key, 3)
    input_tokens = jax.random.randint(k_tok_in, (T_IN,), 0, VOCAB_IN, dtype=jnp.int32)
    target_tokens = jax.random.randint(k_tok_tgt, (T_DEC,), 0, VOCAB_OUT, dtype=jnp.int32)

    params = init_params(k_params, VOCAB_IN, VOCAB_OUT, HIDDEN)
    padded_params, dims = pad_params(params)

    decoder_output, (hidden_state, cell_state) = seq2seq_forward(
        padded_params, dims, input_tokens, target_tokens
    )
    jax.block_until_ready(decoder_output)
    jax.block_until_ready(hidden_state)
    jax.block_until_ready(cell_state)

    assert decoder_output.shape == (1, T_DEC, VOCAB_OUT)
    assert hidden_state.shape == (1, 1, HIDDEN)
    assert cell_state.shape == (1, 1, HIDDEN)

    # Each row of decoder_output is a log-softmax: exp-sum should be ~1.
    row_sums = jnp.exp(decoder_output[0]).sum(-1)
    assert np.allclose(np.asarray(row_sums), 1.0, atol=1e-3)

    # Cross-check against a pure-JAX reference (unpadded math).
    ref_out, (ref_h, ref_c) = seq2seq_reference(params, input_tokens, target_tokens)
    np.testing.assert_allclose(
        np.asarray(decoder_output), np.asarray(ref_out), atol=1e-4, rtol=1e-4
    )
    np.testing.assert_allclose(
        np.asarray(hidden_state), np.asarray(ref_h), atol=1e-4, rtol=1e-4
    )
    np.testing.assert_allclose(
        np.asarray(cell_state), np.asarray(ref_c), atol=1e-4, rtol=1e-4
    )

    print("KERNEL_OK")
</pallas_src>

<mosaic_0001>
module attributes {stable_mosaic.version = 11 : i64} {
  func.func @_fused_seq2seq_kernel(%arg0: memref<10x128xf32, #tpu.memory_space<vmem>>, %arg1: memref<128x512xf32, #tpu.memory_space<vmem>>, %arg2: memref<128x512xf32, #tpu.memory_space<vmem>>, %arg3: memref<1x512xf32, #tpu.memory_space<vmem>>, %arg4: memref<10x128xf32, #tpu.memory_space<vmem>>, %arg5: memref<128x512xf32, #tpu.memory_space<vmem>>, %arg6: memref<128x512xf32, #tpu.memory_space<vmem>>, %arg7: memref<1x512xf32, #tpu.memory_space<vmem>>, %arg8: memref<128x128xf32, #tpu.memory_space<vmem>>, %arg9: memref<1x128xf32, #tpu.memory_space<vmem>>, %arg10: memref<10x128xf32, #tpu.memory_space<vmem>>, %arg11: memref<1x128xf32, #tpu.memory_space<vmem>>, %arg12: memref<1x128xf32, #tpu.memory_space<vmem>>, %arg13: memref<10x512xf32, #tpu.memory_space<vmem>>, %arg14: memref<10x512xf32, #tpu.memory_space<vmem>>, %arg15: memref<10x128xf32, #tpu.memory_space<vmem>>) attributes {dimension_semantics = [], scalar_prefetch = 0 : i64, scratch_operands = 3 : i64, tpu.core_type = #tpu.core_type<tc>} {
    %c0 = arith.constant 0 : index
    %c0_0 = arith.constant 0 : index
    %0 = vector.load %arg0[%c0, %c0_0] : memref<10x128xf32, #tpu.memory_space<vmem>>, vector<10x128xf32>
    %c0_1 = arith.constant 0 : index
    %c0_2 = arith.constant 0 : index
    %1 = vector.load %arg1[%c0_1, %c0_2] : memref<128x512xf32, #tpu.memory_space<vmem>>, vector<128x512xf32>
    %cst = arith.constant dense<0.000000e+00> : vector<10x512xf32>
    %2 = tpu.matmul %0, %1, %cst {dimension_numbers = #tpu.dot_dimension_numbers<[1], [0], [0], [1], [0, 0, 1, 1], [], []>} : vector<10x128xf32>, vector<128x512xf32>, vector<10x512xf32> -> vector<10x512xf32>
    %c0_3 = arith.constant 0 : index
    %c0_4 = arith.constant 0 : index
    %3 = vector.load %arg3[%c0_3, %c0_4] : memref<1x512xf32, #tpu.memory_space<vmem>>, vector<1x512xf32>
    %4 = vector.broadcast %3 : vector<1x512xf32> to vector<10x512xf32>
    %5 = arith.addf %2, %4 : vector<10x512xf32>
    %c0_5 = arith.constant 0 : index
    %c0_6 = arith.constant 0 : index
    %6 = vector.load %arg13[%c0_5, %c0_6] : memref<10x512xf32, #tpu.memory_space<vmem>>, vector<10x512xf32>
    tpu.vector_store %arg13[%c0_5, %c0_6], %5 {strides = array<i32>} : memref<10x512xf32, #tpu.memory_space<vmem>>, vector<10x512xf32>,
    %c0_7 = arith.constant 0 : index
    %c0_8 = arith.constant 0 : index
    %7 = vector.load %arg4[%c0_7, %c0_8] : memref<10x128xf32, #tpu.memory_space<vmem>>, vector<10x128xf32>
    %c0_9 = arith.constant 0 : index
    %c0_10 = arith.constant 0 : index
    %8 = vector.load %arg5[%c0_9, %c0_10] : memref<128x512xf32, #tpu.memory_space<vmem>>, vector<128x512xf32>
    %cst_11 = arith.constant dense<0.000000e+00> : vector<10x512xf32>
    %9 = tpu.matmul %7, %8, %cst_11 {dimension_numbers = #tpu.dot_dimension_numbers<[1], [0], [0], [1], [0, 0, 1, 1], [], []>} : vector<10x128xf32>, vector<128x512xf32>, vector<10x512xf32> -> vector<10x512xf32>
    %c0_12 = arith.constant 0 : index
    %c0_13 = arith.constant 0 : index
    %10 = vector.load %arg7[%c0_12, %c0_13] : memref<1x512xf32, #tpu.memory_space<vmem>>, vector<1x512xf32>
    %11 = vector.broadcast %10 : vector<1x512xf32> to vector<10x512xf32>
    %12 = arith.addf %9, %11 : vector<10x512xf32>
    %c0_14 = arith.constant 0 : index
    %c0_15 = arith.constant 0 : index
    %13 = vector.load %arg14[%c0_14, %c0_15] : memref<10x512xf32, #tpu.memory_space<vmem>>, vector<10x512xf32>
    tpu.vector_store %arg14[%c0_14, %c0_15], %12 {strides = array<i32>} : memref<10x512xf32, #tpu.memory_space<vmem>>, vector<10x512xf32>,
    %c0_16 = arith.constant 0 : index
    %c0_17 = arith.constant 0 : index
    %14 = vector.load %arg2[%c0_16, %c0_17] : memref<128x512xf32, #tpu.memory_space<vmem>>, vector<128x512xf32>
    %c0_18 = arith.constant 0 : index
    %c0_19 = arith.constant 0 : index
    %15 = vector.load %arg6[%c0_18, %c0_19] : memref<128x512xf32, #tpu.memory_space<vmem>>, vector<128x512xf32>
    %cst_20 = arith.constant 0.000000e+00 : f32
    %16 = vector.broadcast %cst_20 : f32 to vector<1x128xf32>
    %cst_21 = arith.constant 0.000000e+00 : f32
    %17 = vector.broadcast %cst_21 : f32 to vector<1x128xf32>
    %c0_i32 = arith.constant 0 : i32
    %18 = arith.index_cast %c0_i32 : i32 to index
    %c0_22 = arith.constant 0 : index
    %19 = vector.load %arg13[%18, %c0_22] : memref<10x512xf32, #tpu.memory_space<vmem>>, vector<1x512xf32>
    %cst_23 = arith.constant dense<0.000000e+00> : vector<1x512xf32>
    %20 = tpu.matmul %16, %14, %cst_23 {dimension_numbers = #tpu.dot_dimension_numbers<[1], [0], [0], [1], [0, 0, 1, 1], [], []>} : vector<1x128xf32>, vector<128x512xf32>, vector<1x512xf32> -> vector<1x512xf32>
    %21 = arith.addf %19, %20 : vector<1x512xf32>
    %22 = vector.extract_strided_slice %21 {offsets = [0, 0], sizes = [1, 128], strides = [1, 1]} : vector<1x512xf32> to vector<1x128xf32>
    %23 = arith.negf %22 : vector<1x128xf32>
    %24 = math.exp %23 : vector<1x128xf32>
    %cst_24 = arith.constant 1.000000e+00 : f32
    %25 = vector.broadcast %cst_24 : f32 to vector<1x128xf32>
    %26 = arith.addf %25, %24 : vector<1x128xf32>
    %27 = arith.divf %25, %26 : vector<1x128xf32>
    %28 = vector.extract_strided_slice %21 {offsets = [0, 128], sizes = [1, 128], strides = [1, 1]} : vector<1x512xf32> to vector<1x128xf32>
    %29 = arith.negf %28 : vector<1x128xf32>
    %30 = math.exp %29 : vector<1x128xf32>
    %cst_25 = arith.constant 1.000000e+00 : f32
    %31 = vector.broadcast %cst_25 : f32 to vector<1x128xf32>
    %32 = arith.addf %31, %30 : vector<1x128xf32>
    %33 = arith.divf %31, %32 : vector<1x128xf32>
    %34 = vector.extract_strided_slice %21 {offsets = [0, 256], sizes = [1, 128], strides = [1, 1]} : vector<1x512xf32> to vector<1x128xf32>
    %35 = math.tanh %34 : vector<1x128xf32>
    %36 = vector.extract_strided_slice %21 {offsets = [0, 384], sizes = [1, 128], strides = [1, 1]} : vector<1x512xf32> to vector<1x128xf32>
    %37 = arith.negf %36 : vector<1x128xf32>
    %38 = math.exp %37 : vector<1x128xf32>
    %cst_26 = arith.constant 1.000000e+00 : f32
    %39 = vector.broadcast %cst_26 : f32 to vector<1x128xf32>
    %40 = arith.addf %39, %38 : vector<1x128xf32>
    %41 = arith.divf %39, %40 : vector<1x128xf32>
    %42 = arith.mulf %33, %17 : vector<1x128xf32>
    %43 = arith.mulf %27, %35 : vector<1x128xf32>
    %44 = arith.addf %42, %43 : vector<1x128xf32>
    %45 = math.tanh %44 : vector<1x128xf32>
    %46 = arith.mulf %41, %45 : vector<1x128xf32>
    %c1_i32 = arith.constant 1 : i32
    %47 = arith.index_cast %c1_i32 : i32 to index
    %c0_27 = arith.constant 0 : index
    %48 = vector.load %arg13[%47, %c0_27] : memref<10x512xf32, #tpu.memory_space<vmem>>, vector<1x512xf32>
    %cst_28 = arith.constant dense<0.000000e+00> : vector<1x512xf32>
    %49 = tpu.matmul %46, %14, %cst_28 {dimension_numbers = #tpu.dot_dimension_numbers<[1], [0], [0], [1], [0, 0, 1, 1], [], []>} : vector<1x128xf32>, vector<128x512xf32>, vector<1x512xf32> -> vector<1x512xf32>
    %50 = arith.addf %48, %49 : vector<1x512xf32>
    %51 = vector.extract_strided_slice %50 {offsets = [0, 0], sizes = [1, 128], strides = [1, 1]} : vector<1x512xf32> to vector<1x128xf32>
    %52 = arith.negf %51 : vector<1x128xf32>
    %53 = math.exp %52 : vector<1x128xf32>
    %cst_29 = arith.constant 1.000000e+00 : f32
    %54 = vector.broadcast %cst_29 : f32 to vector<1x128xf32>
    %55 = arith.addf %54, %53 : vector<1x128xf32>
    %56 = arith.divf %54, %55 : vector<1x128xf32>
    %57 = vector.extract_strided_slice %50 {offsets = [0, 128], sizes = [1, 128], strides = [1, 1]} : vector<1x512xf32> to vector<1x128xf32>
    %58 = arith.negf %57 : vector<1x128xf32>
    %59 = math.exp %58 : vector<1x128xf32>
    %cst_30 = arith.constant 1.000000e+00 : f32
    %60 = vector.broadcast %cst_30 : f32 to vector<1x128xf32>
    %61 = arith.addf %60, %59 : vector<1x128xf32>
    %62 = arith.divf %60, %61 : vector<1x128xf32>
    %63 = vector.extract_strided_slice %50 {offsets = [0, 256], sizes = [1, 128], strides = [1, 1]} : vector<1x512xf32> to vector<1x128xf32>
    %64 = math.tanh %63 : vector<1x128xf32>
    %65 = vector.extract_strided_slice %50 {offsets = [0, 384], sizes = [1, 128], strides = [1, 1]} : vector<1x512xf32> to vector<1x128xf32>
    %66 = arith.negf %65 : vector<1x128xf32>
    %67 = math.exp %66 : vector<1x128xf32>
    %cst_31 = arith.constant 1.000000e+00 : f32
    %68 = vector.broadcast %cst_31 : f32 to vector<1x128xf32>
    %69 = arith.addf %68, %67 : vector<1x128xf32>
    %70 = arith.divf %68, %69 : vector<1x128xf32>
    %71 = arith.mulf %62, %44 : vector<1x128xf32>
    %72 = arith.mulf %56, %64 : vector<1x128xf32>
    %73 = arith.addf %71, %72 : vector<1x128xf32>
    %74 = math.tanh %73 : vector<1x128xf32>
    %75 = arith.mulf %70, %74 : vector<1x128xf32>
    %c2_i32 = arith.constant 2 : i32
    %76 = arith.index_cast %c2_i32 : i32 to index
    %c0_32 = arith.constant 0 : index
    %77 = vector.load %arg13[%76, %c0_32] : memref<10x512xf32, #tpu.memory_space<vmem>>, vector<1x512xf32>
    %cst_33 = arith.constant dense<0.000000e+00> : vector<1x512xf32>
    %78 = tpu.matmul %75, %14, %cst_33 {dimension_numbers = #tpu.dot_dimension_numbers<[1], [0], [0], [1], [0, 0, 1, 1], [], []>} : vector<1x128xf32>, vector<128x512xf32>, vector<1x512xf32> -> vector<1x512xf32>
    %79 = arith.addf %77, %78 : vector<1x512xf32>
    %80 = vector.extract_strided_slice %79 {offsets = [0, 0], sizes = [1, 128], strides = [1, 1]} : vector<1x512xf32> to vector<1x128xf32>
    %81 = arith.negf %80 : vector<1x128xf32>
    %82 = math.exp %81 : vector<1x128xf32>
    %cst_34 = arith.constant 1.000000e+00 : f32
    %83 = vector.broadcast %cst_34 : f32 to vector<1x128xf32>
    %84 = arith.addf %83, %82 : vector<1x128xf32>
    %85 = arith.divf %83, %84 : vector<1x128xf32>
    %86 = vector.extract_strided_slice %79 {offsets = [0, 128], sizes = [1, 128], strides = [1, 1]} : vector<1x512xf32> to vector<1x128xf32>
    %87 = arith.negf %86 : vector<1x128xf32>
    %88 = math.exp %87 : vector<1x128xf32>
    %cst_35 = arith.constant 1.000000e+00 : f32
    %89 = vector.broadcast %cst_35 : f32 to vector<1x128xf32>
    %90 = arith.addf %89, %88 : vector<1x128xf32>
    %91 = arith.divf %89, %90 : vector<1x128xf32>
    %92 = vector.extract_strided_slice %79 {offsets = [0, 256], sizes = [1, 128], strides = [1, 1]} : vector<1x512xf32> to vector<1x128xf32>
    %93 = math.tanh %92 : vector<1x128xf32>
    %94 = vector.extract_strided_slice %79 {offsets = [0, 384], sizes = [1, 128], strides = [1, 1]} : vector<1x512xf32> to vector<1x128xf32>
    %95 = arith.negf %94 : vector<1x128xf32>
    %96 = math.exp %95 : vector<1x128xf32>
    %cst_36 = arith.constant 1.000000e+00 : f32
    %97 = vector.broadcast %cst_36 : f32 to vector<1x128xf32>
    %98 = arith.addf %97, %96 : vector<1x128xf32>
    %99 = arith.divf %97, %98 : vector<1x128xf32>
    %100 = arith.mulf %91, %73 : vector<1x128xf32>
    %101 = arith.mulf %85, %93 : vector<1x128xf32>
    %102 = arith.addf %100, %101 : vector<1x128xf32>
    %103 = math.tanh %102 : vector<1x128xf32>
    %104 = arith.mulf %99, %103 : vector<1x128xf32>
    %c3_i32 = arith.constant 3 : i32
    %105 = arith.index_cast %c3_i32 : i32 to index
    %c0_37 = arith.constant 0 : index
    %106 = vector.load %arg13[%105, %c0_37] : memref<10x512xf32, #tpu.memory_space<vmem>>, vector<1x512xf32>
    %cst_38 = arith.constant dense<0.000000e+00> : vector<1x512xf32>
    %107 = tpu.matmul %104, %14, %cst_38 {dimension_numbers = #tpu.dot_dimension_numbers<[1], [0], [0], [1], [0, 0, 1, 1], [], []>} : vector<1x128xf32>, vector<128x512xf32>, vector<1x512xf32> -> vector<1x512xf32>
    %108 = arith.addf %106, %107 : vector<1x512xf32>
    %109 = vector.extract_strided_slice %108 {offsets = [0, 0], sizes = [1, 128], strides = [1, 1]} : vector<1x512xf32> to vector<1x128xf32>
    %110 = arith.negf %109 : vector<1x128xf32>
    %111 = math.exp %110 : vector<1x128xf32>
    %cst_39 = arith.constant 1.000000e+00 : f32
    %112 = vector.broadcast %cst_39 : f32 to vector<1x128xf32>
    %113 = arith.addf %112, %111 : vector<1x128xf32>
    %114 = arith.divf %112, %113 : vector<1x128xf32>
    %115 = vector.extract_strided_slice %108 {offsets = [0, 128], sizes = [1, 128], strides = [1, 1]} : vector<1x512xf32> to vector<1x128xf32>
    %116 = arith.negf %115 : vector<1x128xf32>
    %117 = math.exp %116 : vector<1x128xf32>
    %cst_40 = arith.constant 1.000000e+00 : f32
    %118 = vector.broadcast %cst_40 : f32 to vector<1x128xf32>
    %119 = arith.addf %118, %117 : vector<1x128xf32>
    %120 = arith.divf %118, %119 : vector<1x128xf32>
    %121 = vector.extract_strided_slice %108 {offsets = [0, 256], sizes = [1, 128], strides = [1, 1]} : vector<1x512xf32> to vector<1x128xf32>
    %122 = math.tanh %121 : vector<1x128xf32>
    %123 = vector.extract_strided_slice %108 {offsets = [0, 384], sizes = [1, 128], strides = [1, 1]} : vector<1x512xf32> to vector<1x128xf32>
    %124 = arith.negf %123 : vector<1x128xf32>
    %125 = math.exp %124 : vector<1x128xf32>
    %cst_41 = arith.constant 1.000000e+00 : f32
    %126 = vector.broadcast %cst_41 : f32 to vector<1x128xf32>
    %127 = arith.addf %126, %125 : vector<1x128xf32>
    %128 = arith.divf %126, %127 : vector<1x128xf32>
    %129 = arith.mulf %120, %102 : vector<1x128xf32>
    %130 = arith.mulf %114, %122 : vector<1x128xf32>
    %131 = arith.addf %129, %130 : vector<1x128xf32>
    %132 = math.tanh %131 : vector<1x128xf32>
    %133 = arith.mulf %128, %132 : vector<1x128xf32>
    %c4_i32 = arith.constant 4 : i32
    %134 = arith.index_cast %c4_i32 : i32 to index
    %c0_42 = arith.constant 0 : index
    %135 = vector.load %arg13[%134, %c0_42] : memref<10x512xf32, #tpu.memory_space<vmem>>, vector<1x512xf32>
    %cst_43 = arith.constant dense<0.000000e+00> : vector<1x512xf32>
    %136 = tpu.matmul %133, %14, %cst_43 {dimension_numbers = #tpu.dot_dimension_numbers<[1], [0], [0], [1], [0, 0, 1, 1], [], []>} : vector<1x128xf32>, vector<128x512xf32>, vector<1x512xf32> -> vector<1x512xf32>
    %137 = arith.addf %135, %136 : vector<1x512xf32>
    %138 = vector.extract_strided_slice %137 {offsets = [0, 0], sizes = [1, 128], strides = [1, 1]} : vector<1x512xf32> to vector<1x128xf32>
    %139 = arith.negf %138 : vector<1x128xf32>
    %140 = math.exp %139 : vector<1x128xf32>
    %cst_44 = arith.constant 1.000000e+00 : f32
    %141 = vector.broadcast %cst_44 : f32 to vector<1x128xf32>
    %142 = arith.addf %141, %140 : vector<1x128xf32>
    %143 = arith.divf %141, %142 : vector<1x128xf32>
    %144 = vector.extract_strided_slice %137 {offsets = [0, 128], sizes = [1, 128], strides = [1, 1]} : vector<1x512xf32> to vector<1x128xf32>
    %145 = arith.negf %144 : vector<1x128xf32>
    %146 = math.exp %145 : vector<1x128xf32>
    %cst_45 = arith.constant 1.000000e+00 : f32
    %147 = vector.broadcast %cst_45 : f32 to vector<1x128xf32>
    %148 = arith.addf %147, %146 : vector<1x128xf32>
    %149 = arith.divf %147, %148 : vector<1x128xf32>
    %150 = vector.extract_strided_slice %137 {offsets = [0, 256], sizes = [1, 128], strides = [1, 1]} : vector<1x512xf32> to vector<1x128xf32>
    %151 = math.tanh %150 : vector<1x128xf32>
    %152 = vector.extract_strided_slice %137 {offsets = [0, 384], sizes = [1, 128], strides = [1, 1]} : vector<1x512xf32> to vector<1x128xf32>
    %153 = arith.negf %152 : vector<1x128xf32>
    %154 = math.exp %153 : vector<1x128xf32>
    %cst_46 = arith.constant 1.000000e+00 : f32
    %155 = vector.broadcast %cst_46 : f32 to vector<1x128xf32>
    %156 = arith.addf %155, %154 : vector<1x128xf32>
    %157 = arith.divf %155, %156 : vector<1x128xf32>
    %158 = arith.mulf %149, %131 : vector<1x128xf32>
    %159 = arith.mulf %143, %151 : vector<1x128xf32>
    %160 = arith.addf %158, %159 : vector<1x128xf32>
    %161 = math.tanh %160 : vector<1x128xf32>
    %162 = arith.mulf %157, %161 : vector<1x128xf32>
    %c5_i32 = arith.constant 5 : i32
    %163 = arith.index_cast %c5_i32 : i32 to index
    %c0_47 = arith.constant 0 : index
    %164 = vector.load %arg13[%163, %c0_47] : memref<10x512xf32, #tpu.memory_space<vmem>>, vector<1x512xf32>
    %cst_48 = arith.constant dense<0.000000e+00> : vector<1x512xf32>
    %165 = tpu.matmul %162, %14, %cst_48 {dimension_numbers = #tpu.dot_dimension_numbers<[1], [0], [0], [1], [0, 0, 1, 1], [], []>} : vector<1x128xf32>, vector<128x512xf32>, vector<1x512xf32> -> vector<1x512xf32>
    %166 = arith.addf %164, %165 : vector<1x512xf32>
    %167 = vector.extract_strided_slice %166 {offsets = [0, 0], sizes = [1, 128], strides = [1, 1]} : vector<1x512xf32> to vector<1x128xf32>
    %168 = arith.negf %167 : vector<1x128xf32>
    %169 = math.exp %168 : vector<1x128xf32>
    %cst_49 = arith.constant 1.000000e+00 : f32
    %170 = vector.broadcast %cst_49 : f32 to vector<1x128xf32>
    %171 = arith.addf %170, %169 : vector<1x128xf32>
    %172 = arith.divf %170, %171 : vector<1x128xf32>
    %173 = vector.extract_strided_slice %166 {offsets = [0, 128], sizes = [1, 128], strides = [1, 1]} : vector<1x512xf32> to vector<1x128xf32>
    %174 = arith.negf %173 : vector<1x128xf32>
    %175 = math.exp %174 : vector<1x128xf32>
    %cst_50 = arith.constant 1.000000e+00 : f32
    %176 = vector.broadcast %cst_50 : f32 to vector<1x128xf32>
    %177 = arith.addf %176, %175 : vector<1x128xf32>
    %178 = arith.divf %176, %177 : vector<1x128xf32>
    %179 = vector.extract_strided_slice %166 {offsets = [0, 256], sizes = [1, 128], strides = [1, 1]} : vector<1x512xf32> to vector<1x128xf32>
    %180 = math.tanh %179 : vector<1x128xf32>
    %181 = vector.extract_strided_slice %166 {offsets = [0, 384], sizes = [1, 128], strides = [1, 1]} : vector<1x512xf32> to vector<1x128xf32>
    %182 = arith.negf %181 : vector<1x128xf32>
    %183 = math.exp %182 : vector<1x128xf32>
    %cst_51 = arith.constant 1.000000e+00 : f32
    %184 = vector.broadcast %cst_51 : f32 to vector<1x128xf32>
    %185 = arith.addf %184, %183 : vector<1x128xf32>
    %186 = arith.divf %184, %185 : vector<1x128xf32>
    %187 = arith.mulf %178, %160 : vector<1x128xf32>
    %188 = arith.mulf %172, %180 : vector<1x128xf32>
    %189 = arith.addf %187, %188 : vector<1x128xf32>
    %190 = math.tanh %189 : vector<1x128xf32>
    %191 = arith.mulf %186, %190 : vector<1x128xf32>
    %c6_i32 = arith.constant 6 : i32
    %192 = arith.index_cast %c6_i32 : i32 to index
    %c0_52 = arith.constant 0 : index
    %193 = vector.load %arg13[%192, %c0_52] : memref<10x512xf32, #tpu.memory_space<vmem>>, vector<1x512xf32>
    %cst_53 = arith.constant dense<0.000000e+00> : vector<1x512xf32>
    %194 = tpu.matmul %191, %14, %cst_53 {dimension_numbers = #tpu.dot_dimension_numbers<[1], [0], [0], [1], [0, 0, 1, 1], [], []>} : vector<1x128xf32>, vector<128x512xf32>, vector<1x512xf32> -> vector<1x512xf32>
    %195 = arith.addf %193, %194 : vector<1x512xf32>
    %196 = vector.extract_strided_slice %195 {offsets = [0, 0], sizes = [1, 128], strides = [1, 1]} : vector<1x512xf32> to vector<1x128xf32>
    %197 = arith.negf %196 : vector<1x128xf32>
    %198 = math.exp %197 : vector<1x128xf32>
    %cst_54 = arith.constant 1.000000e+00 : f32
    %199 = vector.broadcast %cst_54 : f32 to vector<1x128xf32>
    %200 = arith.addf %199, %198 : vector<1x128xf32>
    %201 = arith.divf %199, %200 : vector<1x128xf32>
    %202 = vector.extract_strided_slice %195 {offsets = [0, 128], sizes = [1, 128], strides = [1, 1]} : vector<1x512xf32> to vector<1x128xf32>
    %203 = arith.negf %202 : vector<1x128xf32>
    %204 = math.exp %203 : vector<1x128xf32>
    %cst_55 = arith.constant 1.000000e+00 : f32
    %205 = vector.broadcast %cst_55 : f32 to vector<1x128xf32>
    %206 = arith.addf %205, %204 : vector<1x128xf32>
    %207 = arith.divf %205, %206 : vector<1x128xf32>
    %208 = vector.extract_strided_slice %195 {offsets = [0, 256], sizes = [1, 128], strides = [1, 1]} : vector<1x512xf32> to vector<1x128xf32>
    %209 = math.tanh %208 : vector<1x128xf32>
    %210 = vector.extract_strided_slice %195 {offsets = [0, 384], sizes = [1, 128], strides = [1, 1]} : vector<1x512xf32> to vector<1x128xf32>
    %211 = arith.negf %210 : vector<1x128xf32>
    %212 = math.exp %211 : vector<1x128xf32>
    %cst_56 = arith.constant 1.000000e+00 : f32
    %213 = vector.broadcast %cst_56 : f32 to vector<1x128xf32>
    %214 = arith.addf %213, %212 : vector<1x128xf32>
    %215 = arith.divf %213, %214 : vector<1x128xf32>
    %216 = arith.mulf %207, %189 : vector<1x128xf32>
    %217 = arith.mulf %201, %209 : vector<1x128xf32>
    %218 = arith.addf %216, %217 : vector<1x128xf32>
    %219 = math.tanh %218 : vector<1x128xf32>
    %220 = arith.mulf %215, %219 : vector<1x128xf32>
    %c7_i32 = arith.constant 7 : i32
    %221 = arith.index_cast %c7_i32 : i32 to index
    %c0_57 = arith.constant 0 : index
    %222 = vector.load %arg13[%221, %c0_57] : memref<10x512xf32, #tpu.memory_space<vmem>>, vector<1x512xf32>
    %cst_58 = arith.constant dense<0.000000e+00> : vector<1x512xf32>
    %223 = tpu.matmul %220, %14, %cst_58 {dimension_numbers = #tpu.dot_dimension_numbers<[1], [0], [0], [1], [0, 0, 1, 1], [], []>} : vector<1x128xf32>, vector<128x512xf32>, vector<1x512xf32> -> vector<1x512xf32>
    %224 = arith.addf %222, %223 : vector<1x512xf32>
    %225 = vector.extract_strided_slice %224 {offsets = [0, 0], sizes = [1, 128], strides = [1, 1]} : vector<1x512xf32> to vector<1x128xf32>
    %226 = arith.negf %225 : vector<1x128xf32>
    %227 = math.exp %226 : vector<1x128xf32>
    %cst_59 = arith.constant 1.000000e+00 : f32
    %228 = vector.broadcast %cst_59 : f32 to vector<1x128xf32>
    %229 = arith.addf %228, %227 : vector<1x128xf32>
    %230 = arith.divf %228, %229 : vector<1x128xf32>
    %231 = vector.extract_strided_slice %224 {offsets = [0, 128], sizes = [1, 128], strides = [1, 1]} : vector<1x512xf32> to vector<1x128xf32>
    %232 = arith.negf %231 : vector<1x128xf32>
    %233 = math.exp %232 : vector<1x128xf32>
    %cst_60 = arith.constant 1.000000e+00 : f32
    %234 = vector.broadcast %cst_60 : f32 to vector<1x128xf32>
    %235 = arith.addf %234, %233 : vector<1x128xf32>
    %236 = arith.divf %234, %235 : vector<1x128xf32>
    %237 = vector.extract_strided_slice %224 {offsets = [0, 256], sizes = [1, 128], strides = [1, 1]} : vector<1x512xf32> to vector<1x128xf32>
    %238 = math.tanh %237 : vector<1x128xf32>
    %239 = vector.extract_strided_slice %224 {offsets = [0, 384], sizes = [1, 128], strides = [1, 1]} : vector<1x512xf32> to vector<1x128xf32>
    %240 = arith.negf %239 : vector<1x128xf32>
    %241 = math.exp %240 : vector<1x128xf32>
    %cst_61 = arith.constant 1.000000e+00 : f32
    %242 = vector.broadcast %cst_61 : f32 to vector<1x128xf32>
    %243 = arith.addf %242, %241 : vector<1x128xf32>
    %244 = arith.divf %242, %243 : vector<1x128xf32>
    %245 = arith.mulf %236, %218 : vector<1x128xf32>
    %246 = arith.mulf %230, %238 : vector<1x128xf32>
    %247 = arith.addf %245, %246 : vector<1x128xf32>
    %248 = math.tanh %247 : vector<1x128xf32>
    %249 = arith.mulf %244, %248 : vector<1x128xf32>
    %c8_i32 = arith.constant 8 : i32
    %250 = arith.index_cast %c8_i32 : i32 to index
    %c0_62 = arith.constant 0 : index
    %251 = vector.load %arg13[%250, %c0_62] : memref<10x512xf32, #tpu.memory_space<vmem>>, vector<1x512xf32>
    %cst_63 = arith.constant dense<0.000000e+00> : vector<1x512xf32>
    %252 = tpu.matmul %249, %14, %cst_63 {dimension_numbers = #tpu.dot_dimension_numbers<[1], [0], [0], [1], [0, 0, 1, 1], [], []>} : vector<1x128xf32>, vector<128x512xf32>, vector<1x512xf32> -> vector<1x512xf32>
    %253 = arith.addf %251, %252 : vector<1x512xf32>
    %254 = vector.extract_strided_slice %253 {offsets = [0, 0], sizes = [1, 128], strides = [1, 1]} : vector<1x512xf32> to vector<1x128xf32>
    %255 = arith.negf %254 : vector<1x128xf32>
    %256 = math.exp %255 : vector<1x128xf32>
    %cst_64 = arith.constant 1.000000e+00 : f32
    %257 = vector.broadcast %cst_64 : f32 to vector<1x128xf32>
    %258 = arith.addf %257, %256 : vector<1x128xf32>
    %259 = arith.divf %257, %258 : vector<1x128xf32>
    %260 = vector.extract_strided_slice %253 {offsets = [0, 128], sizes = [1, 128], strides = [1, 1]} : vector<1x512xf32> to vector<1x128xf32>
    %261 = arith.negf %260 : vector<1x128xf32>
    %262 = math.exp %261 : vector<1x128xf32>
    %cst_65 = arith.constant 1.000000e+00 : f32
    %263 = vector.broadcast %cst_65 : f32 to vector<1x128xf32>
    %264 = arith.addf %263, %262 : vector<1x128xf32>
    %265 = arith.divf %263, %264 : vector<1x128xf32>
    %266 = vector.extract_strided_slice %253 {offsets = [0, 256], sizes = [1, 128], strides = [1, 1]} : vector<1x512xf32> to vector<1x128xf32>
    %267 = math.tanh %266 : vector<1x128xf32>
    %268 = vector.extract_strided_slice %253 {offsets = [0, 384], sizes = [1, 128], strides = [1, 1]} : vector<1x512xf32> to vector<1x128xf32>
    %269 = arith.negf %268 : vector<1x128xf32>
    %270 = math.exp %269 : vector<1x128xf32>
    %cst_66 = arith.constant 1.000000e+00 : f32
    %271 = vector.broadcast %cst_66 : f32 to vector<1x128xf32>
    %272 = arith.addf %271, %270 : vector<1x128xf32>
    %273 = arith.divf %271, %272 : vector<1x128xf32>
    %274 = arith.mulf %265, %247 : vector<1x128xf32>
    %275 = arith.mulf %259, %267 : vector<1x128xf32>
    %276 = arith.addf %274, %275 : vector<1x128xf32>
    %277 = math.tanh %276 : vector<1x128xf32>
    %278 = arith.mulf %273, %277 : vector<1x128xf32>
    %c9_i32 = arith.constant 9 : i32
    %279 = arith.index_cast %c9_i32 : i32 to index
    %c0_67 = arith.constant 0 : index
    %280 = vector.load %arg13[%279, %c0_67] : memref<10x512xf32, #tpu.memory_space<vmem>>, vector<1x512xf32>
    %cst_68 = arith.constant dense<0.000000e+00> : vector<1x512xf32>
    %281 = tpu.matmul %278, %14, %cst_68 {dimension_numbers = #tpu.dot_dimension_numbers<[1], [0], [0], [1], [0, 0, 1, 1], [], []>} : vector<1x128xf32>, vector<128x512xf32>, vector<1x512xf32> -> vector<1x512xf32>
    %282 = arith.addf %280, %281 : vector<1x512xf32>
    %283 = vector.extract_strided_slice %282 {offsets = [0, 0], sizes = [1, 128], strides = [1, 1]} : vector<1x512xf32> to vector<1x128xf32>
    %284 = arith.negf %283 : vector<1x128xf32>
    %285 = math.exp %284 : vector<1x128xf32>
    %cst_69 = arith.constant 1.000000e+00 : f32
    %286 = vector.broadcast %cst_69 : f32 to vector<1x128xf32>
    %287 = arith.addf %286, %285 : vector<1x128xf32>
    %288 = arith.divf %286, %287 : vector<1x128xf32>
    %289 = vector.extract_strided_slice %282 {offsets = [0, 128], sizes = [1, 128], strides = [1, 1]} : vector<1x512xf32> to vector<1x128xf32>
    %290 = arith.negf %289 : vector<1x128xf32>
    %291 = math.exp %290 : vector<1x128xf32>
    %cst_70 = arith.constant 1.000000e+00 : f32
    %292 = vector.broadcast %cst_70 : f32 to vector<1x128xf32>
    %293 = arith.addf %292, %291 : vector<1x128xf32>
    %294 = arith.divf %292, %293 : vector<1x128xf32>
    %295 = vector.extract_strided_slice %282 {offsets = [0, 256], sizes = [1, 128], strides = [1, 1]} : vector<1x512xf32> to vector<1x128xf32>
    %296 = math.tanh %295 : vector<1x128xf32>
    %297 = vector.extract_strided_slice %282 {offsets = [0, 384], sizes = [1, 128], strides = [1, 1]} : vector<1x512xf32> to vector<1x128xf32>
    %298 = arith.negf %297 : vector<1x128xf32>
    %299 = math.exp %298 : vector<1x128xf32>
    %cst_71 = arith.constant 1.000000e+00 : f32
    %300 = vector.broadcast %cst_71 : f32 to vector<1x128xf32>
    %301 = arith.addf %300, %299 : vector<1x128xf32>
    %302 = arith.divf %300, %301 : vector<1x128xf32>
    %303 = arith.mulf %294, %276 : vector<1x128xf32>
    %304 = arith.mulf %288, %296 : vector<1x128xf32>
    %305 = arith.addf %303, %304 : vector<1x128xf32>
    %306 = math.tanh %305 : vector<1x128xf32>
    %307 = arith.mulf %302, %306 : vector<1x128xf32>
    %c10_i32 = arith.constant 10 : i32
    %c0_i32_72 = arith.constant 0 : i32
    %308 = arith.index_cast %c0_i32_72 : i32 to index
    %c0_73 = arith.constant 0 : index
    %309 = vector.load %arg14[%308, %c0_73] : memref<10x512xf32, #tpu.memory_space<vmem>>, vector<1x512xf32>
    %cst_74 = arith.constant dense<0.000000e+00> : vector<1x512xf32>
    %310 = tpu.matmul %307, %15, %cst_74 {dimension_numbers = #tpu.dot_dimension_numbers<[1], [0], [0], [1], [0, 0, 1, 1], [], []>} : vector<1x128xf32>, vector<128x512xf32>, vector<1x512xf32> -> vector<1x512xf32>
    %311 = arith.addf %309, %310 : vector<1x512xf32>
    %312 = vector.extract_strided_slice %311 {offsets = [0, 0], sizes = [1, 128], strides = [1, 1]} : vector<1x512xf32> to vector<1x128xf32>
    %313 = arith.negf %312 : vector<1x128xf32>
    %314 = math.exp %313 : vector<1x128xf32>
    %cst_75 = arith.constant 1.000000e+00 : f32
    %315 = vector.broadcast %cst_75 : f32 to vector<1x128xf32>
    %316 = arith.addf %315, %314 : vector<1x128xf32>
    %317 = arith.divf %315, %316 : vector<1x128xf32>
    %318 = vector.extract_strided_slice %311 {offsets = [0, 128], sizes = [1, 128], strides = [1, 1]} : vector<1x512xf32> to vector<1x128xf32>
    %319 = arith.negf %318 : vector<1x128xf32>
    %320 = math.exp %319 : vector<1x128xf32>
    %cst_76 = arith.constant 1.000000e+00 : f32
    %321 = vector.broadcast %cst_76 : f32 to vector<1x128xf32>
    %322 = arith.addf %321, %320 : vector<1x128xf32>
    %323 = arith.divf %321, %322 : vector<1x128xf32>
    %324 = vector.extract_strided_slice %311 {offsets = [0, 256], sizes = [1, 128], strides = [1, 1]} : vector<1x512xf32> to vector<1x128xf32>
    %325 = math.tanh %324 : vector<1x128xf32>
    %326 = vector.extract_strided_slice %311 {offsets = [0, 384], sizes = [1, 128], strides = [1, 1]} : vector<1x512xf32> to vector<1x128xf32>
    %327 = arith.negf %326 : vector<1x128xf32>
    %328 = math.exp %327 : vector<1x128xf32>
    %cst_77 = arith.constant 1.000000e+00 : f32
    %329 = vector.broadcast %cst_77 : f32 to vector<1x128xf32>
    %330 = arith.addf %329, %328 : vector<1x128xf32>
    %331 = arith.divf %329, %330 : vector<1x128xf32>
    %332 = arith.mulf %323, %305 : vector<1x128xf32>
    %333 = arith.mulf %317, %325 : vector<1x128xf32>
    %334 = arith.addf %332, %333 : vector<1x128xf32>
    %335 = math.tanh %334 : vector<1x128xf32>
    %336 = arith.mulf %331, %335 : vector<1x128xf32>
    %337 = arith.index_cast %c0_i32_72 : i32 to index
    %c0_78 = arith.constant 0 : index
    %338 = vector.load %arg15[%337, %c0_78] : memref<10x128xf32, #tpu.memory_space<vmem>>, vector<1x128xf32>
    tpu.vector_store %arg15[%337, %c0_78], %336 {strides = array<i32>} : memref<10x128xf32, #tpu.memory_space<vmem>>, vector<1x128xf32>,
    %c1_i32_79 = arith.constant 1 : i32
    %339 = arith.index_cast %c1_i32_79 : i32 to index
    %c0_80 = arith.constant 0 : index
    %340 = vector.load %arg14[%339, %c0_80] : memref<10x512xf32, #tpu.memory_space<vmem>>, vector<1x512xf32>
    %cst_81 = arith.constant dense<0.000000e+00> : vector<1x512xf32>
    %341 = tpu.matmul %336, %15, %cst_81 {dimension_numbers = #tpu.dot_dimension_numbers<[1], [0], [0], [1], [0, 0, 1, 1], [], []>} : vector<1x128xf32>, vector<128x512xf32>, vector<1x512xf32> -> vector<1x512xf32>
    %342 = arith.addf %340, %341 : vector<1x512xf32>
    %343 = vector.extract_strided_slice %342 {offsets = [0, 0], sizes = [1, 128], strides = [1, 1]} : vector<1x512xf32> to vector<1x128xf32>
    %344 = arith.negf %343 : vector<1x128xf32>
    %345 = math.exp %344 : vector<1x128xf32>
    %cst_82 = arith.constant 1.000000e+00 : f32
    %346 = vector.broadcast %cst_82 : f32 to vector<1x128xf32>
    %347 = arith.addf %346, %345 : vector<1x128xf32>
    %348 = arith.divf %346, %347 : vector<1x128xf32>
    %349 = vector.extract_strided_slice %342 {offsets = [0, 128], sizes = [1, 128], strides = [1, 1]} : vector<1x512xf32> to vector<1x128xf32>
    %350 = arith.negf %349 : vector<1x128xf32>
    %351 = math.exp %350 : vector<1x128xf32>
    %cst_83 = arith.constant 1.000000e+00 : f32
    %352 = vector.broadcast %cst_83 : f32 to vector<1x128xf32>
    %353 = arith.addf %352, %351 : vector<1x128xf32>
    %354 = arith.divf %352, %353 : vector<1x128xf32>
    %355 = vector.extract_strided_slice %342 {offsets = [0, 256], sizes = [1, 128], strides = [1, 1]} : vector<1x512xf32> to vector<1x128xf32>
    %356 = math.tanh %355 : vector<1x128xf32>
    %357 = vector.extract_strided_slice %342 {offsets = [0, 384], sizes = [1, 128], strides = [1, 1]} : vector<1x512xf32> to vector<1x128xf32>
    %358 = arith.negf %357 : vector<1x128xf32>
    %359 = math.exp %358 : vector<1x128xf32>
    %cst_84 = arith.constant 1.000000e+00 : f32
    %360 = vector.broadcast %cst_84 : f32 to vector<1x128xf32>
    %361 = arith.addf %360, %359 : vector<1x128xf32>
    %362 = arith.divf %360, %361 : vector<1x128xf32>
    %363 = arith.mulf %354, %334 : vector<1x128xf32>
    %364 = arith.mulf %348, %356 : vector<1x128xf32>
    %365 = arith.addf %363, %364 : vector<1x128xf32>
    %366 = math.tanh %365 : vector<1x128xf32>
    %367 = arith.mulf %362, %366 : vector<1x128xf32>
    %368 = arith.index_cast %c1_i32_79 : i32 to index
    %c0_85 = arith.constant 0 : index
    %369 = vector.load %arg15[%368, %c0_85] : memref<10x128xf32, #tpu.memory_space<vmem>>, vector<1x128xf32>
    tpu.vector_store %arg15[%368, %c0_85], %367 {strides = array<i32>} : memref<10x128xf32, #tpu.memory_space<vmem>>, vector<1x128xf32>,
    %c2_i32_86 = arith.constant 2 : i32
    %370 = arith.index_cast %c2_i32_86 : i32 to index
    %c0_87 = arith.constant 0 : index
    %371 = vector.load %arg14[%370, %c0_87] : memref<10x512xf32, #tpu.memory_space<vmem>>, vector<1x512xf32>
    %cst_88 = arith.constant dense<0.000000e+00> : vector<1x512xf32>
    %372 = tpu.matmul %367, %15, %cst_88 {dimension_numbers = #tpu.dot_dimension_numbers<[1], [0], [0], [1], [0, 0, 1, 1], [], []>} : vector<1x128xf32>, vector<128x512xf32>, vector<1x512xf32> -> vector<1x512xf32>
    %373 = arith.addf %371, %372 : vector<1x512xf32>
    %374 = vector.extract_strided_slice %373 {offsets = [0, 0], sizes = [1, 128], strides = [1, 1]} : vector<1x512xf32> to vector<1x128xf32>
    %375 = arith.negf %374 : vector<1x128xf32>
    %376 = math.exp %375 : vector<1x128xf32>
    %cst_89 = arith.constant 1.000000e+00 : f32
    %377 = vector.broadcast %cst_89 : f32 to vector<1x128xf32>
    %378 = arith.addf %377, %376 : vector<1x128xf32>
    %379 = arith.divf %377, %378 : vector<1x128xf32>
    %380 = vector.extract_strided_slice %373 {offsets = [0, 128], sizes = [1, 128], strides = [1, 1]} : vector<1x512xf32> to vector<1x128xf32>
    %381 = arith.negf %380 : vector<1x128xf32>
    %382 = math.exp %381 : vector<1x128xf32>
    %cst_90 = arith.constant 1.000000e+00 : f32
    %383 = vector.broadcast %cst_90 : f32 to vector<1x128xf32>
    %384 = arith.addf %383, %382 : vector<1x128xf32>
    %385 = arith.divf %383, %384 : vector<1x128xf32>
    %386 = vector.extract_strided_slice %373 {offsets = [0, 256], sizes = [1, 128], strides = [1, 1]} : vector<1x512xf32> to vector<1x128xf32>
    %387 = math.tanh %386 : vector<1x128xf32>
    %388 = vector.extract_strided_slice %373 {offsets = [0, 384], sizes = [1, 128], strides = [1, 1]} : vector<1x512xf32> to vector<1x128xf32>
    %389 = arith.negf %388 : vector<1x128xf32>
    %390 = math.exp %389 : vector<1x128xf32>
    %cst_91 = arith.constant 1.000000e+00 : f32
    %391 = vector.broadcast %cst_91 : f32 to vector<1x128xf32>
    %392 = arith.addf %391, %390 : vector<1x128xf32>
    %393 = arith.divf %391, %392 : vector<1x128xf32>
    %394 = arith.mulf %385, %365 : vector<1x128xf32>
    %395 = arith.mulf %379, %387 : vector<1x128xf32>
    %396 = arith.addf %394, %395 : vector<1x128xf32>
    %397 = math.tanh %396 : vector<1x128xf32>
    %398 = arith.mulf %393, %397 : vector<1x128xf32>
    %399 = arith.index_cast %c2_i32_86 : i32 to index
    %c0_92 = arith.constant 0 : index
    %400 = vector.load %arg15[%399, %c0_92] : memref<10x128xf32, #tpu.memory_space<vmem>>, vector<1x128xf32>
    tpu.vector_store %arg15[%399, %c0_92], %398 {strides = array<i32>} : memref<10x128xf32, #tpu.memory_space<vmem>>, vector<1x128xf32>,
    %c3_i32_93 = arith.constant 3 : i32
    %401 = arith.index_cast %c3_i32_93 : i32 to index
    %c0_94 = arith.constant 0 : index
    %402 = vector.load %arg14[%401, %c0_94] : memref<10x512xf32, #tpu.memory_space<vmem>>, vector<1x512xf32>
    %cst_95 = arith.constant dense<0.000000e+00> : vector<1x512xf32>
    %403 = tpu.matmul %398, %15, %cst_95 {dimension_numbers = #tpu.dot_dimension_numbers<[1], [0], [0], [1], [0, 0, 1, 1], [], []>} : vector<1x128xf32>, vector<128x512xf32>, vector<1x512xf32> -> vector<1x512xf32>
    %404 = arith.addf %402, %403 : vector<1x512xf32>
    %405 = vector.extract_strided_slice %404 {offsets = [0, 0], sizes = [1, 128], strides = [1, 1]} : vector<1x512xf32> to vector<1x128xf32>
    %406 = arith.negf %405 : vector<1x128xf32>
    %407 = math.exp %406 : vector<1x128xf32>
    %cst_96 = arith.constant 1.000000e+00 : f32
    %408 = vector.broadcast %cst_96 : f32 to vector<1x128xf32>
    %409 = arith.addf %408, %407 : vector<1x128xf32>
    %410 = arith.divf %408, %409 : vector<1x128xf32>
    %411 = vector.extract_strided_slice %404 {offsets = [0, 128], sizes = [1, 128], strides = [1, 1]} : vector<1x512xf32> to vector<1x128xf32>
    %412 = arith.negf %411 : vector<1x128xf32>
    %413 = math.exp %412 : vector<1x128xf32>
    %cst_97 = arith.constant 1.000000e+00 : f32
    %414 = vector.broadcast %cst_97 : f32 to vector<1x128xf32>
    %415 = arith.addf %414, %413 : vector<1x128xf32>
    %416 = arith.divf %414, %415 : vector<1x128xf32>
    %417 = vector.extract_strided_slice %404 {offsets = [0, 256], sizes = [1, 128], strides = [1, 1]} : vector<1x512xf32> to vector<1x128xf32>
    %418 = math.tanh %417 : vector<1x128xf32>
    %419 = vector.extract_strided_slice %404 {offsets = [0, 384], sizes = [1, 128], strides = [1, 1]} : vector<1x512xf32> to vector<1x128xf32>
    %420 = arith.negf %419 : vector<1x128xf32>
    %421 = math.exp %420 : vector<1x128xf32>
    %cst_98 = arith.constant 1.000000e+00 : f32
    %422 = vector.broadcast %cst_98 : f32 to vector<1x128xf32>
    %423 = arith.addf %422, %421 : vector<1x128xf32>
    %424 = arith.divf %422, %423 : vector<1x128xf32>
    %425 = arith.mulf %416, %396 : vector<1x128xf32>
    %426 = arith.mulf %410, %418 : vector<1x128xf32>
    %427 = arith.addf %425, %426 : vector<1x128xf32>
    %428 = math.tanh %427 : vector<1x128xf32>
    %429 = arith.mulf %424, %428 : vector<1x128xf32>
    %430 = arith.index_cast %c3_i32_93 : i32 to index
    %c0_99 = arith.constant 0 : index
    %431 = vector.load %arg15[%430, %c0_99] : memref<10x128xf32, #tpu.memory_space<vmem>>, vector<1x128xf32>
    tpu.vector_store %arg15[%430, %c0_99], %429 {strides = array<i32>} : memref<10x128xf32, #tpu.memory_space<vmem>>, vector<1x128xf32>,
    %c4_i32_100 = arith.constant 4 : i32
    %432 = arith.index_cast %c4_i32_100 : i32 to index
    %c0_101 = arith.constant 0 : index
    %433 = vector.load %arg14[%432, %c0_101] : memref<10x512xf32, #tpu.memory_space<vmem>>, vector<1x512xf32>
    %cst_102 = arith.constant dense<0.000000e+00> : vector<1x512xf32>
    %434 = tpu.matmul %429, %15, %cst_102 {dimension_numbers = #tpu.dot_dimension_numbers<[1], [0], [0], [1], [0, 0, 1, 1], [], []>} : vector<1x128xf32>, vector<128x512xf32>, vector<1x512xf32> -> vector<1x512xf32>
    %435 = arith.addf %433, %434 : vector<1x512xf32>
    %436 = vector.extract_strided_slice %435 {offsets = [0, 0], sizes = [1, 128], strides = [1, 1]} : vector<1x512xf32> to vector<1x128xf32>
    %437 = arith.negf %436 : vector<1x128xf32>
    %438 = math.exp %437 : vector<1x128xf32>
    %cst_103 = arith.constant 1.000000e+00 : f32
    %439 = vector.broadcast %cst_103 : f32 to vector<1x128xf32>
    %440 = arith.addf %439, %438 : vector<1x128xf32>
    %441 = arith.divf %439, %440 : vector<1x128xf32>
    %442 = vector.extract_strided_slice %435 {offsets = [0, 128], sizes = [1, 128], strides = [1, 1]} : vector<1x512xf32> to vector<1x128xf32>
    %443 = arith.negf %442 : vector<1x128xf32>
    %444 = math.exp %443 : vector<1x128xf32>
    %cst_104 = arith.constant 1.000000e+00 : f32
    %445 = vector.broadcast %cst_104 : f32 to vector<1x128xf32>
    %446 = arith.addf %445, %444 : vector<1x128xf32>
    %447 = arith.divf %445, %446 : vector<1x128xf32>
    %448 = vector.extract_strided_slice %435 {offsets = [0, 256], sizes = [1, 128], strides = [1, 1]} : vector<1x512xf32> to vector<1x128xf32>
    %449 = math.tanh %448 : vector<1x128xf32>
    %450 = vector.extract_strided_slice %435 {offsets = [0, 384], sizes = [1, 128], strides = [1, 1]} : vector<1x512xf32> to vector<1x128xf32>
    %451 = arith.negf %450 : vector<1x128xf32>
    %452 = math.exp %451 : vector<1x128xf32>
    %cst_105 = arith.constant 1.000000e+00 : f32
    %453 = vector.broadcast %cst_105 : f32 to vector<1x128xf32>
    %454 = arith.addf %453, %452 : vector<1x128xf32>
    %455 = arith.divf %453, %454 : vector<1x128xf32>
    %456 = arith.mulf %447, %427 : vector<1x128xf32>
    %457 = arith.mulf %441, %449 : vector<1x128xf32>
    %458 = arith.addf %456, %457 : vector<1x128xf32>
    %459 = math.tanh %458 : vector<1x128xf32>
    %460 = arith.mulf %455, %459 : vector<1x128xf32>
    %461 = arith.index_cast %c4_i32_100 : i32 to index
    %c0_106 = arith.constant 0 : index
    %462 = vector.load %arg15[%461, %c0_106] : memref<10x128xf32, #tpu.memory_space<vmem>>, vector<1x128xf32>
    tpu.vector_store %arg15[%461, %c0_106], %460 {strides = array<i32>} : memref<10x128xf32, #tpu.memory_space<vmem>>, vector<1x128xf32>,
    %c5_i32_107 = arith.constant 5 : i32
    %463 = arith.index_cast %c5_i32_107 : i32 to index
    %c0_108 = arith.constant 0 : index
    %464 = vector.load %arg14[%463, %c0_108] : memref<10x512xf32, #tpu.memory_space<vmem>>, vector<1x512xf32>
    %cst_109 = arith.constant dense<0.000000e+00> : vector<1x512xf32>
    %465 = tpu.matmul %460, %15, %cst_109 {dimension_numbers = #tpu.dot_dimension_numbers<[1], [0], [0], [1], [0, 0, 1, 1], [], []>} : vector<1x128xf32>, vector<128x512xf32>, vector<1x512xf32> -> vector<1x512xf32>
    %466 = arith.addf %464, %465 : vector<1x512xf32>
    %467 = vector.extract_strided_slice %466 {offsets = [0, 0], sizes = [1, 128], strides = [1, 1]} : vector<1x512xf32> to vector<1x128xf32>
    %468 = arith.negf %467 : vector<1x128xf32>
    %469 = math.exp %468 : vector<1x128xf32>
    %cst_110 = arith.constant 1.000000e+00 : f32
    %470 = vector.broadcast %cst_110 : f32 to vector<1x128xf32>
    %471 = arith.addf %470, %469 : vector<1x128xf32>
    %472 = arith.divf %470, %471 : vector<1x128xf32>
    %473 = vector.extract_strided_slice %466 {offsets = [0, 128], sizes = [1, 128], strides = [1, 1]} : vector<1x512xf32> to vector<1x128xf32>
    %474 = arith.negf %473 : vector<1x128xf32>
    %475 = math.exp %474 : vector<1x128xf32>
    %cst_111 = arith.constant 1.000000e+00 : f32
    %476 = vector.broadcast %cst_111 : f32 to vector<1x128xf32>
    %477 = arith.addf %476, %475 : vector<1x128xf32>
    %478 = arith.divf %476, %477 : vector<1x128xf32>
    %479 = vector.extract_strided_slice %466 {offsets = [0, 256], sizes = [1, 128], strides = [1, 1]} : vector<1x512xf32> to vector<1x128xf32>
    %480 = math.tanh %479 : vector<1x128xf32>
    %481 = vector.extract_strided_slice %466 {offsets = [0, 384], sizes = [1, 128], strides = [1, 1]} : vector<1x512xf32> to vector<1x128xf32>
    %482 = arith.negf %481 : vector<1x128xf32>
    %483 = math.exp %482 : vector<1x128xf32>
    %cst_112 = arith.constant 1.000000e+00 : f32
    %484 = vector.broadcast %cst_112 : f32 to vector<1x128xf32>
    %485 = arith.addf %484, %483 : vector<1x128xf32>
    %486 = arith.divf %484, %485 : vector<1x128xf32>
    %487 = arith.mulf %478, %458 : vector<1x128xf32>
    %488 = arith.mulf %472, %480 : vector<1x128xf32>
    %489 = arith.addf %487, %488 : vector<1x128xf32>
    %490 = math.tanh %489 : vector<1x128xf32>
    %491 = arith.mulf %486, %490 : vector<1x128xf32>
    %492 = arith.index_cast %c5_i32_107 : i32 to index
    %c0_113 = arith.constant 0 : index
    %493 = vector.load %arg15[%492, %c0_113] : memref<10x128xf32, #tpu.memory_space<vmem>>, vector<1x128xf32>
    tpu.vector_store %arg15[%492, %c0_113], %491 {strides = array<i32>} : memref<10x128xf32, #tpu.memory_space<vmem>>, vector<1x128xf32>,
    %c6_i32_114 = arith.constant 6 : i32
    %494 = arith.index_cast %c6_i32_114 : i32 to index
    %c0_115 = arith.constant 0 : index
    %495 = vector.load %arg14[%494, %c0_115] : memref<10x512xf32, #tpu.memory_space<vmem>>, vector<1x512xf32>
    %cst_116 = arith.constant dense<0.000000e+00> : vector<1x512xf32>
    %496 = tpu.matmul %491, %15, %cst_116 {dimension_numbers = #tpu.dot_dimension_numbers<[1], [0], [0], [1], [0, 0, 1, 1], [], []>} : vector<1x128xf32>, vector<128x512xf32>, vector<1x512xf32> -> vector<1x512xf32>
    %497 = arith.addf %495, %496 : vector<1x512xf32>
    %498 = vector.extract_strided_slice %497 {offsets = [0, 0], sizes = [1, 128], strides = [1, 1]} : vector<1x512xf32> to vector<1x128xf32>
    %499 = arith.negf %498 : vector<1x128xf32>
    %500 = math.exp %499 : vector<1x128xf32>
    %cst_117 = arith.constant 1.000000e+00 : f32
    %501 = vector.broadcast %cst_117 : f32 to vector<1x128xf32>
    %502 = arith.addf %501, %500 : vector<1x128xf32>
    %503 = arith.divf %501, %502 : vector<1x128xf32>
    %504 = vector.extract_strided_slice %497 {offsets = [0, 128], sizes = [1, 128], strides = [1, 1]} : vector<1x512xf32> to vector<1x128xf32>
    %505 = arith.negf %504 : vector<1x128xf32>
    %506 = math.exp %505 : vector<1x128xf32>
    %cst_118 = arith.constant 1.000000e+00 : f32
    %507 = vector.broadcast %cst_118 : f32 to vector<1x128xf32>
    %508 = arith.addf %507, %506 : vector<1x128xf32>
    %509 = arith.divf %507, %508 : vector<1x128xf32>
    %510 = vector.extract_strided_slice %497 {offsets = [0, 256], sizes = [1, 128], strides = [1, 1]} : vector<1x512xf32> to vector<1x128xf32>
    %511 = math.tanh %510 : vector<1x128xf32>
    %512 = vector.extract_strided_slice %497 {offsets = [0, 384], sizes = [1, 128], strides = [1, 1]} : vector<1x512xf32> to vector<1x128xf32>
    %513 = arith.negf %512 : vector<1x128xf32>
    %514 = math.exp %513 : vector<1x128xf32>
    %cst_119 = arith.constant 1.000000e+00 : f32
    %515 = vector.broadcast %cst_119 : f32 to vector<1x128xf32>
    %516 = arith.addf %515, %514 : vector<1x128xf32>
    %517 = arith.divf %515, %516 : vector<1x128xf32>
    %518 = arith.mulf %509, %489 : vector<1x128xf32>
    %519 = arith.mulf %503, %511 : vector<1x128xf32>
    %520 = arith.addf %518, %519 : vector<1x128xf32>
    %521 = math.tanh %520 : vector<1x128xf32>
    %522 = arith.mulf %517, %521 : vector<1x128xf32>
    %523 = arith.index_cast %c6_i32_114 : i32 to index
    %c0_120 = arith.constant 0 : index
    %524 = vector.load %arg15[%523, %c0_120] : memref<10x128xf32, #tpu.memory_space<vmem>>, vector<1x128xf32>
    tpu.vector_store %arg15[%523, %c0_120], %522 {strides = array<i32>} : memref<10x128xf32, #tpu.memory_space<vmem>>, vector<1x128xf32>,
    %c7_i32_121 = arith.constant 7 : i32
    %525 = arith.index_cast %c7_i32_121 : i32 to index
    %c0_122 = arith.constant 0 : index
    %526 = vector.load %arg14[%525, %c0_122] : memref<10x512xf32, #tpu.memory_space<vmem>>, vector<1x512xf32>
    %cst_123 = arith.constant dense<0.000000e+00> : vector<1x512xf32>
    %527 = tpu.matmul %522, %15, %cst_123 {dimension_numbers = #tpu.dot_dimension_numbers<[1], [0], [0], [1], [0, 0, 1, 1], [], []>} : vector<1x128xf32>, vector<128x512xf32>, vector<1x512xf32> -> vector<1x512xf32>
    %528 = arith.addf %526, %527 : vector<1x512xf32>
    %529 = vector.extract_strided_slice %528 {offsets = [0, 0], sizes = [1, 128], strides = [1, 1]} : vector<1x512xf32> to vector<1x128xf32>
    %530 = arith.negf %529 : vector<1x128xf32>
    %531 = math.exp %530 : vector<1x128xf32>
    %cst_124 = arith.constant 1.000000e+00 : f32
    %532 = vector.broadcast %cst_124 : f32 to vector<1x128xf32>
    %533 = arith.addf %532, %531 : vector<1x128xf32>
    %534 = arith.divf %532, %533 : vector<1x128xf32>
    %535 = vector.extract_strided_slice %528 {offsets = [0, 128], sizes = [1, 128], strides = [1, 1]} : vector<1x512xf32> to vector<1x128xf32>
    %536 = arith.negf %535 : vector<1x128xf32>
    %537 = math.exp %536 : vector<1x128xf32>
    %cst_125 = arith.constant 1.000000e+00 : f32
    %538 = vector.broadcast %cst_125 : f32 to vector<1x128xf32>
    %539 = arith.addf %538, %537 : vector<1x128xf32>
    %540 = arith.divf %538, %539 : vector<1x128xf32>
    %541 = vector.extract_strided_slice %528 {offsets = [0, 256], sizes = [1, 128], strides = [1, 1]} : vector<1x512xf32> to vector<1x128xf32>
    %542 = math.tanh %541 : vector<1x128xf32>
    %543 = vector.extract_strided_slice %528 {offsets = [0, 384], sizes = [1, 128], strides = [1, 1]} : vector<1x512xf32> to vector<1x128xf32>
    %544 = arith.negf %543 : vector<1x128xf32>
    %545 = math.exp %544 : vector<1x128xf32>
    %cst_126 = arith.constant 1.000000e+00 : f32
    %546 = vector.broadcast %cst_126 : f32 to vector<1x128xf32>
    %547 = arith.addf %546, %545 : vector<1x128xf32>
    %548 = arith.divf %546, %547 : vector<1x128xf32>
    %549 = arith.mulf %540, %520 : vector<1x128xf32>
    %550 = arith.mulf %534, %542 : vector<1x128xf32>
    %551 = arith.addf %549, %550 : vector<1x128xf32>
    %552 = math.tanh %551 : vector<1x128xf32>
    %553 = arith.mulf %548, %552 : vector<1x128xf32>
    %554 = arith.index_cast %c7_i32_121 : i32 to index
    %c0_127 = arith.constant 0 : index
    %555 = vector.load %arg15[%554, %c0_127] : memref<10x128xf32, #tpu.memory_space<vmem>>, vector<1x128xf32>
    tpu.vector_store %arg15[%554, %c0_127], %553 {strides = array<i32>} : memref<10x128xf32, #tpu.memory_space<vmem>>, vector<1x128xf32>,
    %c8_i32_128 = arith.constant 8 : i32
    %556 = arith.index_cast %c8_i32_128 : i32 to index
    %c0_129 = arith.constant 0 : index
    %557 = vector.load %arg14[%556, %c0_129] : memref<10x512xf32, #tpu.memory_space<vmem>>, vector<1x512xf32>
    %cst_130 = arith.constant dense<0.000000e+00> : vector<1x512xf32>
    %558 = tpu.matmul %553, %15, %cst_130 {dimension_numbers = #tpu.dot_dimension_numbers<[1], [0], [0], [1], [0, 0, 1, 1], [], []>} : vector<1x128xf32>, vector<128x512xf32>, vector<1x512xf32> -> vector<1x512xf32>
    %559 = arith.addf %557, %558 : vector<1x512xf32>
    %560 = vector.extract_strided_slice %559 {offsets = [0, 0], sizes = [1, 128], strides = [1, 1]} : vector<1x512xf32> to vector<1x128xf32>
    %561 = arith.negf %560 : vector<1x128xf32>
    %562 = math.exp %561 : vector<1x128xf32>
    %cst_131 = arith.constant 1.000000e+00 : f32
    %563 = vector.broadcast %cst_131 : f32 to vector<1x128xf32>
    %564 = arith.addf %563, %562 : vector<1x128xf32>
    %565 = arith.divf %563, %564 : vector<1x128xf32>
    %566 = vector.extract_strided_slice %559 {offsets = [0, 128], sizes = [1, 128], strides = [1, 1]} : vector<1x512xf32> to vector<1x128xf32>
    %567 = arith.negf %566 : vector<1x128xf32>
    %568 = math.exp %567 : vector<1x128xf32>
    %cst_132 = arith.constant 1.000000e+00 : f32
    %569 = vector.broadcast %cst_132 : f32 to vector<1x128xf32>
    %570 = arith.addf %569, %568 : vector<1x128xf32>
    %571 = arith.divf %569, %570 : vector<1x128xf32>
    %572 = vector.extract_strided_slice %559 {offsets = [0, 256], sizes = [1, 128], strides = [1, 1]} : vector<1x512xf32> to vector<1x128xf32>
    %573 = math.tanh %572 : vector<1x128xf32>
    %574 = vector.extract_strided_slice %559 {offsets = [0, 384], sizes = [1, 128], strides = [1, 1]} : vector<1x512xf32> to vector<1x128xf32>
    %575 = arith.negf %574 : vector<1x128xf32>
    %576 = math.exp %575 : vector<1x128xf32>
    %cst_133 = arith.constant 1.000000e+00 : f32
    %577 = vector.broadcast %cst_133 : f32 to vector<1x128xf32>
    %578 = arith.addf %577, %576 : vector<1x128xf32>
    %579 = arith.divf %577, %578 : vector<1x128xf32>
    %580 = arith.mulf %571, %551 : vector<1x128xf32>
    %581 = arith.mulf %565, %573 : vector<1x128xf32>
    %582 = arith.addf %580, %581 : vector<1x128xf32>
    %583 = math.tanh %582 : vector<1x128xf32>
    %584 = arith.mulf %579, %583 : vector<1x128xf32>
    %585 = arith.index_cast %c8_i32_128 : i32 to index
    %c0_134 = arith.constant 0 : index
    %586 = vector.load %arg15[%585, %c0_134] : memref<10x128xf32, #tpu.memory_space<vmem>>, vector<1x128xf32>
    tpu.vector_store %arg15[%585, %c0_134], %584 {strides = array<i32>} : memref<10x128xf32, #tpu.memory_space<vmem>>, vector<1x128xf32>,
    %c9_i32_135 = arith.constant 9 : i32
    %587 = arith.index_cast %c9_i32_135 : i32 to index
    %c0_136 = arith.constant 0 : index
    %588 = vector.load %arg14[%587, %c0_136] : memref<10x512xf32, #tpu.memory_space<vmem>>, vector<1x512xf32>
    %cst_137 = arith.constant dense<0.000000e+00> : vector<1x512xf32>
    %589 = tpu.matmul %584, %15, %cst_137 {dimension_numbers = #tpu.dot_dimension_numbers<[1], [0], [0], [1], [0, 0, 1, 1], [], []>} : vector<1x128xf32>, vector<128x512xf32>, vector<1x512xf32> -> vector<1x512xf32>
    %590 = arith.addf %588, %589 : vector<1x512xf32>
    %591 = vector.extract_strided_slice %590 {offsets = [0, 0], sizes = [1, 128], strides = [1, 1]} : vector<1x512xf32> to vector<1x128xf32>
    %592 = arith.negf %591 : vector<1x128xf32>
    %593 = math.exp %592 : vector<1x128xf32>
    %cst_138 = arith.constant 1.000000e+00 : f32
    %594 = vector.broadcast %cst_138 : f32 to vector<1x128xf32>
    %595 = arith.addf %594, %593 : vector<1x128xf32>
    %596 = arith.divf %594, %595 : vector<1x128xf32>
    %597 = vector.extract_strided_slice %590 {offsets = [0, 128], sizes = [1, 128], strides = [1, 1]} : vector<1x512xf32> to vector<1x128xf32>
    %598 = arith.negf %597 : vector<1x128xf32>
    %599 = math.exp %598 : vector<1x128xf32>
    %cst_139 = arith.constant 1.000000e+00 : f32
    %600 = vector.broadcast %cst_139 : f32 to vector<1x128xf32>
    %601 = arith.addf %600, %599 : vector<1x128xf32>
    %602 = arith.divf %600, %601 : vector<1x128xf32>
    %603 = vector.extract_strided_slice %590 {offsets = [0, 256], sizes = [1, 128], strides = [1, 1]} : vector<1x512xf32> to vector<1x128xf32>
    %604 = math.tanh %603 : vector<1x128xf32>
    %605 = vector.extract_strided_slice %590 {offsets = [0, 384], sizes = [1, 128], strides = [1, 1]} : vector<1x512xf32> to vector<1x128xf32>
    %606 = arith.negf %605 : vector<1x128xf32>
    %607 = math.exp %606 : vector<1x128xf32>
    %cst_140 = arith.constant 1.000000e+00 : f32
    %608 = vector.broadcast %cst_140 : f32 to vector<1x128xf32>
    %609 = arith.addf %608, %607 : vector<1x128xf32>
    %610 = arith.divf %608, %609 : vector<1x128xf32>
    %611 = arith.mulf %602, %582 : vector<1x128xf32>
    %612 = arith.mulf %596, %604 : vector<1x128xf32>
    %613 = arith.addf %611, %612 : vector<1x128xf32>
    %614 = math.tanh %613 : vector<1x128xf32>
    %615 = arith.mulf %610, %614 : vector<1x128xf32>
    %616 = arith.index_cast %c9_i32_135 : i32 to index
    %c0_141 = arith.constant 0 : index
    %617 = vector.load %arg15[%616, %c0_141] : memref<10x128xf32, #tpu.memory_space<vmem>>, vector<1x128xf32>
    tpu.vector_store %arg15[%616, %c0_141], %615 {strides = array<i32>} : memref<10x128xf32, #tpu.memory_space<vmem>>, vector<1x128xf32>,
    %c10_i32_142 = arith.constant 10 : i32
    %c0_143 = arith.constant 0 : index
    %c0_144 = arith.constant 0 : index
    %618 = vector.load %arg11[%c0_143, %c0_144] : memref<1x128xf32, #tpu.memory_space<vmem>>, vector<1x128xf32>
    tpu.vector_store %arg11[%c0_143, %c0_144], %615 {strides = array<i32>} : memref<1x128xf32, #tpu.memory_space<vmem>>, vector<1x128xf32>,
    %c0_145 = arith.constant 0 : index
    %c0_146 = arith.constant 0 : index
    %619 = vector.load %arg12[%c0_145, %c0_146] : memref<1x128xf32, #tpu.memory_space<vmem>>, vector<1x128xf32>
    tpu.vector_store %arg12[%c0_145, %c0_146], %613 {strides = array<i32>} : memref<1x128xf32, #tpu.memory_space<vmem>>, vector<1x128xf32>,
    %c0_147 = arith.constant 0 : index
    %c0_148 = arith.constant 0 : index
    %620 = vector.load %arg15[%c0_147, %c0_148] : memref<10x128xf32, #tpu.memory_space<vmem>>, vector<10x128xf32>
    %c0_149 = arith.constant 0 : index
    %c0_150 = arith.constant 0 : index
    %621 = vector.load %arg8[%c0_149, %c0_150] : memref<128x128xf32, #tpu.memory_space<vmem>>, vector<128x128xf32>
    %cst_151 = arith.constant dense<0.000000e+00> : vector<10x128xf32>
    %622 = tpu.matmul %620, %621, %cst_151 {dimension_numbers = #tpu.dot_dimension_numbers<[1], [0], [0], [1], [0, 0, 1, 1], [], []>} : vector<10x128xf32>, vector<128x128xf32>, vector<10x128xf32> -> vector<10x128xf32>
    %c0_152 = arith.constant 0 : index
    %c0_153 = arith.constant 0 : index
    %623 = vector.load %arg9[%c0_152, %c0_153] : memref<1x128xf32, #tpu.memory_space<vmem>>, vector<1x128xf32>
    %624 = vector.broadcast %623 : vector<1x128xf32> to vector<10x128xf32>
    %625 = arith.addf %622, %624 : vector<10x128xf32>
    %cst_154 = arith.constant dense<0xFF800000> : vector<10xf32>
    %626 = vector.multi_reduction <maximumf>, %625, %cst_154 [1] : vector<10x128xf32> to vector<10xf32>
    %627 = vector.shape_cast %626 : vector<10xf32> to vector<10x1xf32>
    %628 = vector.broadcast %627 : vector<10x1xf32> to vector<10x128xf32>
    %629 = arith.subf %625, %628 : vector<10x128xf32>
    %630 = math.exp %629 : vector<10x128xf32>
    %cst_155 = arith.constant dense<0.000000e+00> : vector<10xf32>
    %631 = vector.multi_reduction <add>, %630, %cst_155 [1] : vector<10x128xf32> to vector<10xf32>
    %632 = vector.shape_cast %631 : vector<10xf32> to vector<10x1xf32>
    %633 = math.log %632 : vector<10x1xf32>
    %634 = arith.addf %633, %627 : vector<10x1xf32>
    %635 = vector.broadcast %634 : vector<10x1xf32> to vector<10x128xf32>
    %636 = arith.subf %625, %635 : vector<10x128xf32>
    %c0_156 = arith.constant 0 : index
    %c0_157 = arith.constant 0 : index
    %637 = vector.load %arg10[%c0_156, %c0_157] : memref<10x128xf32, #tpu.memory_space<vmem>>, vector<10x128xf32>
    tpu.vector_store %arg10[%c0_156, %c0_157], %636 {strides = array<i32>} : memref<10x128xf32, #tpu.memory_space<vmem>>, vector<10x128xf32>,
    return
  }
}

</mosaic_0001>

<bundles_post_ra>
// kernel: tpu_custom_call.1
= control target key start
LH: loop header
LB: loop body
LE: loop exit
PB: predicated region body
PF: predicated region fallthrough
CT: control target
= control target key end

     0   :  { %18 = vsyncpa [#allocation6], 0  ;;  %s7978_s0 = inlined_call_operand.hbm [shape: f32[10,128], index: 0, kind: input, shape index: {}]   ;;  %s7979_s1 = inlined_call_operand.hbm [shape: f32[128,512], index: 1, kind: input, shape index: {}]   ;;  %s7980_s2 = inlined_call_operand.hbm [shape: f32[128,512], index: 2, kind: input, shape index: {}]   ;;  %s7981_s3 = inlined_call_operand.vmem [shape: f32[1,512], index: 3, kind: input, shape index: {}]   ;;  %s7982_s4 = inlined_call_operand.hbm [shape: f32[10,128], index: 4, kind: input, shape index: {}]   ;;  %s7983_s5 = inlined_call_operand.hbm [shape: f32[128,512], index: 5, kind: input, shape index: {}]   ;;  %s7984_s6 = inlined_call_operand.hbm [shape: f32[128,512], index: 6, kind: input, shape index: {}]   ;;  %s7985_s7 = inlined_call_operand.vmem [shape: f32[1,512], index: 7, kind: input, shape index: {}]   ;;  %s7986_s8 = inlined_call_operand.hbm [shape: f32[128,128], index: 8, kind: input, shape index: {}]   ;;  %s7987_s9 = inlined_call_operand.vmem [shape: f32[1,128], index: 9, kind: input, shape index: {}]   ;;  %s7988_s10 = inlined_call_operand.hbm [shape: f32[10,128], index: 10, kind: output, shape index: {0}]   ;;  %s7989_s11 = inlined_call_operand.hbm [shape: f32[1,128], index: 11, kind: output, shape index: {1}]   ;;  %s7990_s12 = inlined_call_operand.hbm [shape: f32[1,128], index: 12, kind: output, shape index: {2}]  }
   0x1   :  { %19 = vsyncpa [#allocation9], 0 }
   0x2   :  { %20 = vsyncpa [#allocation12], 0 }
   0x3   :  { %21 = vsyncpa [#allocation15], 0 }
   0x4   :  { %22 = vsyncpa [#allocation7], 0 }
   0x5   :  { %23 = vsyncpa [#allocation19], 0  ;;  %s5869_s21 = smov [#allocation8]  }
   0x6   :  { %s41_s22 = sshll.u32 %s5869_s21, 4  ;;  %s42_s22 = int_to_ptr.vmem [resolvable:$true] %s41_s22 }
   0x7   :  { %s5665_s23 = scalar_lea.vmem %s42_s22, 8192  ;;  %p5670_p1 = scmp.lt.s32.totalorder %s42_s22, %s42_s22 }
   0x8   :  { %p5666_p0 = scmp.ne.s32.totalorder %s42_s22, %s5665_s23  ;;  %p5671_p2 = scmp.lt.s32.totalorder %s5665_s23, %s5665_s23 }
   0xa   :  { %p5672_p3 = por %p5671_p2, %p5670_p1 }
   0xc   :  { %p5673_p4 = pnand %p5672_p3, %p5666_p0 }
   0xe   :  { %5676 = shalt.err (!%p5673_p4)
}
   0xf   :  { %s5870_s24 = smov 512   ;;  %s5871_s25 = smov 32  }
  0x10   :  { %47 = dma.hbm_to_vmem [thread:$0]  %s7979_s1, 8192, %s42_s22, [#allocation9], %s5870_s24, %s5870_s24, %s5871_s25  }
  0x11   :  { %s5872_s28 = smov [#allocation11]   ;;  %s5873_s30 = smov [#allocation14]  }
  0x12   :  { %s67_s29 = sshll.u32 %s5872_s28, 4  ;;  %s91_s13 = sshll.u32 %s5873_s30, 4  ;;  %s68_s29 = int_to_ptr.vmem [resolvable:$true] %s67_s29  ;;  %s92_s13 = int_to_ptr.vmem [resolvable:$true] %s91_s13 }
  0x13   :  { %s5685_s14 = scalar_lea.vmem %s68_s29, 256  ;;  %p5690_p6 = scmp.lt.s32.totalorder %s68_s29, %s68_s29 }
  0x14   :  { %p5686_p5 = scmp.ne.s32.totalorder %s68_s29, %s5685_s14  ;;  %p5691_p7 = scmp.lt.s32.totalorder %s5685_s14, %s5685_s14 }
  0x16   :  { %p5692_p8 = por %p5691_p7, %p5690_p6 }
  0x18   :  { %p5693_p9 = pnand %p5692_p8, %p5686_p5 }
  0x1a   :  { %5696 = shalt.err (!%p5693_p9)
}
  0x1b   :  { %s5874_s15 = smov 128   ;;  %s5875_s16 = smov 8  }
  0x1c   :  { %73 = dma.hbm_to_vmem [thread:$0]  %s7982_s4, 256, %s68_s29, [#allocation12], %s5874_s15, %s5874_s15, %s5875_s16  }
  0x1d   :  { %s5705_s1 = scalar_lea.vmem %s92_s13, 8192  ;;  %p5710_p11 = scmp.lt.s32.totalorder %s92_s13, %s92_s13 }
  0x1e   :  { %p5706_p10 = scmp.ne.s32.totalorder %s92_s13, %s5705_s1  ;;  %p5711_p12 = scmp.lt.s32.totalorder %s5705_s1, %s5705_s1 }
  0x20   :  { %p5712_p13 = por %p5711_p12, %p5710_p11 }
  0x22   :  { %p5713_p0 = pnand %p5712_p13, %p5706_p10 }
  0x24   :  { %5716 = shalt.err (!%p5713_p0)
}
  0x25   :  { %97 = dma.hbm_to_vmem [thread:$0]  %s7984_s6, 8192, %s92_s13, [#allocation15], %s5870_s24, %s5870_s24, %s5871_s25  }
  0x26   :  { %s5876_s21 = smov [#allocation5]   ;;  %s5877_s23 = smov [#allocation10]  }
  0x27   :  { %s29_s22 = sshll.u32 %s5876_s21, 4  ;;  %s53_s4 = sshll.u32 %s5877_s23, 4  ;;  %s30_s22 = int_to_ptr.vmem [resolvable:$true] %s29_s22  ;;  %s54_s4 = int_to_ptr.vmem [resolvable:$true] %s53_s4 }
  0x28   :  { %s5725_s26 = scalar_lea.vmem %s30_s22, 256  ;;  %p5730_p2 = scmp.lt.s32.totalorder %s30_s22, %s30_s22 }
  0x29   :  { %p5726_p1 = scmp.ne.s32.totalorder %s30_s22, %s5725_s26  ;;  %p5731_p3 = scmp.lt.s32.totalorder %s5725_s26, %s5725_s26 }
  0x2b   :  { %p5732_p4 = por %p5731_p3, %p5730_p2 }
  0x2d   :  { %p5733_p5 = pnand %p5732_p4, %p5726_p1 }
  0x2f   :  { %5736 = shalt.err (!%p5733_p5)
}
  0x30   :  { %35 = dma.hbm_to_vmem [thread:$0]  %s7978_s0, 256, %s30_s22, [#allocation6], %s5874_s15, %s5874_s15, %s5875_s16  }
  0x31   :  { %s5745_s6 = scalar_lea.vmem %s54_s4, 8192  ;;  %p5750_p7 = scmp.lt.s32.totalorder %s54_s4, %s54_s4 }
  0x32   :  { %p5746_p6 = scmp.ne.s32.totalorder %s54_s4, %s5745_s6  ;;  %p5751_p8 = scmp.lt.s32.totalorder %s5745_s6, %s5745_s6 }
  0x34   :  { %p5752_p9 = por %p5751_p8, %p5750_p7 }
  0x36   :  { %p5753_p10 = pnand %p5752_p9, %p5746_p6 }
  0x38   :  { %5756 = shalt.err (!%p5753_p10)
}
  0x39   :  { %59 = dma.hbm_to_vmem [thread:$0]  %s7980_s2, 8192, %s54_s4, [#allocation9], %s5870_s24, %s5870_s24, %s5871_s25  }
  0x3a   :  { %s5878_s13 = smov [#allocation13]   ;;  %s5879_s17 = smov [#allocation16]  }
  0x3b   :  { %s79_s14 = sshll.u32 %s5878_s13, 4  ;;  %s105_s0 = sshll.u32 %s5879_s17, 4  ;;  %s80_s14 = int_to_ptr.vmem [resolvable:$true] %s79_s14  ;;  %s106_s0 = int_to_ptr.vmem [resolvable:$true] %s105_s0 }
  0x3c   :  { %s5765_s18 = scalar_lea.vmem %s80_s14, 8192  ;;  %p5770_p12 = scmp.lt.s32.totalorder %s80_s14, %s80_s14 }
  0x3d   :  { %p5766_p11 = scmp.ne.s32.totalorder %s80_s14, %s5765_s18  ;;  %p5771_p13 = scmp.lt.s32.totalorder %s5765_s18, %s5765_s18 }
  0x3f   :  { %p5772_p0 = por %p5771_p13, %p5770_p12 }
  0x41   :  { %p5773_p1 = pnand %p5772_p0, %p5766_p11 }
  0x43   :  { %5776 = shalt.err (!%p5773_p1)
}
  0x44   :  { %85 = dma.hbm_to_vmem [thread:$0]  %s7983_s5, 8192, %s80_s14, [#allocation12], %s5870_s24, %s5870_s24, %s5871_s25  }
  0x45   :  { %s5785_s2 = scalar_lea.vmem %s106_s0, 2048  ;;  %p5790_p3 = scmp.lt.s32.totalorder %s106_s0, %s106_s0 }
  0x46   :  { %p5786_p2 = scmp.ne.s32.totalorder %s106_s0, %s5785_s2  ;;  %p5791_p4 = scmp.lt.s32.totalorder %s5785_s2, %s5785_s2 }
  0x48   :  { %p5792_p5 = por %p5791_p4, %p5790_p3 }
  0x4a   :  { %p5793_p6 = pnand %p5792_p5, %p5786_p2 }
  0x4c   :  { %5796 = shalt.err (!%p5793_p6)
}
  0x4d   :  { %111 = dma.hbm_to_vmem [thread:$0]  %s7986_s8, 2048, %s106_s0, [#allocation15], %s5874_s15, %s5874_s15, %s5875_s16  }
  0x4e   :  { %5857 = dma.done.wait [#allocation6], 256  }
  0x4f   :  { %5858 = vsyncadd [#allocation6], 4294967040 }
  0x50   :  { %5859 = dma.done.wait [#allocation9], 16384  }
  0x51   :  { %5860 = vsyncadd [#allocation9], 4294950912 }
  0x52   :  { %5861 = dma.done.wait [#allocation12], 8448  }
  0x53   :  { %5862 = vsyncadd [#allocation12], 4294958848 }
  0x54   :  { %5863 = dma.done.wait [#allocation15], 10240  }
  0x55   :  { %5864 = vsyncadd [#allocation15], 4294957056  ;;  %v7991_v0 = vmov 0.0   ;;  %v198_v1 = vld [vmem:[#allocation8 + $0x1e8] sm:$0xff]  ;;  %v200_v2 = vld [vmem:[#allocation8 + $0x1f8] sm:$0xff]  ;;  %vm4975_vm0 = vcmask 1041408  }
  0x56   :  { %287 = vmatprep.mubr.f32.mxu0 %v7991_v0  ;;  %364 = vmatprep.mubr.f32.mxu1 %v7991_v0  ;;  %v197_v3 = vld [vmem:[#allocation8 + $0x1e0] sm:$0xff]  ;;  %v199_v4 = vld [vmem:[#allocation8 + $0x1f0] sm:$0xff]  ;;  %v194_v5 = vld [vmem:[#allocation8 + $0x1c8] sm:$0xff] }
  0x57   :  { %223 = vmatprep.subr.mxu0 %v198_v1  ;;  %300 = vmatprep.subr.mxu1 %v200_v2  ;;  %v196_v6 = vld [vmem:[#allocation8 + $0x1d8] sm:$0xff]  ;;  %v193_v7 = vld [vmem:[#allocation8 + $0x1c0] sm:$0xff]  ;;  %v195_v8 = vld [vmem:[#allocation8 + $0x1d0] sm:$0xff] }
  0x58   :  { %224 = vmatpush1.msra.mxu0 %v197_v3  ;;  %301 = vmatpush1.msra.mxu1 %v199_v4  ;;  %v190_v9 = vld [vmem:[#allocation8 + $0x1a8] sm:$0xff]  ;;  %v192_v10 = vld [vmem:[#allocation8 + $0x1b8] sm:$0xff]  ;;  %v189_v11 = vld [vmem:[#allocation8 + $0x1a0] sm:$0xff] }
  0x59   :  { %225 = vmatprep.subr.mxu0 %v194_v5  ;;  %302 = vmatprep.subr.mxu1 %v196_v6  ;;  %v191_v12 = vld [vmem:[#allocation8 + $0x1b0] sm:$0xff]  ;;  %v186_v13 = vld [vmem:[#allocation8 + $0x188] sm:$0xff]  ;;  %v188_v14 = vld [vmem:[#allocation8 + $0x198] sm:$0xff] }
  0x5a   :  { %226 = vmatpush1.msra.mxu0 %v193_v7  ;;  %303 = vmatpush1.msra.mxu1 %v195_v8  ;;  %v185_v15 = vld [vmem:[#allocation8 + $0x180] sm:$0xff]  ;;  %v187_v16 = vld [vmem:[#allocation8 + $0x190] sm:$0xff]  ;;  %v182_v17 = vld [vmem:[#allocation8 + $0x168] sm:$0xff] }
  0x5b   :  { %227 = vmatprep.subr.mxu0 %v190_v9  ;;  %304 = vmatprep.subr.mxu1 %v192_v10  ;;  %v184_v18 = vld [vmem:[#allocation8 + $0x178] sm:$0xff]  ;;  %v181_v19 = vld [vmem:[#allocation8 + $0x160] sm:$0xff]  ;;  %v183_v20 = vld [vmem:[#allocation8 + $0x170] sm:$0xff] }
  0x5c   :  { %228 = vmatpush1.msra.mxu0 %v189_v11  ;;  %305 = vmatpush1.msra.mxu1 %v191_v12  ;;  %v178_v21 = vld [vmem:[#allocation8 + $0x148] sm:$0xff]  ;;  %v180_v22 = vld [vmem:[#allocation8 + $0x158] sm:$0xff]  ;;  %v177_v23 = vld [vmem:[#allocation8 + $0x140] sm:$0xff] }
  0x5d   :  { %229 = vmatprep.subr.mxu0 %v186_v13  ;;  %306 = vmatprep.subr.mxu1 %v188_v14  ;;  %v179_v24 = vld [vmem:[#allocation8 + $0x150] sm:$0xff]  ;;  %v174_v25 = vld [vmem:[#allocation8 + $0x128] sm:$0xff]  ;;  %v176_v26 = vld [vmem:[#allocation8 + $0x138] sm:$0xff] }
  0x5e   :  { %230 = vmatpush1.msra.mxu0 %v185_v15  ;;  %307 = vmatpush1.msra.mxu1 %v187_v16  ;;  %v173_v27 = vld [vmem:[#allocation8 + $0x120] sm:$0xff]  ;;  %v175_v28 = vld [vmem:[#allocation8 + $0x130] sm:$0xff]  ;;  %v170_v29 = vld [vmem:[#allocation8 + $0x108] sm:$0xff] }
  0x5f   :  { %231 = vmatprep.subr.mxu0 %v182_v17  ;;  %308 = vmatprep.subr.mxu1 %v184_v18  ;;  %v172_v30 = vld [vmem:[#allocation8 + $0x118] sm:$0xff]  ;;  %v169_v31 = vld [vmem:[#allocation8 + $0x100] sm:$0xff]  ;;  %v171_v32 = vld [vmem:[#allocation8 + $0x110] sm:$0xff] }
  0x60   :  { %232 = vmatpush1.msra.mxu0 %v181_v19  ;;  %309 = vmatpush1.msra.mxu1 %v183_v20  ;;  %v166_v33 = vld [vmem:[#allocation8 + $0xe8] sm:$0xff]  ;;  %v168_v34 = vld [vmem:[#allocation8 + $0xf8] sm:$0xff]  ;;  %v165_v35 = vld [vmem:[#allocation8 + $0xe0] sm:$0xff] }
  0x61   :  { %233 = vmatprep.subr.mxu0 %v178_v21  ;;  %310 = vmatprep.subr.mxu1 %v180_v22  ;;  %v167_v36 = vld [vmem:[#allocation8 + $0xf0] sm:$0xff]  ;;  %v162_v37 = vld [vmem:[#allocation8 + $0xc8] sm:$0xff]  ;;  %v164_v38 = vld [vmem:[#allocation8 + $0xd8] sm:$0xff] }
  0x62   :  { %234 = vmatpush1.msra.mxu0 %v177_v23  ;;  %311 = vmatpush1.msra.mxu1 %v179_v24  ;;  %v161_v39 = vld [vmem:[#allocation8 + $0xc0] sm:$0xff]  ;;  %v163_v40 = vld [vmem:[#allocation8 + $0xd0] sm:$0xff]  ;;  %v158_v41 = vld [vmem:[#allocation8 + $0xa8] sm:$0xff] }
  0x63   :  { %235 = vmatprep.subr.mxu0 %v174_v25  ;;  %312 = vmatprep.subr.mxu1 %v176_v26  ;;  %v160_v42 = vld [vmem:[#allocation8 + $0xb8] sm:$0xff]  ;;  %v157_v43 = vld [vmem:[#allocation8 + $0xa0] sm:$0xff]  ;;  %v159_v44 = vld [vmem:[#allocation8 + $0xb0] sm:$0xff] }
  0x64   :  { %236 = vmatpush1.msra.mxu0 %v173_v27  ;;  %313 = vmatpush1.msra.mxu1 %v175_v28  ;;  %v154_v45 = vld [vmem:[#allocation8 + $0x88] sm:$0xff]  ;;  %v156_v46 = vld [vmem:[#allocation8 + $0x98] sm:$0xff]  ;;  %v153_v47 = vld [vmem:[#allocation8 + $0x80] sm:$0xff] }
  0x65   :  { %237 = vmatprep.subr.mxu0 %v170_v29  ;;  %314 = vmatprep.subr.mxu1 %v172_v30  ;;  %v155_v48 = vld [vmem:[#allocation8 + $0x90] sm:$0xff]  ;;  %v150_v49 = vld [vmem:[#allocation8 + $0x68] sm:$0xff]  ;;  %v152_v50 = vld [vmem:[#allocation8 + $0x78] sm:$0xff] }
  0x66   :  { %238 = vmatpush1.msra.mxu0 %v169_v31  ;;  %315 = vmatpush1.msra.mxu1 %v171_v32  ;;  %v149_v51 = vld [vmem:[#allocation8 + $0x60] sm:$0xff]  ;;  %v151_v52 = vld [vmem:[#allocation8 + $0x70] sm:$0xff]  ;;  %v146_v53 = vld [vmem:[#allocation8 + $0x48] sm:$0xff] }
  0x67   :  { %239 = vmatprep.subr.mxu0 %v166_v33  ;;  %316 = vmatprep.subr.mxu1 %v168_v34  ;;  %v148_v54 = vld [vmem:[#allocation8 + $0x58] sm:$0xff]  ;;  %v145_v55 = vld [vmem:[#allocation8 + $0x40] sm:$0xff]  ;;  %v147_v56 = vld [vmem:[#allocation8 + $0x50] sm:$0xff] }
  0x68   :  { %240 = vmatpush1.msra.mxu0 %v165_v35  ;;  %317 = vmatpush1.msra.mxu1 %v167_v36  ;;  %v142_v57 = vld [vmem:[#allocation8 + $0x28] sm:$0xff]  ;;  %v144_v58 = vld [vmem:[#allocation8 + $0x38] sm:$0xff]  ;;  %v141_v59 = vld [vmem:[#allocation8 + $0x20] sm:$0xff] }
  0x69   :  { %241 = vmatprep.subr.mxu0 %v162_v37  ;;  %318 = vmatprep.subr.mxu1 %v164_v38  ;;  %v143_v60 = vld [vmem:[#allocation8 + $0x30] sm:$0xff]  ;;  %v138_v61 = vld [vmem:[#allocation8 + $0x8] sm:$0xff]  ;;  %v140_v62 = vld [vmem:[#allocation8 + $0x18] sm:$0xff] }
  0x6a   :  { %242 = vmatpush1.msra.mxu0 %v161_v39  ;;  %319 = vmatpush1.msra.mxu1 %v163_v40  ;;  %v137_v63 = vld [vmem:[#allocation8] sm:$0xff]  ;;  %v139_v1 = vld [vmem:[#allocation8 + $0x10] sm:$0xff]  ;;  %v448_v3 = vld [vmem:[#allocation13 + $0x1e8] sm:$0xff] }
  0x6b   :  { %243 = vmatprep.subr.mxu0 %v158_v41  ;;  %320 = vmatprep.subr.mxu1 %v160_v42  ;;  %v135_v2 = vld [vmem:[#allocation5] sm:$0xff]  ;;  %v450_v4 = vld [vmem:[#allocation13 + $0x1f8] sm:$0xff]  ;;  %v449_v6 = vld [vmem:[#allocation13 + $0x1f0] sm:$0xff] }
  0x6c   :  { %244 = vmatpush1.msra.mxu0 %v157_v43  ;;  %321 = vmatpush1.msra.mxu1 %v159_v44  ;;  %v447_v5 = vld [vmem:[#allocation13 + $0x1e0] sm:$0xff]  ;;  %v444_v7 = vld [vmem:[#allocation13 + $0x1c8] sm:$0xff]  ;;  %v446_v8 = vld [vmem:[#allocation13 + $0x1d8] sm:$0xff] }
  0x6d   :  { %245 = vmatprep.subr.mxu0 %v154_v45  ;;  %322 = vmatprep.subr.mxu1 %v156_v46  ;;  %v443_v9 = vld [vmem:[#allocation13 + $0x1c0] sm:$0xff]  ;;  %v445_v10 = vld [vmem:[#allocation13 + $0x1d0] sm:$0xff]  ;;  %v440_v11 = vld [vmem:[#allocation13 + $0x1a8] sm:$0xff] }
  0x6e   :  { %246 = vmatpush1.msra.mxu0 %v153_v47  ;;  %323 = vmatpush1.msra.mxu1 %v155_v48  ;;  %v442_v12 = vld [vmem:[#allocation13 + $0x1b8] sm:$0xff]  ;;  %v439_v13 = vld [vmem:[#allocation13 + $0x1a0] sm:$0xff]  ;;  %v441_v14 = vld [vmem:[#allocation13 + $0x1b0] sm:$0xff] }
  0x6f   :  { %247 = vmatprep.subr.mxu0 %v150_v49  ;;  %324 = vmatprep.subr.mxu1 %v152_v50  ;;  %v436_v15 = vld [vmem:[#allocation13 + $0x188] sm:$0xff]  ;;  %v438_v16 = vld [vmem:[#allocation13 + $0x198] sm:$0xff]  ;;  %v435_v17 = vld [vmem:[#allocation13 + $0x180] sm:$0xff] }
  0x70   :  { %248 = vmatpush1.msra.mxu0 %v149_v51  ;;  %325 = vmatpush1.msra.mxu1 %v151_v52  ;;  %v437_v18 = vld [vmem:[#allocation13 + $0x190] sm:$0xff]  ;;  %v432_v19 = vld [vmem:[#allocation13 + $0x168] sm:$0xff]  ;;  %v434_v20 = vld [vmem:[#allocation13 + $0x178] sm:$0xff] }
  0x71   :  { %249 = vmatprep.subr.mxu0 %v146_v53  ;;  %326 = vmatprep.subr.mxu1 %v148_v54  ;;  %v431_v21 = vld [vmem:[#allocation13 + $0x160] sm:$0xff]  ;;  %v433_v22 = vld [vmem:[#allocation13 + $0x170] sm:$0xff]  ;;  %v428_v23 = vld [vmem:[#allocation13 + $0x148] sm:$0xff] }
  0x72   :  { %250 = vmatpush1.msra.mxu0 %v145_v55  ;;  %327 = vmatpush1.msra.mxu1 %v147_v56  ;;  %v430_v24 = vld [vmem:[#allocation13 + $0x158] sm:$0xff]  ;;  %v427_v25 = vld [vmem:[#allocation13 + $0x140] sm:$0xff]  ;;  %v429_v26 = vld [vmem:[#allocation13 + $0x150] sm:$0xff] }
  0x73   :  { %251 = vmatprep.subr.mxu0 %v142_v57  ;;  %328 = vmatprep.subr.mxu1 %v144_v58  ;;  %v424_v27 = vld [vmem:[#allocation13 + $0x128] sm:$0xff]  ;;  %v426_v28 = vld [vmem:[#allocation13 + $0x138] sm:$0xff]  ;;  %v423_v29 = vld [vmem:[#allocation13 + $0x120] sm:$0xff] }
  0x74   :  { %252 = vmatpush1.msra.mxu0 %v141_v59  ;;  %329 = vmatpush1.msra.mxu1 %v143_v60  ;;  %v425_v30 = vld [vmem:[#allocation13 + $0x130] sm:$0xff]  ;;  %v420_v31 = vld [vmem:[#allocation13 + $0x108] sm:$0xff]  ;;  %v422_v32 = vld [vmem:[#allocation13 + $0x118] sm:$0xff] }
  0x75   :  { %253 = vmatprep.subr.mxu0 %v138_v61  ;;  %330 = vmatprep.subr.mxu1 %v140_v62  ;;  %v419_v33 = vld [vmem:[#allocation13 + $0x100] sm:$0xff]  ;;  %v421_v34 = vld [vmem:[#allocation13 + $0x110] sm:$0xff]  ;;  %v416_v35 = vld [vmem:[#allocation13 + $0xe8] sm:$0xff] }
  0x76   :  { %254 = vmatpush1.msra.mxu0 %v137_v63  ;;  %331 = vmatpush1.msra.mxu1 %v139_v1  ;;  %v418_v36 = vld [vmem:[#allocation13 + $0xf8] sm:$0xff]  ;;  %v415_v37 = vld [vmem:[#allocation13 + $0xe0] sm:$0xff]  ;;  %v417_v38 = vld [vmem:[#allocation13 + $0xf0] sm:$0xff] }
  0x77   :  { %288 = vmatmul.mubr.f32.vlgmr.msra.gmra.mxu0 %v135_v2  ;;  %365 = vmatmul.mubr.f32.vlgmr.msra.gmra.mxu1 %v135_v2  ;;  %v412_v39 = vld [vmem:[#allocation13 + $0xc8] sm:$0xff]  ;;  %v414_v40 = vld [vmem:[#allocation13 + $0xd8] sm:$0xff]  ;;  %v411_v41 = vld [vmem:[#allocation13 + $0xc0] sm:$0xff] }
  0x78   :  { %473 = vmatprep.subr.mxu0 %v448_v3  ;;  %550 = vmatprep.subr.mxu1 %v450_v4  ;;  %v413_v42 = vld [vmem:[#allocation13 + $0xd0] sm:$0xff]  ;;  %v408_v43 = vld [vmem:[#allocation13 + $0xa8] sm:$0xff]  ;;  %v410_v44 = vld [vmem:[#allocation13 + $0xb8] sm:$0xff] }
  0x79   :  { %474 = vmatpush1.msra.mxu0 %v447_v5  ;;  %551 = vmatpush1.msra.mxu1 %v449_v6  ;;  %v407_v45 = vld [vmem:[#allocation13 + $0xa0] sm:$0xff]  ;;  %v409_v46 = vld [vmem:[#allocation13 + $0xb0] sm:$0xff]  ;;  %v404_v47 = vld [vmem:[#allocation13 + $0x88] sm:$0xff] }
  0x7a   :  { %475 = vmatprep.subr.mxu0 %v444_v7  ;;  %552 = vmatprep.subr.mxu1 %v446_v8  ;;  %v406_v48 = vld [vmem:[#allocation13 + $0x98] sm:$0xff]  ;;  %v403_v49 = vld [vmem:[#allocation13 + $0x80] sm:$0xff]  ;;  %v405_v50 = vld [vmem:[#allocation13 + $0x90] sm:$0xff] }
  0x7b   :  { %476 = vmatpush1.msra.mxu0 %v443_v9  ;;  %553 = vmatpush1.msra.mxu1 %v445_v10  ;;  %v400_v51 = vld [vmem:[#allocation13 + $0x68] sm:$0xff]  ;;  %v402_v52 = vld [vmem:[#allocation13 + $0x78] sm:$0xff]  ;;  %v399_v53 = vld [vmem:[#allocation13 + $0x60] sm:$0xff] }
  0x7c   :  { %477 = vmatprep.subr.mxu0 %v440_v11  ;;  %554 = vmatprep.subr.mxu1 %v442_v12  ;;  %v401_v54 = vld [vmem:[#allocation13 + $0x70] sm:$0xff]  ;;  %v396_v55 = vld [vmem:[#allocation13 + $0x48] sm:$0xff]  ;;  %v398_v56 = vld [vmem:[#allocation13 + $0x58] sm:$0xff] }
  0x7d   :  { %478 = vmatpush1.msra.mxu0 %v439_v13  ;;  %555 = vmatpush1.msra.mxu1 %v441_v14  ;;  %v136_v57 = vld [vmem:[#allocation5 + $0x8] sm:$0x3]  ;;  %v395_v58 = vld [vmem:[#allocation13 + $0x40] sm:$0xff]  ;;  %v397_v59 = vld [vmem:[#allocation13 + $0x50] sm:$0xff] }
  0x7e   :  { %479 = vmatprep.subr.mxu0 %v436_v15  ;;  %556 = vmatprep.subr.mxu1 %v438_v16  ;;  %v392_v60 = vld [vmem:[#allocation13 + $0x28] sm:$0xff]  ;;  %v394_v61 = vld [vmem:[#allocation13 + $0x38] sm:$0xff]  ;;  %v391_v62 = vld [vmem:[#allocation13 + $0x20] sm:$0xff] }
  0x7f   :  { %480 = vmatpush1.msra.mxu0 %v435_v17  ;;  %557 = vmatpush1.msra.mxu1 %v437_v18  ;;  %v393_v63 = vld [vmem:[#allocation13 + $0x30] sm:$0xff]  ;;  %v388_v1 = vld [vmem:[#allocation13 + $0x8] sm:$0xff]  ;;  %v390_v2 = vld [vmem:[#allocation13 + $0x18] sm:$0xff] }
  0x80   :  { %481 = vmatprep.subr.mxu0 %v432_v19  ;;  %558 = vmatprep.subr.mxu1 %v434_v20  ;;  %v387_v3 = vld [vmem:[#allocation13] sm:$0xff]  ;;  %v389_v4 = vld [vmem:[#allocation13 + $0x10] sm:$0xff]  ;;  %v5997_v6 = vld [vmem:[#allocation10 + $0x1e8] sm:$0xff] }
  0x81   :  { %482 = vmatpush1.msra.mxu0 %v431_v21  ;;  %559 = vmatpush1.msra.mxu1 %v433_v22  ;;  %v385_v5 = vld [vmem:[#allocation11] sm:$0xff]  ;;  %8186 = vst [vmem:[#allocation27_spill] sm:$0xff] %v5997_v6  ;;  %v5999_v7 = vld [vmem:[#allocation10 + $0x1f8] sm:$0xff]  ;;  %v6004_v9 = vld [vmem:[#allocation10 + $0x1f0] sm:$0xff] }
  0x82   :  { %483 = vmatprep.subr.mxu0 %v428_v23  ;;  %560 = vmatprep.subr.mxu1 %v430_v24  ;;  %8187 = vst [vmem:[#allocation28_spill] sm:$0xff] %v5999_v7  ;;  %v6002_v8 = vld [vmem:[#allocation10 + $0x1e0] sm:$0xff]  ;;  %v6006_v10 = vld [vmem:[#allocation10 + $0x1c8] sm:$0xff]  ;;  %v6008_v11 = vld [vmem:[#allocation10 + $0x1d8] sm:$0xff] }
  0x83   :  { %484 = vmatpush1.msra.mxu0 %v427_v25  ;;  %561 = vmatpush1.msra.mxu1 %v429_v26  ;;  %v6012_v12 = vld [vmem:[#allocation10 + $0x1c0] sm:$0xff]  ;;  %v6014_v13 = vld [vmem:[#allocation10 + $0x1d0] sm:$0xff]  ;;  %v6018_v14 = vld [vmem:[#allocation10 + $0x1a8] sm:$0xff] }
  0x84   :  { %485 = vmatprep.subr.mxu0 %v424_v27  ;;  %562 = vmatprep.subr.mxu1 %v426_v28  ;;  %v6020_v15 = vld [vmem:[#allocation10 + $0x1b8] sm:$0xff]  ;;  %v6024_v16 = vld [vmem:[#allocation10 + $0x1a0] sm:$0xff]  ;;  %v6026_v17 = vld [vmem:[#allocation10 + $0x1b0] sm:$0xff] }
  0x85   :  { %486 = vmatpush1.msra.mxu0 %v423_v29  ;;  %563 = vmatpush1.msra.mxu1 %v425_v30  ;;  %v6030_v18 = vld [vmem:[#allocation10 + $0x188] sm:$0xff]  ;;  %v6032_v19 = vld [vmem:[#allocation10 + $0x198] sm:$0xff]  ;;  %v6036_v20 = vld [vmem:[#allocation10 + $0x180] sm:$0xff] }
  0x86   :  { %487 = vmatprep.subr.mxu0 %v420_v31  ;;  %564 = vmatprep.subr.mxu1 %v422_v32  ;;  %v6038_v21 = vld [vmem:[#allocation10 + $0x190] sm:$0xff]  ;;  %v6042_v22 = vld [vmem:[#allocation10 + $0x168] sm:$0xff]  ;;  %v6044_v23 = vld [vmem:[#allocation10 + $0x178] sm:$0xff] }
  0x87   :  { %488 = vmatpush1.msra.mxu0 %v419_v33  ;;  %565 = vmatpush1.msra.mxu1 %v421_v34  ;;  %v6048_v24 = vld [vmem:[#allocation10 + $0x160] sm:$0xff]  ;;  %v6050_v25 = vld [vmem:[#allocation10 + $0x170] sm:$0xff]  ;;  %v6054_v26 = vld [vmem:[#allocation10 + $0x148] sm:$0xff] }
  0x88   :  { %489 = vmatprep.subr.mxu0 %v416_v35  ;;  %566 = vmatprep.subr.mxu1 %v418_v36  ;;  %v6056_v27 = vld [vmem:[#allocation10 + $0x158] sm:$0xff]  ;;  %v6060_v28 = vld [vmem:[#allocation10 + $0x140] sm:$0xff]  ;;  %v6062_v29 = vld [vmem:[#allocation10 + $0x150] sm:$0xff] }
  0x89   :  { %490 = vmatpush1.msra.mxu0 %v415_v37  ;;  %567 = vmatpush1.msra.mxu1 %v417_v38  ;;  %v6066_v30 = vld [vmem:[#allocation10 + $0x128] sm:$0xff]  ;;  %v6068_v31 = vld [vmem:[#allocation10 + $0x138] sm:$0xff]  ;;  %v6072_v32 = vld [vmem:[#allocation10 + $0x120] sm:$0xff] }
  0x8a   :  { %491 = vmatprep.subr.mxu0 %v412_v39  ;;  %568 = vmatprep.subr.mxu1 %v414_v40  ;;  %v6074_v33 = vld [vmem:[#allocation10 + $0x130] sm:$0xff]  ;;  %v6078_v34 = vld [vmem:[#allocation10 + $0x108] sm:$0xff]  ;;  %v6080_v35 = vld [vmem:[#allocation10 + $0x118] sm:$0xff] }
  0x8b   :  { %492 = vmatpush1.msra.mxu0 %v411_v41  ;;  %569 = vmatpush1.msra.mxu1 %v413_v42  ;;  %v6084_v36 = vld [vmem:[#allocation10 + $0x100] sm:$0xff]  ;;  %v6086_v37 = vld [vmem:[#allocation10 + $0x110] sm:$0xff]  ;;  %v6090_v38 = vld [vmem:[#allocation10 + $0xe8] sm:$0xff] }
  0x8c   :  { %493 = vmatprep.subr.mxu0 %v408_v43  ;;  %570 = vmatprep.subr.mxu1 %v410_v44  ;;  %v6092_v39 = vld [vmem:[#allocation10 + $0xf8] sm:$0xff]  ;;  %v6096_v40 = vld [vmem:[#allocation10 + $0xe0] sm:$0xff]  ;;  %v6098_v41 = vld [vmem:[#allocation10 + $0xf0] sm:$0xff] }
  0x8d   :  { %494 = vmatpush1.msra.mxu0 %v407_v45  ;;  %571 = vmatpush1.msra.mxu1 %v409_v46  ;;  %v6102_v42 = vld [vmem:[#allocation10 + $0xc8] sm:$0xff]  ;;  %v6104_v43 = vld [vmem:[#allocation10 + $0xd8] sm:$0xff]  ;;  %v6108_v44 = vld [vmem:[#allocation10 + $0xc0] sm:$0xff] }
  0x8e   :  { %495 = vmatprep.subr.mxu0 %v404_v47  ;;  %572 = vmatprep.subr.mxu1 %v406_v48  ;;  %v6110_v45 = vld [vmem:[#allocation10 + $0xd0] sm:$0xff]  ;;  %v6114_v46 = vld [vmem:[#allocation10 + $0xa8] sm:$0xff]  ;;  %v6116_v47 = vld [vmem:[#allocation10 + $0xb8] sm:$0xff] }
  0x8f   :  { %496 = vmatpush1.msra.mxu0 %v403_v49  ;;  %573 = vmatpush1.msra.mxu1 %v405_v50  ;;  %8188 = vst [vmem:[#allocation29_spill] sm:$0xff] %v6114_v46  ;;  %8189 = vst [vmem:[#allocation30_spill] sm:$0xff] %v6116_v47  ;;  %v6120_v48 = vld [vmem:[#allocation10 + $0xa0] sm:$0xff]  ;;  %v6122_v49 = vld [vmem:[#allocation10 + $0xb0] sm:$0xff] }
  0x90   :  { %497 = vmatprep.subr.mxu0 %v400_v51  ;;  %574 = vmatprep.subr.mxu1 %v402_v52  ;;  %8190 = vst [vmem:[#allocation31_spill] sm:$0xff] %v6120_v48  ;;  %8191 = vst [vmem:[#allocation32_spill] sm:$0xff] %v6122_v49  ;;  %v6126_v50 = vld [vmem:[#allocation10 + $0x88] sm:$0xff]  ;;  %v6128_v51 = vld [vmem:[#allocation10 + $0x98] sm:$0xff] }
  0x91   :  { %498 = vmatpush1.msra.mxu0 %v399_v53  ;;  %575 = vmatpush1.msra.mxu1 %v401_v54  ;;  %8192 = vst [vmem:[#allocation33_spill] sm:$0xff] %v6126_v50  ;;  %8193 = vst [vmem:[#allocation34_spill] sm:$0xff] %v6128_v51  ;;  %v6132_v52 = vld [vmem:[#allocation10 + $0x80] sm:$0xff]  ;;  %v6134_v53 = vld [vmem:[#allocation10 + $0x90] sm:$0xff] }
  0x92   :  { %293 = vmatprep.mubr.f32.mxu0 %v7991_v0  ;;  %370 = vmatprep.mubr.f32.mxu1 %v7991_v0  ;;  %8194 = vst [vmem:[#allocation35_spill] sm:$0xff] %v6132_v52  ;;  %8195 = vst [vmem:[#allocation36_spill] sm:$0xff] %v6134_v53  ;;  %v6138_v54 = vld [vmem:[#allocation10 + $0x68] sm:$0xff] }
  0x93   :  { %499 = vmatprep.subr.mxu0 %v396_v55  ;;  %576 = vmatprep.subr.mxu1 %v398_v56  ;;  %8196 = vst [vmem:[#allocation37_spill] sm:$0xff] %v6138_v54  ;;  %v6140_v55 = vld [vmem:[#allocation10 + $0x78] sm:$0xff]  ;;  %v6146_v56 = vld [vmem:[#allocation10 + $0x60] sm:$0xff] }
  0x94   :  { %294 = vmatmul.mubr.f32.gmra.mxu0 %v136_v57  ;;  %371 = vmatmul.mubr.f32.gmra.mxu1 %v136_v57  ;;  %8197 = vst [vmem:[#allocation38_spill] sm:$0xff] %v6140_v55  ;;  %8198 = vst [vmem:[#allocation39_spill] sm:$0xff] %v6146_v56  ;;  %v6148_v57 = vld [vmem:[#allocation10 + $0x70] sm:$0xff] }
  0x95   :  { %500 = vmatpush1.msra.mxu0 %v395_v58  ;;  %577 = vmatpush1.msra.mxu1 %v397_v59  ;;  %8199 = vst [vmem:[#allocation40_spill] sm:$0xff] %v6148_v57  ;;  %v386_v58 = vld [vmem:[#allocation11 + $0x8] sm:$0x3] }
  0x96   :  { %501 = vmatprep.subr.mxu0 %v392_v60  ;;  %578 = vmatprep.subr.mxu1 %v394_v61  ;;  %v6154_v59 = vld [vmem:[#allocation10 + $0x48] sm:$0xff]  ;;  %v6156_v60 = vld [vmem:[#allocation10 + $0x58] sm:$0xff]  ;;  %v6160_v61 = vld [vmem:[#allocation10 + $0x40] sm:$0xff] }
  0x97   :  { %502 = vmatpush1.msra.mxu0 %v391_v62  ;;  %579 = vmatpush1.msra.mxu1 %v393_v63  ;;  %8200 = vst [vmem:[#allocation41_spill] sm:$0xff] %v6154_v59  ;;  %8201 = vst [vmem:[#allocation42_spill] sm:$0xff] %v6156_v60  ;;  %v6162_v62 = vld [vmem:[#allocation10 + $0x50] sm:$0xff]  ;;  %v6164_v63 = vld [vmem:[#allocation10 + $0x28] sm:$0xff] }
  0x98   :  { %503 = vmatprep.subr.mxu0 %v388_v1  ;;  %580 = vmatprep.subr.mxu1 %v390_v2  ;;  %8202 = vst [vmem:[#allocation43_spill] sm:$0xff] %v6160_v61  ;;  %8203 = vst [vmem:[#allocation44_spill] sm:$0xff] %v6162_v62  ;;  %v6166_v1 = vld [vmem:[#allocation10 + $0x38] sm:$0xff]  ;;  %v6170_v2 = vld [vmem:[#allocation10 + $0x20] sm:$0xff] }
  0x99   :  { %504 = vmatpush1.msra.mxu0 %v387_v3  ;;  %537 = vmatprep.mubr.f32.mxu0 %v7991_v0  ;;  %8204 = vst [vmem:[#allocation45_spill] sm:$0xff] %v6164_v63  ;;  %8205 = vst [vmem:[#allocation46_spill] sm:$0xff] %v6166_v1  ;;  %v6172_v3 = vld [vmem:[#allocation10 + $0x30] sm:$0xff] }
  0x9a   :  { %581 = vmatpush1.msra.mxu1 %v389_v4  ;;  %614 = vmatprep.mubr.f32.mxu1 %v7991_v0  ;;  %8206 = vst [vmem:[#allocation47_spill] sm:$0xff] %v6170_v2  ;;  %8207 = vst [vmem:[#allocation48_spill] sm:$0xff] %v6172_v3  ;;  %v6176_v4 = vld [vmem:[#allocation10 + $0x8] sm:$0xff] }
  0x9b   :  { %538 = vmatmul.mubr.f32.vlgmr.msra.gmra.mxu0 %v385_v5  ;;  %615 = vmatmul.mubr.f32.vlgmr.msra.gmra.mxu1 %v385_v5  ;;  %8208 = vst [vmem:[#allocation49_spill] sm:$0xff] %v6176_v4  ;;  %v6178_v5 = vld [vmem:[#allocation10 + $0x18] sm:$0xff] }
  0x9c   :  { %764 = vmatprep.subr.mxu0 %v5997_v6  ;;  %835 = vmatprep.subr.mxu1 %v5999_v7  ;;  %8209 = vst [vmem:[#allocation50_spill] sm:$0xff] %v6178_v5 }
  0x9d   :  { %765 = vmatpush1.msra.mxu0 %v6002_v8  ;;  %836 = vmatpush1.msra.mxu1 %v6004_v9 }
  0x9e   :  { %766 = vmatprep.subr.mxu0 %v6006_v10  ;;  %837 = vmatprep.subr.mxu1 %v6008_v11 }
  0x9f   :  { %767 = vmatpush1.msra.mxu0 %v6012_v12  ;;  %838 = vmatpush1.msra.mxu1 %v6014_v13 }
  0xa0   :  { %768 = vmatprep.subr.mxu0 %v6018_v14  ;;  %839 = vmatprep.subr.mxu1 %v6020_v15 }
  0xa1   :  { %769 = vmatpush1.msra.mxu0 %v6024_v16  ;;  %840 = vmatpush1.msra.mxu1 %v6026_v17 }
  0xa2   :  { %770 = vmatprep.subr.mxu0 %v6030_v18  ;;  %841 = vmatprep.subr.mxu1 %v6032_v19 }
  0xa3   :  { %771 = vmatpush1.msra.mxu0 %v6036_v20  ;;  %842 = vmatpush1.msra.mxu1 %v6038_v21 }
  0xa4   :  { %772 = vmatprep.subr.mxu0 %v6042_v22  ;;  %843 = vmatprep.subr.mxu1 %v6044_v23 }
  0xa5   :  { %773 = vmatpush1.msra.mxu0 %v6048_v24  ;;  %844 = vmatpush1.msra.mxu1 %v6050_v25 }
  0xa6   :  { %774 = vmatprep.subr.mxu0 %v6054_v26  ;;  %845 = vmatprep.subr.mxu1 %v6056_v27 }
  0xa7   :  { %775 = vmatpush1.msra.mxu0 %v6060_v28  ;;  %846 = vmatpush1.msra.mxu1 %v6062_v29 }
  0xa8   :  { %776 = vmatprep.subr.mxu0 %v6066_v30  ;;  %847 = vmatprep.subr.mxu1 %v6068_v31 }
  0xa9   :  { %777 = vmatpush1.msra.mxu0 %v6072_v32  ;;  %848 = vmatpush1.msra.mxu1 %v6074_v33 }
  0xaa   :  { %778 = vmatprep.subr.mxu0 %v6078_v34  ;;  %849 = vmatprep.subr.mxu1 %v6080_v35 }
  0xab   :  { %779 = vmatpush1.msra.mxu0 %v6084_v36  ;;  %850 = vmatpush1.msra.mxu1 %v6086_v37 }
  0xac   :  { %780 = vmatprep.subr.mxu0 %v6090_v38  ;;  %851 = vmatprep.subr.mxu1 %v6092_v39 }
  0xad   :  { %781 = vmatpush1.msra.mxu0 %v6096_v40  ;;  %852 = vmatpush1.msra.mxu1 %v6098_v41 }
  0xae   :  { %782 = vmatprep.subr.mxu0 %v6102_v42  ;;  %853 = vmatprep.subr.mxu1 %v6104_v43 }
  0xaf   :  { %783 = vmatpush1.msra.mxu0 %v6108_v44  ;;  %854 = vmatpush1.msra.mxu1 %v6110_v45 }
  0xb0   :  { %784 = vmatprep.subr.mxu0 %v6114_v46  ;;  %855 = vmatprep.subr.mxu1 %v6116_v47 }
  0xb1   :  { %785 = vmatpush1.msra.mxu0 %v6120_v48  ;;  %856 = vmatpush1.msra.mxu1 %v6122_v49 }
  0xb2   :  { %786 = vmatprep.subr.mxu0 %v6126_v50  ;;  %857 = vmatprep.subr.mxu1 %v6128_v51 }
  0xb3   :  { %787 = vmatpush1.msra.mxu0 %v6132_v52  ;;  %858 = vmatpush1.msra.mxu1 %v6134_v53 }
  0xb4   :  { %788 = vmatprep.subr.mxu0 %v6138_v54  ;;  %859 = vmatprep.subr.mxu1 %v6140_v55 }
  0xb5   :  { %543 = vmatprep.mubr.f32.mxu0 %v7991_v0  ;;  %620 = vmatprep.mubr.f32.mxu1 %v7991_v0  ;;  %v6186_v0 = vld [vmem:[#allocation10 + $0x10] sm:$0xff] }
  0xb6   :  { %789 = vmatpush1.msra.mxu0 %v6146_v56  ;;  %860 = vmatpush1.msra.mxu1 %v6148_v57  ;;  %8211 = vst [vmem:[#allocation52_spill] sm:$0xff] %v6186_v0 }
  0xb7   :  { %544 = vmatmul.mubr.f32.gmra.mxu0 %v386_v58  ;;  %621 = vmatmul.mubr.f32.gmra.mxu1 %v386_v58  ;;  %v6182_v58 = vld [vmem:[#allocation10] sm:$0xff] }
  0xb8   :  { %790 = vmatprep.subr.mxu0 %v6154_v59  ;;  %861 = vmatprep.subr.mxu1 %v6156_v60  ;;  %8210 = vst [vmem:[#allocation51_spill] sm:$0xff] %v6182_v58 }
  0xb9   :  { %791 = vmatpush1.msra.mxu0 %v6160_v61  ;;  %862 = vmatpush1.msra.mxu1 %v6162_v62  ;;  %v8212_v62 = vmov 0.0  }
  0xba   :  { %792 = vmatprep.subr.mxu0 %v6164_v63  ;;  %863 = vmatprep.subr.mxu1 %v6166_v1 }
  0xbb   :  { %793 = vmatpush1.msra.mxu0 %v6170_v2  ;;  %864 = vmatpush1.msra.mxu1 %v6172_v3 }
  0xbc   :  { %794 = vmatprep.subr.mxu0 %v6176_v4  ;;  %865 = vmatprep.subr.mxu1 %v6178_v5 }
  0xbd   :  { %795 = vmatpush1.msra.mxu0 %v6182_v58  ;;  %828 = vmatprep.mubr.f32.mxu0 %v8212_v62 }
  0xbe   :  { %866 = vmatpush1.msra.mxu1 %v6186_v0  ;;  %899 = vmatprep.mubr.f32.mxu1 %v8212_v62 }
  0xbf   :  { %829 = vmatmul.mubr.f32.vlgmr.msra.gmra.mxu0 %v8212_v62  ;;  %900 = vmatmul.mubr.f32.vlgmr.msra.gmra.mxu1 %v8212_v62 }
  0xc0   :  { %969 = vmatprep.subr.mxu0 %v5997_v6  ;;  %1040 = vmatprep.subr.mxu1 %v5999_v7 }
  0xc1   :  { %970 = vmatpush1.msra.mxu0 %v6002_v8  ;;  %1041 = vmatpush1.msra.mxu1 %v6004_v9 }
  0xc2   :  { %971 = vmatprep.subr.mxu0 %v6006_v10  ;;  %1042 = vmatprep.subr.mxu1 %v6008_v11 }
  0xc3   :  { %972 = vmatpush1.msra.mxu0 %v6012_v12  ;;  %1043 = vmatpush1.msra.mxu1 %v6014_v13 }
  0xc4   :  { %973 = vmatprep.subr.mxu0 %v6018_v14  ;;  %1044 = vmatprep.subr.mxu1 %v6020_v15 }
  0xc5   :  { %974 = vmatpush1.msra.mxu0 %v6024_v16  ;;  %1045 = vmatpush1.msra.mxu1 %v6026_v17 }
  0xc6   :  { %975 = vmatprep.subr.mxu0 %v6030_v18  ;;  %1046 = vmatprep.subr.mxu1 %v6032_v19 }
  0xc7   :  { %976 = vmatpush1.msra.mxu0 %v6036_v20  ;;  %1047 = vmatpush1.msra.mxu1 %v6038_v21 }
  0xc8   :  { %977 = vmatprep.subr.mxu0 %v6042_v22  ;;  %1048 = vmatprep.subr.mxu1 %v6044_v23 }
  0xc9   :  { %978 = vmatpush1.msra.mxu0 %v6048_v24  ;;  %1049 = vmatpush1.msra.mxu1 %v6050_v25 }
  0xca   :  { %979 = vmatprep.subr.mxu0 %v6054_v26  ;;  %1050 = vmatprep.subr.mxu1 %v6056_v27 }
  0xcb   :  { %980 = vmatpush1.msra.mxu0 %v6060_v28  ;;  %1051 = vmatpush1.msra.mxu1 %v6062_v29 }
  0xcc   :  { %981 = vmatprep.subr.mxu0 %v6066_v30  ;;  %1052 = vmatprep.subr.mxu1 %v6068_v31 }
  0xcd   :  { %982 = vmatpush1.msra.mxu0 %v6072_v32  ;;  %1053 = vmatpush1.msra.mxu1 %v6074_v33 }
  0xce   :  { %983 = vmatprep.subr.mxu0 %v6078_v34  ;;  %1054 = vmatprep.subr.mxu1 %v6080_v35 }
  0xcf   :  { %984 = vmatpush1.msra.mxu0 %v6084_v36  ;;  %1055 = vmatpush1.msra.mxu1 %v6086_v37 }
  0xd0   :  { %985 = vmatprep.subr.mxu0 %v6090_v38  ;;  %1056 = vmatprep.subr.mxu1 %v6092_v39 }
  0xd1   :  { %986 = vmatpush1.msra.mxu0 %v6096_v40  ;;  %1057 = vmatpush1.msra.mxu1 %v6098_v41 }
  0xd2   :  { %987 = vmatprep.subr.mxu0 %v6102_v42  ;;  %1058 = vmatprep.subr.mxu1 %v6104_v43 }
  0xd3   :  { %988 = vmatpush1.msra.mxu0 %v6108_v44  ;;  %1059 = vmatpush1.msra.mxu1 %v6110_v45 }
  0xd4   :  { %989 = vmatprep.subr.mxu0 %v6114_v46  ;;  %1060 = vmatprep.subr.mxu1 %v6116_v47 }
  0xd5   :  { %990 = vmatpush1.msra.mxu0 %v6120_v48  ;;  %1061 = vmatpush1.msra.mxu1 %v6122_v49 }
  0xd6   :  { %991 = vmatprep.subr.mxu0 %v6126_v50  ;;  %1062 = vmatprep.subr.mxu1 %v6128_v51  ;;  %v8213_v50 = vld [vmem:[#allocation44_spill] sm:$0xff] }
  0xd7   :  { %992 = vmatpush1.msra.mxu0 %v6132_v52  ;;  %1063 = vmatpush1.msra.mxu1 %v6134_v53 }
  0xd8   :  { %993 = vmatprep.subr.mxu0 %v6138_v54  ;;  %1064 = vmatprep.subr.mxu1 %v6140_v55 }
  0xd9   :  { %994 = vmatpush1.msra.mxu0 %v6146_v56  ;;  %1065 = vmatpush1.msra.mxu1 %v6148_v57 }
  0xda   :  { %995 = vmatprep.subr.mxu0 %v6154_v59  ;;  %1066 = vmatprep.subr.mxu1 %v6156_v60 }
  0xdb   :  { %996 = vmatpush1.msra.mxu0 %v6160_v61  ;;  %1067 = vmatpush1.msra.mxu1 %v8213_v50 }
  0xdc   :  { %997 = vmatprep.subr.mxu0 %v6164_v63  ;;  %1068 = vmatprep.subr.mxu1 %v6166_v1  ;;  %v203_v1 = vlaneseq }
  0xdd   :  { %998 = vmatpush1.msra.mxu0 %v6170_v2  ;;  %1069 = vmatpush1.msra.mxu1 %v6172_v3 }
  0xde   :  { %999 = vmatprep.subr.mxu0 %v6176_v4  ;;  %1070 = vmatprep.subr.mxu1 %v6178_v5  ;;  %v6264_v2 = vshrl.u32 %v203_v1, 7 }
  0xdf   :  { %1000 = vmatpush1.msra.mxu0 %v6182_v58  ;;  %1033 = vmatprep.mubr.f32.mxu0 %v8212_v62  ;;  %v201_v58 = vld [vmem:[%s7981_s3] sm:$0xf] }
  0xe0   :  { %1071 = vmatpush1.msra.mxu1 %v6186_v0  ;;  %1104 = vmatprep.mubr.f32.mxu1 %v8212_v62  ;;  %v205_v3 = vsub.s32 0, %v6264_v2  ;;  %v213_v4 = vsub.s32 2, %v6264_v2  ;;  %v209_v5 = vsub.s32 1, %v6264_v2  ;;  %v217_v0 = vsub.s32 3, %v6264_v2 }
  0xe1   :  { %1174 = vmatprep.subr.mxu0 %v5997_v6  ;;  %1245 = vmatprep.subr.mxu1 %v5999_v7 }
  0xe2   :  { %v206_v62 = vrot.slane %v201_v58, %v205_v3  ;;  %v214_v63 = vrot.slane %v201_v58, %v213_v4  ;;  %v210_v6 = vrot.slane %v201_v58, %v209_v5  ;;  %v218_v50 = vrot.slane %v201_v58, %v217_v0  ;;  %v451_v58 = vld [vmem:[%s7985_s7] sm:$0xf] }
 0x137   :  { %v289_v7 = vpop.f32.mrf.mxu0  ;;  %v366_v61 = vpop.f32.mrf.mxu1 }
 0x138   :  { %v290_v1 = vadd.f32 %v289_v7, %v206_v62  ;;  %v367_v60 = vadd.f32 %v366_v61, %v214_v63 }
 0x139   :  { %v291_v59 = vpop.f32.mrf.mxu0  ;;  %v368_v57 = vpop.f32.mrf.mxu1 }
 0x13a   :  { %377 = vst [vmem:[#allocation2] sm:$0xff] %v290_v1  ;;  %379 = vst [vmem:[#allocation2 + $0x10] sm:$0xff] %v367_v60  ;;  %v292_v56 = vadd.f32 %v291_v59, %v210_v6  ;;  %v369_v55 = vadd.f32 %v368_v57, %v218_v50  ;;  %v456_v1 = vrot.slane %v451_v58, %v205_v3 }
 0x13b   :  { %v464_v60 = vrot.slane %v451_v58, %v213_v4 }
 0x13c   :  { %378 = vst [vmem:[#allocation2 + $0x8] sm:$0xff] %v292_v56  ;;  %380 = vst [vmem:[#allocation2 + $0x18] sm:$0xff] %v369_v55  ;;  %v460_v56 = vrot.slane %v451_v58, %v209_v5  ;;  %v468_v55 = vrot.slane %v451_v58, %v217_v0 }
 0x154   :  { %v295_v54 = vpop.f32.mrf.mxu0  ;;  %v372_v53 = vpop.f32.mrf.mxu1 }
 0x155   :  { %v296_v52 = vadd.f32 %v295_v54, %v206_v62  ;;  %v373_v51 = vadd.f32 %v372_v53, %v214_v63 }
 0x156   :  { %v297_v49 = vpop.f32.mrf.mxu0  ;;  %v374_v48 = vpop.f32.mrf.mxu1 }
 0x157   :  { %381 = vst [vmem:[#allocation2 + $0x20] sm:$0x3] %v296_v52  ;;  %383 = vst [vmem:[#allocation2 + $0x30] sm:$0x3] %v373_v51  ;;  %v298_v7 = vadd.f32 %v297_v49, %v210_v6  ;;  %v375_v61 = vadd.f32 %v374_v48, %v218_v50  ;;  %v5881_v49 = vmov 1966171168  }
 0x158   :  { %v913_v50 = vunpack.c.l.s4 %v5881_v49 }
 0x159   :  { %382 = vst [vmem:[#allocation2 + $0x28] sm:$0x3] %v298_v7  ;;  %384 = vst [vmem:[#allocation2 + $0x38] sm:$0x3] %v375_v61 }
 0x15a   :  { %v914_v58 = vunpack.c.0.s8 %v913_v50 }
 0x15b   :  { %v539_v57 = vpop.f32.mrf.mxu0  ;;  %v616_v59 = vpop.f32.mrf.mxu1 }
 0x15c   :  { %v540_v54 = vadd.f32 %v539_v57, %v456_v1  ;;  %v617_v53 = vadd.f32 %v616_v59, %v464_v60 }
 0x15d   :  { %v541_v62 = vpop.f32.mrf.mxu0  ;;  %v618_v63 = vpop.f32.mrf.mxu1 }
 0x15e   :  { %627 = vst [vmem:[#allocation3] sm:$0xff] %v540_v54  ;;  %629 = vst [vmem:[#allocation3 + $0x10] sm:$0xff] %v617_v53  ;;  %v542_v47 = vadd.f32 %v541_v62, %v460_v56  ;;  %v619_v46 = vadd.f32 %v618_v63, %v468_v55 }
 0x160   :  { %628 = vst [vmem:[#allocation3 + $0x8] sm:$0xff] %v542_v47  ;;  %630 = vst [vmem:[#allocation3 + $0x18] sm:$0xff] %v619_v46  ;;  %v6277_v47 = vsub.s32 %v914_v58, %v6264_v2 }
 0x177   :  { %v545_v6 = vpop.f32.mrf.mxu0  ;;  %v622_v48 = vpop.f32.mrf.mxu1 }
 0x178   :  { %v546_v51 = vadd.f32 %v545_v6, %v456_v1  ;;  %v623_v52 = vadd.f32 %v622_v48, %v464_v60 }
 0x179   :  { %v547_v3 = vpop.f32.mrf.mxu0  ;;  %v624_v0 = vpop.f32.mrf.mxu1 }
 0x17a   :  { %631 = vst [vmem:[#allocation3 + $0x20] sm:$0x3] %v546_v51  ;;  %633 = vst [vmem:[#allocation3 + $0x30] sm:$0x3] %v623_v52  ;;  %v548_v4 = vadd.f32 %v547_v3, %v460_v56  ;;  %v625_v5 = vadd.f32 %v624_v0, %v468_v55 }
 0x17b   :  { %v763_v55 = vld [vmem:[#allocation2] ss:$8 sm:$0xf] }
 0x17c   :  { %632 = vst [vmem:[#allocation3 + $0x28] sm:$0x3] %v548_v4  ;;  %634 = vst [vmem:[#allocation3 + $0x38] sm:$0x3] %v625_v5 }
 0x17f   :  { %v830_v7 = vpop.f32.mrf.mxu0  ;;  %v901_v61 = vpop.f32.mrf.mxu1 }
 0x181   :  { %v832_v46 = vpop.f32.mrf.mxu0  ;;  %v903_v57 = vpop.f32.mrf.mxu1 }
 0x182   :  { %v910_v59 = vcombine.low %v830_v7, %v832_v46  ;;  %v911_v54 = vcombine.low %v901_v61, %v903_v57 }
 0x184   :  { %v918_v1 = vrot.slane %v910_v59, %v6277_v47  ;;  %v925_v60 = vrot.slane %v911_v54, %v6277_v47 }
 0x186   :  { %v926_v53 = vcombine.low %v918_v1, %v925_v60 }
 0x188   :  { %v933_v56 = vrot.slane %v926_v53, %v6277_v47  ;;  %v8214_v53 = vld [vmem:[#allocation29_spill] sm:$0xff] }
 0x18a   :  { %v935_v62 = vadd.f32 %v933_v56, %v763_v55  ;;  %v8215_v56 = vld [vmem:[#allocation30_spill] sm:$0xff]  ;;  %v8216_v55 = vld [vmem:[#allocation31_spill] sm:$0xff] }
 0x18c   :  { %v5047_v63 = vmul.f32 -1.442695, %v935_v62  ;;  %v943_v6 = vrot.slane %v935_v62, 1  ;;  %v954_v2 = vrot.slane %v935_v62, 3  ;;  %v951_v51 = vrot.slane %v935_v62, 2  ;;  %v8217_v62 = vld [vmem:[#allocation32_spill] sm:$0xff] }
 0x18e   :  { %5177 = vpow2.f32 %v5047_v63  ;;  %v5048_v48 = vmul.f32 -1.442695, %v943_v6  ;;  %v5049_v49 = vmul.f32 -1.442695, %v954_v2  ;;  %v8218_v63 = vld [vmem:[#allocation33_spill] sm:$0xff]  ;;  %v8219_v6 = vld [vmem:[#allocation34_spill] sm:$0xff] }
 0x18f   :  { %v8221_v2 = vld [vmem:[#allocation36_spill] sm:$0xff] }
 0x190   :  { %5179 = vpow2.f32 %v5048_v48  ;;  %v8220_v48 = vld [vmem:[#allocation35_spill] sm:$0xff] }
 0x191   :  { %5181 = vpow2.f32 %v5049_v49  ;;  %v8222_v49 = vld [vmem:[#allocation37_spill] sm:$0xff] }
 0x19b   :  { %v5178_v50 = vpop.eup %5177 }
 0x19c   :  { %v939_v52 = vadd.f32 1.0, %v5178_v50  ;;  %v8223_v50 = vld [vmem:[#allocation38_spill] sm:$0xff] }
 0x19d   :  { %v5180_v3 = vpop.eup %5179 }
 0x19e   :  { %5183 = vrcp.f32 %v939_v52  ;;  %v948_v0 = vadd.f32 1.0, %v5180_v3  ;;  %v5182_v4 = vpop.eup %5181  ;;  %v8225_v52 = vld [vmem:[#allocation40_spill] sm:$0xff]  ;;  %v8226_v3 = vld [vmem:[#allocation41_spill] sm:$0xff] }
 0x19f   :  { %5185 = vtanh.f32 %v951_v51  ;;  %v959_v61 = vadd.f32 1.0, %v5182_v4  ;;  %v8224_v51 = vld [vmem:[#allocation39_spill] sm:$0xff] }
 0x1a0   :  { %5187 = vrcp.f32 %v948_v0  ;;  %v8227_v0 = vld [vmem:[#allocation42_spill] sm:$0xff]  ;;  %v8228_v4 = vld [vmem:[#allocation43_spill] sm:$0xff] }
 0x1a1   :  { %5189 = vrcp.f32 %v959_v61  ;;  %v8232_v61 = vld [vmem:[#allocation47_spill] sm:$0xff] }
 0x1ab   :  { %v5184_v5 = vpop.eup %5183 }
 0x1ac   :  { %v5186_v58 = vpop.eup %5185 }
 0x1ad   :  { %v5188_v7 = vpop.eup %5187  ;;  %v963_v57 = vmul.f32 %v5186_v58, %v5184_v5  ;;  %v8229_v5 = vld [vmem:[#allocation44_spill] sm:$0xff]  ;;  %v8230_v58 = vld [vmem:[#allocation45_spill] sm:$0xff] }
 0x1ae   :  { %v962_v46 = vmul.f32 0.0, %v5188_v7  ;;  %v5190_v54 = vpop.eup %5189  ;;  %v8231_v7 = vld [vmem:[#allocation46_spill] sm:$0xff] }
 0x1b0   :  { %v6282_v59 = vadd.f32 %v963_v57, %v962_v46  ;;  %v8233_v46 = vld [vmem:[#allocation48_spill] sm:$0xff]  ;;  %v8234_v57 = vld [vmem:[#allocation49_spill] sm:$0xff] }
 0x1b2   :  { %5191 = vtanh.f32 %v6282_v59 }
 0x1bf   :  { %v5192_v1 = vpop.eup %5191 }
 0x1c0   :  { %v966_v60 = vmul.f32 %v5192_v1, %v5190_v54  ;;  %v8235_v54 = vld [vmem:[#allocation50_spill] sm:$0xff]  ;;  %v8236_v1 = vld [vmem:[#allocation51_spill] sm:$0xff] }
 0x1c2   :  { %1034 = vmatmul.mubr.f32.vlgmr.msra.gmra.mxu0 %v966_v60  ;;  %1105 = vmatmul.mubr.f32.vlgmr.msra.gmra.mxu1 %v966_v60  ;;  %v8237_v60 = vmov 0.0  }
 0x1c3   :  { %1175 = vmatpush1.msra.mxu0 %v6002_v8  ;;  %1246 = vmatpush1.msra.mxu1 %v6004_v9 }
 0x1c4   :  { %1176 = vmatprep.subr.mxu0 %v6006_v10  ;;  %1247 = vmatprep.subr.mxu1 %v6008_v11 }
 0x1c5   :  { %1177 = vmatpush1.msra.mxu0 %v6012_v12  ;;  %1248 = vmatpush1.msra.mxu1 %v6014_v13 }
 0x1c6   :  { %1178 = vmatprep.subr.mxu0 %v6018_v14  ;;  %1249 = vmatprep.subr.mxu1 %v6020_v15 }
 0x1c7   :  { %1179 = vmatpush1.msra.mxu0 %v6024_v16  ;;  %1250 = vmatpush1.msra.mxu1 %v6026_v17 }
 0x1c8   :  { %1180 = vmatprep.subr.mxu0 %v6030_v18  ;;  %1251 = vmatprep.subr.mxu1 %v6032_v19 }
 0x1c9   :  { %1181 = vmatpush1.msra.mxu0 %v6036_v20  ;;  %1252 = vmatpush1.msra.mxu1 %v6038_v21 }
 0x1ca   :  { %1182 = vmatprep.subr.mxu0 %v6042_v22  ;;  %1253 = vmatprep.subr.mxu1 %v6044_v23 }
 0x1cb   :  { %1183 = vmatpush1.msra.mxu0 %v6048_v24  ;;  %1254 = vmatpush1.msra.mxu1 %v6050_v25 }
 0x1cc   :  { %1184 = vmatprep.subr.mxu0 %v6054_v26  ;;  %1255 = vmatprep.subr.mxu1 %v6056_v27 }
 0x1cd   :  { %1185 = vmatpush1.msra.mxu0 %v6060_v28  ;;  %1256 = vmatpush1.msra.mxu1 %v6062_v29 }
 0x1ce   :  { %1186 = vmatprep.subr.mxu0 %v6066_v30  ;;  %1257 = vmatprep.subr.mxu1 %v6068_v31 }
 0x1cf   :  { %1187 = vmatpush1.msra.mxu0 %v6072_v32  ;;  %1258 = vmatpush1.msra.mxu1 %v6074_v33 }
 0x1d0   :  { %1188 = vmatprep.subr.mxu0 %v6078_v34  ;;  %1259 = vmatprep.subr.mxu1 %v6080_v35 }
 0x1d1   :  { %1189 = vmatpush1.msra.mxu0 %v6084_v36  ;;  %1260 = vmatpush1.msra.mxu1 %v6086_v37 }
 0x1d2   :  { %1190 = vmatprep.subr.mxu0 %v6090_v38  ;;  %1261 = vmatprep.subr.mxu1 %v6092_v39 }
 0x1d3   :  { %1191 = vmatpush1.msra.mxu0 %v6096_v40  ;;  %1262 = vmatpush1.msra.mxu1 %v6098_v41 }
 0x1d4   :  { %1192 = vmatprep.subr.mxu0 %v6102_v42  ;;  %1263 = vmatprep.subr.mxu1 %v6104_v43 }
 0x1d5   :  { %1193 = vmatpush1.msra.mxu0 %v6108_v44  ;;  %1264 = vmatpush1.msra.mxu1 %v6110_v45 }
 0x1d6   :  { %1194 = vmatprep.subr.mxu0 %v8214_v53  ;;  %1265 = vmatprep.subr.mxu1 %v8215_v56 }
 0x1d7   :  { %1195 = vmatpush1.msra.mxu0 %v8216_v55  ;;  %1266 = vmatpush1.msra.mxu1 %v8217_v62 }
 0x1d8   :  { %1196 = vmatprep.subr.mxu0 %v8218_v63  ;;  %1267 = vmatprep.subr.mxu1 %v8219_v6 }
 0x1d9   :  { %1197 = vmatpush1.msra.mxu0 %v8220_v48  ;;  %1268 = vmatpush1.msra.mxu1 %v8221_v2 }
 0x1da   :  { %1198 = vmatprep.subr.mxu0 %v8222_v49  ;;  %1269 = vmatprep.subr.mxu1 %v8223_v50 }
 0x1db   :  { %1199 = vmatpush1.msra.mxu0 %v8224_v51  ;;  %1270 = vmatpush1.msra.mxu1 %v8225_v52 }
 0x1dc   :  { %1200 = vmatprep.subr.mxu0 %v8226_v3  ;;  %1271 = vmatprep.subr.mxu1 %v8227_v0  ;;  %v8238_v0 = vld [vmem:[#allocation52_spill] sm:$0xff] }
 0x1dd   :  { %1201 = vmatpush1.msra.mxu0 %v8228_v4  ;;  %1272 = vmatpush1.msra.mxu1 %v8229_v5  ;;  %v8239_v5 = vld [vmem:[#allocation27_spill] sm:$0xff] }
 0x1de   :  { %1202 = vmatprep.subr.mxu0 %v8230_v58  ;;  %1273 = vmatprep.subr.mxu1 %v8231_v7  ;;  %v8240_v58 = vld [vmem:[#allocation28_spill] sm:$0xff] }
 0x1df   :  { %1203 = vmatpush1.msra.mxu0 %v8232_v61  ;;  %1274 = vmatpush1.msra.mxu1 %v8233_v46 }
 0x1e0   :  { %1204 = vmatprep.subr.mxu0 %v8234_v57  ;;  %1275 = vmatprep.subr.mxu1 %v8235_v54 }
 0x1e1   :  { %1205 = vmatpush1.msra.mxu0 %v8236_v1  ;;  %1238 = vmatprep.mubr.f32.mxu0 %v8237_v60 }
 0x1e2   :  { %1276 = vmatpush1.msra.mxu1 %v8238_v0  ;;  %1309 = vmatprep.mubr.f32.mxu1 %v8237_v60  ;;  %v968_v0 = vld [vmem:[#allocation2 + $0x1] ss:$8 sm:$0xf] }
 0x1e3   :  { %1379 = vmatprep.subr.mxu0 %v8239_v5  ;;  %1450 = vmatprep.subr.mxu1 %v8240_v58 }
 0x282   :  { %v1035_v7 = vpop.f32.mrf.mxu0  ;;  %v1106_v61 = vpop.f32.mrf.mxu1 }
 0x284   :  { %v1037_v4 = vpop.f32.mrf.mxu0  ;;  %v1108_v46 = vpop.f32.mrf.mxu1 }
 0x285   :  { %v1115_v3 = vcombine.low %v1035_v7, %v1037_v4  ;;  %v1116_v57 = vcombine.low %v1106_v61, %v1108_v46 }
 0x287   :  { %v1123_v54 = vrot.slane %v1115_v3, %v6277_v47  ;;  %v1130_v1 = vrot.slane %v1116_v57, %v6277_v47 }
 0x289   :  { %v1131_v52 = vcombine.low %v1123_v54, %v1130_v1 }
 0x28b   :  { %v1138_v51 = vrot.slane %v1131_v52, %v6277_v47 }
 0x28d   :  { %v1140_v50 = vadd.f32 %v1138_v51, %v968_v0 }
 0x28f   :  { %v5050_v60 = vmul.f32 -1.442695, %v1140_v50  ;;  %v1148_v49 = vrot.slane %v1140_v50, 1  ;;  %v1159_v58 = vrot.slane %v1140_v50, 3  ;;  %v1156_v6 = vrot.slane %v1140_v50, 2 }
 0x291   :  { %5193 = vpow2.f32 %v5050_v60  ;;  %v5051_v5 = vmul.f32 -1.442695, %v1148_v49  ;;  %v5052_v2 = vmul.f32 -1.442695, %v1159_v58 }
 0x293   :  { %5195 = vpow2.f32 %v5051_v5 }
 0x294   :  { %5197 = vpow2.f32 %v5052_v2 }
 0x29e   :  { %v5194_v48 = vpop.eup %5193 }
 0x29f   :  { %v1144_v4 = vadd.f32 1.0, %v5194_v48 }
 0x2a0   :  { %v5196_v7 = vpop.eup %5195 }
 0x2a1   :  { %5199 = vrcp.f32 %v1144_v4  ;;  %v1153_v3 = vadd.f32 1.0, %v5196_v7  ;;  %v5198_v61 = vpop.eup %5197 }
 0x2a2   :  { %5201 = vtanh.f32 %v1156_v6  ;;  %v1164_v0 = vadd.f32 1.0, %v5198_v61 }
 0x2a3   :  { %5203 = vrcp.f32 %v1153_v3  ;;  %v1173_v3 = vld [vmem:[#allocation2 + $0x2] ss:$8 sm:$0xf] }
 0x2a4   :  { %5205 = vrcp.f32 %v1164_v0 }
 0x2ae   :  { %v5200_v52 = vpop.eup %5199 }
 0x2af   :  { %v5202_v46 = vpop.eup %5201 }
 0x2b0   :  { %v5204_v51 = vpop.eup %5203  ;;  %v1168_v49 = vmul.f32 %v5202_v46, %v5200_v52 }
 0x2b1   :  { %v1167_v57 = vmul.f32 %v5204_v51, %v6282_v59  ;;  %v5206_v48 = vpop.eup %5205 }
 0x2b3   :  { %v6355_v5 = vadd.f32 %v1168_v49, %v1167_v57 }
 0x2b5   :  { %5207 = vtanh.f32 %v6355_v5 }
 0x2c2   :  { %v5208_v50 = vpop.eup %5207 }
 0x2c3   :  { %v1171_v2 = vmul.f32 %v5208_v50, %v5206_v48 }
 0x2c5   :  { %1239 = vmatmul.mubr.f32.vlgmr.msra.gmra.mxu0 %v1171_v2  ;;  %1310 = vmatmul.mubr.f32.vlgmr.msra.gmra.mxu1 %v1171_v2 }
 0x2c6   :  { %1380 = vmatpush1.msra.mxu0 %v6002_v8  ;;  %1451 = vmatpush1.msra.mxu1 %v6004_v9  ;;  %v8241_v8 = vld [vmem:[#allocation34_spill] sm:$0xff]  ;;  %v8242_v9 = vld [vmem:[#allocation35_spill] sm:$0xff] }
 0x2c7   :  { %1381 = vmatprep.subr.mxu0 %v6006_v10  ;;  %1452 = vmatprep.subr.mxu1 %v6008_v11  ;;  %v8243_v10 = vld [vmem:[#allocation36_spill] sm:$0xff]  ;;  %v8244_v11 = vld [vmem:[#allocation37_spill] sm:$0xff] }
 0x2c8   :  { %1382 = vmatpush1.msra.mxu0 %v6012_v12  ;;  %1453 = vmatpush1.msra.mxu1 %v6014_v13  ;;  %v8245_v12 = vld [vmem:[#allocation38_spill] sm:$0xff]  ;;  %v8246_v13 = vld [vmem:[#allocation39_spill] sm:$0xff] }
 0x2c9   :  { %1383 = vmatprep.subr.mxu0 %v6018_v14  ;;  %1454 = vmatprep.subr.mxu1 %v6020_v15  ;;  %v8247_v14 = vld [vmem:[#allocation40_spill] sm:$0xff]  ;;  %v8248_v15 = vld [vmem:[#allocation41_spill] sm:$0xff] }
 0x2ca   :  { %1384 = vmatpush1.msra.mxu0 %v6024_v16  ;;  %1455 = vmatpush1.msra.mxu1 %v6026_v17  ;;  %v8249_v16 = vld [vmem:[#allocation42_spill] sm:$0xff]  ;;  %v8250_v17 = vld [vmem:[#allocation43_spill] sm:$0xff] }
 0x2cb   :  { %1385 = vmatprep.subr.mxu0 %v6030_v18  ;;  %1456 = vmatprep.subr.mxu1 %v6032_v19  ;;  %v8251_v18 = vld [vmem:[#allocation44_spill] sm:$0xff]  ;;  %v8252_v19 = vld [vmem:[#allocation45_spill] sm:$0xff] }
 0x2cc   :  { %1386 = vmatpush1.msra.mxu0 %v6036_v20  ;;  %1457 = vmatpush1.msra.mxu1 %v6038_v21  ;;  %v8253_v20 = vld [vmem:[#allocation46_spill] sm:$0xff]  ;;  %v8254_v21 = vld [vmem:[#allocation47_spill] sm:$0xff] }
 0x2cd   :  { %1387 = vmatprep.subr.mxu0 %v6042_v22  ;;  %1458 = vmatprep.subr.mxu1 %v6044_v23  ;;  %v8255_v22 = vld [vmem:[#allocation48_spill] sm:$0xff]  ;;  %v8256_v23 = vld [vmem:[#allocation49_spill] sm:$0xff] }
 0x2ce   :  { %1388 = vmatpush1.msra.mxu0 %v6048_v24  ;;  %1459 = vmatpush1.msra.mxu1 %v6050_v25  ;;  %v8257_v24 = vld [vmem:[#allocation50_spill] sm:$0xff]  ;;  %v8258_v25 = vld [vmem:[#allocation51_spill] sm:$0xff] }
 0x2cf   :  { %1389 = vmatprep.subr.mxu0 %v6054_v26  ;;  %1460 = vmatprep.subr.mxu1 %v6056_v27  ;;  %v8259_v26 = vmov 0.0   ;;  %v8260_v27 = vld [vmem:[#allocation52_spill] sm:$0xff] }
 0x2d0   :  { %1390 = vmatpush1.msra.mxu0 %v6060_v28  ;;  %1461 = vmatpush1.msra.mxu1 %v6062_v29  ;;  %v8261_v28 = vld [vmem:[#allocation27_spill] sm:$0xff]  ;;  %v8262_v29 = vld [vmem:[#allocation28_spill] sm:$0xff] }
 0x2d1   :  { %1391 = vmatprep.subr.mxu0 %v6066_v30  ;;  %1462 = vmatprep.subr.mxu1 %v6068_v31 }
 0x2d2   :  { %1392 = vmatpush1.msra.mxu0 %v6072_v32  ;;  %1463 = vmatpush1.msra.mxu1 %v6074_v33 }
 0x2d3   :  { %1393 = vmatprep.subr.mxu0 %v6078_v34  ;;  %1464 = vmatprep.subr.mxu1 %v6080_v35 }
 0x2d4   :  { %1394 = vmatpush1.msra.mxu0 %v6084_v36  ;;  %1465 = vmatpush1.msra.mxu1 %v6086_v37 }
 0x2d5   :  { %1395 = vmatprep.subr.mxu0 %v6090_v38  ;;  %1466 = vmatprep.subr.mxu1 %v6092_v39 }
 0x2d6   :  { %1396 = vmatpush1.msra.mxu0 %v6096_v40  ;;  %1467 = vmatpush1.msra.mxu1 %v6098_v41 }
 0x2d7   :  { %1397 = vmatprep.subr.mxu0 %v6102_v42  ;;  %1468 = vmatprep.subr.mxu1 %v6104_v43 }
 0x2d8   :  { %1398 = vmatpush1.msra.mxu0 %v6108_v44  ;;  %1469 = vmatpush1.msra.mxu1 %v6110_v45 }
 0x2d9   :  { %1399 = vmatprep.subr.mxu0 %v8214_v53  ;;  %1470 = vmatprep.subr.mxu1 %v8215_v56 }
 0x2da   :  { %1400 = vmatpush1.msra.mxu0 %v8216_v55  ;;  %1471 = vmatpush1.msra.mxu1 %v8217_v62 }
 0x2db   :  { %1401 = vmatprep.subr.mxu0 %v8218_v63  ;;  %1472 = vmatprep.subr.mxu1 %v8241_v8 }
 0x2dc   :  { %1402 = vmatpush1.msra.mxu0 %v8242_v9  ;;  %1473 = vmatpush1.msra.mxu1 %v8243_v10 }
 0x2dd   :  { %1403 = vmatprep.subr.mxu0 %v8244_v11  ;;  %1474 = vmatprep.subr.mxu1 %v8245_v12 }
 0x2de   :  { %1404 = vmatpush1.msra.mxu0 %v8246_v13  ;;  %1475 = vmatpush1.msra.mxu1 %v8247_v14 }
 0x2df   :  { %1405 = vmatprep.subr.mxu0 %v8248_v15  ;;  %1476 = vmatprep.subr.mxu1 %v8249_v16 }
 0x2e0   :  { %1406 = vmatpush1.msra.mxu0 %v8250_v17  ;;  %1477 = vmatpush1.msra.mxu1 %v8251_v18 }
 0x2e1   :  { %1407 = vmatprep.subr.mxu0 %v8252_v19  ;;  %1478 = vmatprep.subr.mxu1 %v8253_v20 }
 0x2e2   :  { %1408 = vmatpush1.msra.mxu0 %v8254_v21  ;;  %1479 = vmatpush1.msra.mxu1 %v8255_v22 }
 0x2e3   :  { %1409 = vmatprep.subr.mxu0 %v8256_v23  ;;  %1480 = vmatprep.subr.mxu1 %v8257_v24 }
 0x2e4   :  { %1410 = vmatpush1.msra.mxu0 %v8258_v25  ;;  %1443 = vmatprep.mubr.f32.mxu0 %v8259_v26 }
 0x2e5   :  { %1481 = vmatpush1.msra.mxu1 %v8260_v27  ;;  %1514 = vmatprep.mubr.f32.mxu1 %v8259_v26 }
 0x2e6   :  { %1584 = vmatprep.subr.mxu0 %v8261_v28  ;;  %1655 = vmatprep.subr.mxu1 %v8262_v29 }
 0x385   :  { %v1240_v30 = vpop.f32.mrf.mxu0  ;;  %v1311_v31 = vpop.f32.mrf.mxu1 }
 0x387   :  { %v1242_v59 = vpop.f32.mrf.mxu0  ;;  %v1313_v6 = vpop.f32.mrf.mxu1 }
 0x388   :  { %v1320_v58 = vcombine.low %v1240_v30, %v1242_v59  ;;  %v1321_v54 = vcombine.low %v1311_v31, %v1313_v6 }
 0x38a   :  { %v1328_v1 = vrot.slane %v1320_v58, %v6277_v47  ;;  %v1335_v60 = vrot.slane %v1321_v54, %v6277_v47 }
 0x38c   :  { %v1336_v4 = vcombine.low %v1328_v1, %v1335_v60 }
 0x38e   :  { %v1343_v7 = vrot.slane %v1336_v4, %v6277_v47 }
 0x390   :  { %v1345_v61 = vadd.f32 %v1343_v7, %v1173_v3  ;;  %v6431_v3 = vld [vmem:[#allocation10 + $0x1e0] sm:$0xff] }
 0x392   :  { %v5053_v52 = vmul.f32 -1.442695, %v1345_v61  ;;  %v1353_v46 = vrot.slane %v1345_v61, 1  ;;  %v1364_v0 = vrot.slane %v1345_v61, 3  ;;  %v1361_v48 = vrot.slane %v1345_v61, 2  ;;  %v6434_v61 = vld [vmem:[#allocation10 + $0x1f0] sm:$0xff] }
 0x394   :  { %5209 = vpow2.f32 %v5053_v52  ;;  %v5054_v51 = vmul.f32 -1.442695, %v1353_v46  ;;  %v5055_v57 = vmul.f32 -1.442695, %v1364_v0  ;;  %v6440_v52 = vld [vmem:[#allocation10 + $0x1d8] sm:$0xff]  ;;  %v6443_v46 = vld [vmem:[#allocation10 + $0x1c0] sm:$0xff] }
 0x395   :  { %v6449_v0 = vld [vmem:[#allocation10 + $0x1a8] sm:$0xff] }
 0x396   :  { %5211 = vpow2.f32 %v5054_v51  ;;  %v6446_v51 = vld [vmem:[#allocation10 + $0x1d0] sm:$0xff] }
 0x397   :  { %5213 = vpow2.f32 %v5055_v57  ;;  %v6452_v57 = vld [vmem:[#allocation10 + $0x1b8] sm:$0xff] }
 0x3a1   :  { %v5210_v49 = vpop.eup %5209 }
 0x3a2   :  { %v1349_v50 = vadd.f32 1.0, %v5210_v49  ;;  %v6455_v49 = vld [vmem:[#allocation10 + $0x1a0] sm:$0xff] }
 0x3a3   :  { %v5212_v2 = vpop.eup %5211 }
 0x3a4   :  { %5215 = vrcp.f32 %v1349_v50  ;;  %v1358_v28 = vadd.f32 1.0, %v5212_v2  ;;  %v5214_v29 = vpop.eup %5213  ;;  %v6461_v50 = vld [vmem:[#allocation10 + $0x188] sm:$0xff]  ;;  %v6464_v2 = vld [vmem:[#allocation10 + $0x198] sm:$0xff] }
 0x3a5   :  { %5217 = vtanh.f32 %v1361_v48  ;;  %v1369_v6 = vadd.f32 1.0, %v5214_v29  ;;  %v6458_v48 = vld [vmem:[#allocation10 + $0x1b0] sm:$0xff] }
 0x3a6   :  { %5219 = vrcp.f32 %v1358_v28  ;;  %v6467_v28 = vld [vmem:[#allocation10 + $0x180] sm:$0xff]  ;;  %v6470_v29 = vld [vmem:[#allocation10 + $0x190] sm:$0xff] }
 0x3a7   :  { %5221 = vrcp.f32 %v1369_v6  ;;  %v6482_v6 = vld [vmem:[#allocation10 + $0x170] sm:$0xff] }
 0x3a8   :  { %8263 = vst [vmem:[#allocation29_spill] sm:$0xff] %v6482_v6 }
 0x3b1   :  { %v5216_v30 = vpop.eup %5215 }
 0x3b2   :  { %v5218_v31 = vpop.eup %5217 }
 0x3b3   :  { %v5220_v59 = vpop.eup %5219  ;;  %v1373_v54 = vmul.f32 %v5218_v31, %v5216_v30  ;;  %v6473_v30 = vld [vmem:[#allocation10 + $0x168] sm:$0xff]  ;;  %v6476_v31 = vld [vmem:[#allocation10 + $0x178] sm:$0xff] }
 0x3b4   :  { %v1372_v58 = vmul.f32 %v5220_v59, %v6355_v5  ;;  %v5222_v60 = vpop.eup %5221  ;;  %v6437_v5 = vld [vmem:[#allocation10 + $0x1c8] sm:$0xff]  ;;  %v6479_v59 = vld [vmem:[#allocation10 + $0x160] sm:$0xff] }
 0x3b6   :  { %v6428_v1 = vadd.f32 %v1373_v54, %v1372_v58  ;;  %v6485_v58 = vld [vmem:[#allocation10 + $0x148] sm:$0xff]  ;;  %v6488_v54 = vld [vmem:[#allocation10 + $0x158] sm:$0xff] }
 0x3b8   :  { %5223 = vtanh.f32 %v6428_v1 }
 0x3c5   :  { %v5224_v4 = vpop.eup %5223 }
 0x3c6   :  { %v1376_v7 = vmul.f32 %v5224_v4, %v5222_v60  ;;  %v6491_v60 = vld [vmem:[#allocation10 + $0x140] sm:$0xff]  ;;  %v6494_v4 = vld [vmem:[#allocation10 + $0x150] sm:$0xff] }
 0x3c8   :  { %1444 = vmatmul.mubr.f32.vlgmr.msra.gmra.mxu0 %v1376_v7  ;;  %1515 = vmatmul.mubr.f32.vlgmr.msra.gmra.mxu1 %v1376_v7  ;;  %v6497_v7 = vld [vmem:[#allocation10 + $0x128] sm:$0xff] }
 0x3c9   :  { %1585 = vmatpush1.msra.mxu0 %v6431_v3  ;;  %1656 = vmatpush1.msra.mxu1 %v6434_v61 }
 0x3ca   :  { %1586 = vmatprep.subr.mxu0 %v6437_v5  ;;  %1657 = vmatprep.subr.mxu1 %v6440_v52 }
 0x3cb   :  { %1587 = vmatpush1.msra.mxu0 %v6443_v46  ;;  %1658 = vmatpush1.msra.mxu1 %v6446_v51 }
 0x3cc   :  { %1588 = vmatprep.subr.mxu0 %v6449_v0  ;;  %1659 = vmatprep.subr.mxu1 %v6452_v57 }
 0x3cd   :  { %1589 = vmatpush1.msra.mxu0 %v6455_v49  ;;  %1660 = vmatpush1.msra.mxu1 %v6458_v48 }
 0x3ce   :  { %1590 = vmatprep.subr.mxu0 %v6461_v50  ;;  %1661 = vmatprep.subr.mxu1 %v6464_v2 }
 0x3cf   :  { %1591 = vmatpush1.msra.mxu0 %v6467_v28  ;;  %1662 = vmatpush1.msra.mxu1 %v6470_v29 }
 0x3d0   :  { %1592 = vmatprep.subr.mxu0 %v6473_v30  ;;  %1663 = vmatprep.subr.mxu1 %v6476_v31 }
 0x3d1   :  { %1593 = vmatpush1.msra.mxu0 %v6479_v59  ;;  %1664 = vmatpush1.msra.mxu1 %v6482_v6  ;;  %v6500_v6 = vld [vmem:[#allocation10 + $0x138] sm:$0xff] }
 0x3d2   :  { %1594 = vmatprep.subr.mxu0 %v6485_v58  ;;  %1665 = vmatprep.subr.mxu1 %v6488_v54 }
 0x3d3   :  { %1595 = vmatpush1.msra.mxu0 %v6491_v60  ;;  %1666 = vmatpush1.msra.mxu1 %v6494_v4 }
 0x3d4   :  { %1596 = vmatprep.subr.mxu0 %v6497_v7  ;;  %1667 = vmatprep.subr.mxu1 %v6500_v6 }
 0x3d5   :  { %1597 = vmatpush1.msra.mxu0 %v6072_v32  ;;  %1668 = vmatpush1.msra.mxu1 %v6074_v33  ;;  %v6543_v32 = vld [vmem:[#allocation10 + $0x1e8] sm:$0xff]  ;;  %v6546_v33 = vld [vmem:[#allocation10 + $0x1f8] sm:$0xff] }
 0x3d6   :  { %1598 = vmatprep.subr.mxu0 %v6078_v34  ;;  %1669 = vmatprep.subr.mxu1 %v6080_v35  ;;  %8264 = vst [vmem:[#allocation30_spill] sm:$0xff] %v6543_v32  ;;  %8265 = vst [vmem:[#allocation31_spill] sm:$0xff] %v6546_v33 }
 0x3d7   :  { %1599 = vmatpush1.msra.mxu0 %v6084_v36  ;;  %1670 = vmatpush1.msra.mxu1 %v6086_v37 }
 0x3d8   :  { %1600 = vmatprep.subr.mxu0 %v6090_v38  ;;  %1671 = vmatprep.subr.mxu1 %v6092_v39 }
 0x3d9   :  { %1601 = vmatpush1.msra.mxu0 %v6096_v40  ;;  %1672 = vmatpush1.msra.mxu1 %v6098_v41 }
 0x3da   :  { %1602 = vmatprep.subr.mxu0 %v6102_v42  ;;  %1673 = vmatprep.subr.mxu1 %v6104_v43 }
 0x3db   :  { %1603 = vmatpush1.msra.mxu0 %v6108_v44  ;;  %1674 = vmatpush1.msra.mxu1 %v6110_v45  ;;  %v1378_v44 = vld [vmem:[#allocation2 + $0x3] ss:$8 sm:$0xf] }
 0x3dc   :  { %1604 = vmatprep.subr.mxu0 %v8214_v53  ;;  %1675 = vmatprep.subr.mxu1 %v8215_v56 }
 0x3dd   :  { %1605 = vmatpush1.msra.mxu0 %v8216_v55  ;;  %1676 = vmatpush1.msra.mxu1 %v8217_v62 }
 0x3de   :  { %1606 = vmatprep.subr.mxu0 %v8218_v63  ;;  %1677 = vmatprep.subr.mxu1 %v8241_v8 }
 0x3df   :  { %1607 = vmatpush1.msra.mxu0 %v8242_v9  ;;  %1678 = vmatpush1.msra.mxu1 %v8243_v10 }
 0x3e0   :  { %1608 = vmatprep.subr.mxu0 %v8244_v11  ;;  %1679 = vmatprep.subr.mxu1 %v8245_v12 }
 0x3e1   :  { %1609 = vmatpush1.msra.mxu0 %v8246_v13  ;;  %1680 = vmatpush1.msra.mxu1 %v8247_v14 }
 0x3e2   :  { %1610 = vmatprep.subr.mxu0 %v8248_v15  ;;  %1681 = vmatprep.subr.mxu1 %v8249_v16 }
 0x3e3   :  { %1611 = vmatpush1.msra.mxu0 %v8250_v17  ;;  %1682 = vmatpush1.msra.mxu1 %v8251_v18 }
 0x3e4   :  { %1612 = vmatprep.subr.mxu0 %v8252_v19  ;;  %1683 = vmatprep.subr.mxu1 %v8253_v20 }
 0x3e5   :  { %1613 = vmatpush1.msra.mxu0 %v8254_v21  ;;  %1684 = vmatpush1.msra.mxu1 %v8255_v22 }
 0x3e6   :  { %1614 = vmatprep.subr.mxu0 %v8256_v23  ;;  %1685 = vmatprep.subr.mxu1 %v8257_v24  ;;  %v8266_v24 = vld [vmem:[#allocation29_spill] sm:$0xff] }
 0x3e7   :  { %1615 = vmatpush1.msra.mxu0 %v8258_v25  ;;  %1648 = vmatprep.mubr.f32.mxu0 %v8259_v26  ;;  %v6580_v25 = vld [vmem:[#allocation10 + $0x120] sm:$0xff] }
 0x3e8   :  { %1686 = vmatpush1.msra.mxu1 %v8260_v27  ;;  %1719 = vmatprep.mubr.f32.mxu1 %v8259_v26  ;;  %v6583_v27 = vld [vmem:[#allocation10 + $0x130] sm:$0xff] }
 0x3e9   :  { %1789 = vmatprep.subr.mxu0 %v6543_v32  ;;  %1860 = vmatprep.subr.mxu1 %v6546_v33 }
 0x488   :  { %v1445_v34 = vpop.f32.mrf.mxu0  ;;  %v1516_v35 = vpop.f32.mrf.mxu1 }
 0x48a   :  { %v1447_v36 = vpop.f32.mrf.mxu0  ;;  %v1518_v37 = vpop.f32.mrf.mxu1 }
 0x48b   :  { %v1525_v38 = vcombine.low %v1445_v34, %v1447_v36  ;;  %v1526_v39 = vcombine.low %v1516_v35, %v1518_v37  ;;  %v6589_v34 = vld [vmem:[#allocation10 + $0x118] sm:$0xff]  ;;  %v6592_v35 = vld [vmem:[#allocation10 + $0x100] sm:$0xff]  ;;  %v6595_v36 = vld [vmem:[#allocation10 + $0x110] sm:$0xff] }
 0x48c   :  { %v6598_v37 = vld [vmem:[#allocation10 + $0xe8] sm:$0xff] }
 0x48d   :  { %v1533_v40 = vrot.slane %v1525_v38, %v6277_v47  ;;  %v1540_v41 = vrot.slane %v1526_v39, %v6277_v47  ;;  %v6601_v38 = vld [vmem:[#allocation10 + $0xf8] sm:$0xff]  ;;  %v6604_v39 = vld [vmem:[#allocation10 + $0xe0] sm:$0xff] }
 0x48f   :  { %v1541_v42 = vcombine.low %v1533_v40, %v1540_v41  ;;  %v6607_v40 = vld [vmem:[#allocation10 + $0xf0] sm:$0xff]  ;;  %v6610_v41 = vld [vmem:[#allocation10 + $0xc8] sm:$0xff] }
 0x491   :  { %v1548_v43 = vrot.slane %v1541_v42, %v6277_v47  ;;  %v6613_v42 = vld [vmem:[#allocation10 + $0xd8] sm:$0xff] }
 0x493   :  { %v1550_v45 = vadd.f32 %v1548_v43, %v1378_v44  ;;  %v6616_v43 = vld [vmem:[#allocation10 + $0xc0] sm:$0xff]  ;;  %v6619_v44 = vld [vmem:[#allocation10 + $0xd0] sm:$0xff] }
 0x495   :  { %v5056_v53 = vmul.f32 -1.442695, %v1550_v45  ;;  %v1558_v56 = vrot.slane %v1550_v45, 1  ;;  %v1569_v62 = vrot.slane %v1550_v45, 3  ;;  %v1566_v9 = vrot.slane %v1550_v45, 2  ;;  %v6622_v45 = vld [vmem:[#allocation10 + $0xa8] sm:$0xff] }
 0x497   :  { %5225 = vpow2.f32 %v5056_v53  ;;  %v5057_v55 = vmul.f32 -1.442695, %v1558_v56  ;;  %v5058_v63 = vmul.f32 -1.442695, %v1569_v62  ;;  %v6625_v53 = vld [vmem:[#allocation10 + $0xb8] sm:$0xff]  ;;  %v6628_v56 = vld [vmem:[#allocation10 + $0xa0] sm:$0xff] }
 0x498   :  { %v6634_v62 = vld [vmem:[#allocation10 + $0x88] sm:$0xff] }
 0x499   :  { %5227 = vpow2.f32 %v5057_v55  ;;  %v6631_v55 = vld [vmem:[#allocation10 + $0xb0] sm:$0xff] }
 0x49a   :  { %5229 = vpow2.f32 %v5058_v63  ;;  %v6637_v63 = vld [vmem:[#allocation10 + $0x98] sm:$0xff] }
 0x49b   :  { %8267 = vst [vmem:[#allocation32_spill] sm:$0xff] %v6637_v63 }
 0x4a4   :  { %v5226_v8 = vpop.eup %5225 }
 0x4a5   :  { %v1554_v10 = vadd.f32 1.0, %v5226_v8  ;;  %v6640_v8 = vld [vmem:[#allocation10 + $0x80] sm:$0xff] }
 0x4a6   :  { %v5228_v11 = vpop.eup %5227  ;;  %8268 = vst [vmem:[#allocation33_spill] sm:$0xff] %v6640_v8 }
 0x4a7   :  { %5231 = vrcp.f32 %v1554_v10  ;;  %v1563_v12 = vadd.f32 1.0, %v5228_v11  ;;  %v5230_v13 = vpop.eup %5229  ;;  %v6646_v10 = vld [vmem:[#allocation10 + $0x68] sm:$0xff]  ;;  %v6649_v11 = vld [vmem:[#allocation10 + $0x78] sm:$0xff] }
 0x4a8   :  { %5233 = vtanh.f32 %v1566_v9  ;;  %v1574_v17 = vadd.f32 1.0, %v5230_v13  ;;  %v6643_v9 = vld [vmem:[#allocation10 + $0x90] sm:$0xff]  ;;  %8270 = vst [vmem:[#allocation35_spill] sm:$0xff] %v6646_v10  ;;  %8271 = vst [vmem:[#allocation36_spill] sm:$0xff] %v6649_v11 }
 0x4a9   :  { %5235 = vrcp.f32 %v1563_v12  ;;  %8269 = vst [vmem:[#allocation34_spill] sm:$0xff] %v6643_v9  ;;  %v6652_v12 = vld [vmem:[#allocation10 + $0x60] sm:$0xff]  ;;  %v6655_v13 = vld [vmem:[#allocation10 + $0x70] sm:$0xff] }
 0x4aa   :  { %5237 = vrcp.f32 %v1574_v17  ;;  %8272 = vst [vmem:[#allocation37_spill] sm:$0xff] %v6652_v12  ;;  %8273 = vst [vmem:[#allocation38_spill] sm:$0xff] %v6655_v13  ;;  %v6667_v17 = vld [vmem:[#allocation10 + $0x50] sm:$0xff] }
 0x4ab   :  { %8277 = vst [vmem:[#allocation42_spill] sm:$0xff] %v6667_v17 }
 0x4b4   :  { %v5232_v14 = vpop.eup %5231 }
 0x4b5   :  { %v5234_v15 = vpop.eup %5233 }
 0x4b6   :  { %v5236_v16 = vpop.eup %5235  ;;  %v1578_v19 = vmul.f32 %v5234_v15, %v5232_v14  ;;  %v6658_v14 = vld [vmem:[#allocation10 + $0x48] sm:$0xff]  ;;  %v6661_v15 = vld [vmem:[#allocation10 + $0x58] sm:$0xff] }
 0x4b7   :  { %v1577_v18 = vmul.f32 %v5236_v16, %v6428_v1  ;;  %v5238_v21 = vpop.eup %5237  ;;  %v6586_v1 = vld [vmem:[#allocation10 + $0x108] sm:$0xff]  ;;  %8274 = vst [vmem:[#allocation39_spill] sm:$0xff] %v6658_v14  ;;  %8275 = vst [vmem:[#allocation40_spill] sm:$0xff] %v6661_v15  ;;  %v6664_v16 = vld [vmem:[#allocation10 + $0x40] sm:$0xff] }
 0x4b8   :  { %8276 = vst [vmem:[#allocation41_spill] sm:$0xff] %v6664_v16 }
 0x4b9   :  { %v6553_v20 = vadd.f32 %v1578_v19, %v1577_v18  ;;  %v6670_v18 = vld [vmem:[#allocation10 + $0x28] sm:$0xff]  ;;  %v6673_v19 = vld [vmem:[#allocation10 + $0x38] sm:$0xff] }
 0x4ba   :  { %8278 = vst [vmem:[#allocation43_spill] sm:$0xff] %v6670_v18  ;;  %8279 = vst [vmem:[#allocation44_spill] sm:$0xff] %v6673_v19 }
 0x4bb   :  { %5239 = vtanh.f32 %v6553_v20 }
 0x4c8   :  { %v5240_v22 = vpop.eup %5239 }
 0x4c9   :  { %v1581_v23 = vmul.f32 %v5240_v22, %v5238_v21  ;;  %v6676_v21 = vld [vmem:[#allocation10 + $0x20] sm:$0xff]  ;;  %v6679_v22 = vld [vmem:[#allocation10 + $0x30] sm:$0xff] }
 0x4ca   :  { %8280 = vst [vmem:[#allocation45_spill] sm:$0xff] %v6676_v21  ;;  %8281 = vst [vmem:[#allocation46_spill] sm:$0xff] %v6679_v22 }
 0x4cb   :  { %1649 = vmatmul.mubr.f32.vlgmr.msra.gmra.mxu0 %v1581_v23  ;;  %1720 = vmatmul.mubr.f32.vlgmr.msra.gmra.mxu1 %v1581_v23  ;;  %v6682_v23 = vld [vmem:[#allocation10 + $0x8] sm:$0xff] }
 0x4cc   :  { %1790 = vmatpush1.msra.mxu0 %v6431_v3  ;;  %1861 = vmatpush1.msra.mxu1 %v6434_v61  ;;  %8282 = vst [vmem:[#allocation47_spill] sm:$0xff] %v6682_v23 }
 0x4cd   :  { %1791 = vmatprep.subr.mxu0 %v6437_v5  ;;  %1862 = vmatprep.subr.mxu1 %v6440_v52 }
 0x4ce   :  { %1792 = vmatpush1.msra.mxu0 %v6443_v46  ;;  %1863 = vmatpush1.msra.mxu1 %v6446_v51 }
 0x4cf   :  { %1793 = vmatprep.subr.mxu0 %v6449_v0  ;;  %1864 = vmatprep.subr.mxu1 %v6452_v57 }
 0x4d0   :  { %1794 = vmatpush1.msra.mxu0 %v6455_v49  ;;  %1865 = vmatpush1.msra.mxu1 %v6458_v48 }
 0x4d1   :  { %1795 = vmatprep.subr.mxu0 %v6461_v50  ;;  %1866 = vmatprep.subr.mxu1 %v6464_v2 }
 0x4d2   :  { %1796 = vmatpush1.msra.mxu0 %v6467_v28  ;;  %1867 = vmatpush1.msra.mxu1 %v6470_v29 }
 0x4d3   :  { %1797 = vmatprep.subr.mxu0 %v6473_v30  ;;  %1868 = vmatprep.subr.mxu1 %v6476_v31 }
 0x4d4   :  { %1798 = vmatpush1.msra.mxu0 %v6479_v59  ;;  %1869 = vmatpush1.msra.mxu1 %v8266_v24 }
 0x4d5   :  { %1799 = vmatprep.subr.mxu0 %v6485_v58  ;;  %1870 = vmatprep.subr.mxu1 %v6488_v54 }
 0x4d6   :  { %1800 = vmatpush1.msra.mxu0 %v6491_v60  ;;  %1871 = vmatpush1.msra.mxu1 %v6494_v4 }
 0x4d7   :  { %1801 = vmatprep.subr.mxu0 %v6497_v7  ;;  %1872 = vmatprep.subr.mxu1 %v6500_v6 }
 0x4d8   :  { %1802 = vmatpush1.msra.mxu0 %v6580_v25  ;;  %1873 = vmatpush1.msra.mxu1 %v6583_v27 }
 0x4d9   :  { %1803 = vmatprep.subr.mxu0 %v6586_v1  ;;  %1874 = vmatprep.subr.mxu1 %v6589_v34 }
 0x4da   :  { %1804 = vmatpush1.msra.mxu0 %v6592_v35  ;;  %1875 = vmatpush1.msra.mxu1 %v6595_v36 }
 0x4db   :  { %1805 = vmatprep.subr.mxu0 %v6598_v37  ;;  %1876 = vmatprep.subr.mxu1 %v6601_v38 }
 0x4dc   :  { %1806 = vmatpush1.msra.mxu0 %v6604_v39  ;;  %1877 = vmatpush1.msra.mxu1 %v6607_v40 }
 0x4dd   :  { %1807 = vmatprep.subr.mxu0 %v6610_v41  ;;  %1878 = vmatprep.subr.mxu1 %v6613_v42 }
 0x4de   :  { %1808 = vmatpush1.msra.mxu0 %v6616_v43  ;;  %1879 = vmatpush1.msra.mxu1 %v6619_v44 }
 0x4df   :  { %1809 = vmatprep.subr.mxu0 %v6622_v45  ;;  %1880 = vmatprep.subr.mxu1 %v6625_v53 }
 0x4e0   :  { %1810 = vmatpush1.msra.mxu0 %v6628_v56  ;;  %1881 = vmatpush1.msra.mxu1 %v6631_v55 }
 0x4e1   :  { %1811 = vmatprep.subr.mxu0 %v6634_v62  ;;  %1882 = vmatprep.subr.mxu1 %v6637_v63 }
 0x4e2   :  { %1812 = vmatpush1.msra.mxu0 %v6640_v8  ;;  %1883 = vmatpush1.msra.mxu1 %v6643_v9 }
 0x4e3   :  { %1813 = vmatprep.subr.mxu0 %v6646_v10  ;;  %1884 = vmatprep.subr.mxu1 %v6649_v11 }
 0x4e4   :  { %1814 = vmatpush1.msra.mxu0 %v6652_v12  ;;  %1885 = vmatpush1.msra.mxu1 %v6655_v13 }
 0x4e5   :  { %1815 = vmatprep.subr.mxu0 %v6658_v14  ;;  %1886 = vmatprep.subr.mxu1 %v6661_v15 }
 0x4e6   :  { %1816 = vmatpush1.msra.mxu0 %v6664_v16  ;;  %1887 = vmatpush1.msra.mxu1 %v6667_v17  ;;  %v6685_v17 = vld [vmem:[#allocation10 + $0x18] sm:$0xff] }
 0x4e7   :  { %1817 = vmatprep.subr.mxu0 %v6670_v18  ;;  %1888 = vmatprep.subr.mxu1 %v6673_v19  ;;  %8283 = vst [vmem:[#allocation48_spill] sm:$0xff] %v6685_v17  ;;  %v6688_v18 = vld [vmem:[#allocation10] sm:$0xff]  ;;  %v6692_v19 = vld [vmem:[#allocation10 + $0x10] sm:$0xff] }
 0x4e8   :  { %1818 = vmatpush1.msra.mxu0 %v6676_v21  ;;  %1889 = vmatpush1.msra.mxu1 %v6679_v22  ;;  %8284 = vst [vmem:[#allocation49_spill] sm:$0xff] %v6688_v18  ;;  %8285 = vst [vmem:[#allocation50_spill] sm:$0xff] %v6692_v19 }
 0x4e9   :  { %1819 = vmatprep.subr.mxu0 %v6682_v23  ;;  %1890 = vmatprep.subr.mxu1 %v6685_v17 }
 0x4ea   :  { %1820 = vmatpush1.msra.mxu0 %v6688_v18  ;;  %1853 = vmatprep.mubr.f32.mxu0 %v8259_v26 }
 0x4eb   :  { %1891 = vmatpush1.msra.mxu1 %v6692_v19  ;;  %1924 = vmatprep.mubr.f32.mxu1 %v8259_v26  ;;  %v1583_v19 = vld [vmem:[#allocation2 + $0x4] ss:$8 sm:$0xf] }
 0x4ec   :  { %1994 = vmatprep.subr.mxu0 %v6543_v32  ;;  %2065 = vmatprep.subr.mxu1 %v6546_v33 }
 0x58b   :  { %v1650_v23 = vpop.f32.mrf.mxu0  ;;  %v1721_v22 = vpop.f32.mrf.mxu1 }
 0x58d   :  { %v1652_v21 = vpop.f32.mrf.mxu0  ;;  %v1723_v17 = vpop.f32.mrf.mxu1 }
 0x58e   :  { %v1730_v16 = vcombine.low %v1650_v23, %v1652_v21  ;;  %v1731_v15 = vcombine.low %v1721_v22, %v1723_v17  ;;  %v8290_v22 = vld [vmem:[#allocation36_spill] sm:$0xff]  ;;  %v8291_v23 = vld [vmem:[#allocation37_spill] sm:$0xff] }
 0x590   :  { %v1738_v18 = vrot.slane %v1730_v16, %v6277_v47  ;;  %v1745_v14 = vrot.slane %v1731_v15, %v6277_v47 }
 0x592   :  { %v1746_v13 = vcombine.low %v1738_v18, %v1745_v14 }
 0x594   :  { %v1753_v12 = vrot.slane %v1746_v13, %v6277_v47 }
 0x596   :  { %v1755_v11 = vadd.f32 %v1753_v12, %v1583_v19  ;;  %v8289_v19 = vld [vmem:[#allocation35_spill] sm:$0xff] }
 0x598   :  { %v5059_v26 = vmul.f32 -1.442695, %v1755_v11  ;;  %v1763_v10 = vrot.slane %v1755_v11, 1  ;;  %v1774_v33 = vrot.slane %v1755_v11, 3  ;;  %v1771_v63 = vrot.slane %v1755_v11, 2  ;;  %v8288_v11 = vld [vmem:[#allocation34_spill] sm:$0xff] }
 0x59a   :  { %5241 = vpow2.f32 %v5059_v26  ;;  %v5060_v32 = vmul.f32 -1.442695, %v1763_v10  ;;  %v5061_v9 = vmul.f32 -1.442695, %v1774_v33 }
 0x59c   :  { %5243 = vpow2.f32 %v5060_v32 }
 0x59d   :  { %5245 = vpow2.f32 %v5061_v9 }
 0x5a7   :  { %v5242_v8 = vpop.eup %5241 }
 0x5a8   :  { %v1759_v21 = vadd.f32 1.0, %v5242_v8 }
 0x5a9   :  { %v5244_v17 = vpop.eup %5243 }
 0x5aa   :  { %5247 = vrcp.f32 %v1759_v21  ;;  %v1768_v16 = vadd.f32 1.0, %v5244_v17  ;;  %v5246_v14 = vpop.eup %5245  ;;  %v8292_v21 = vld [vmem:[#allocation38_spill] sm:$0xff]  ;;  %v8293_v17 = vld [vmem:[#allocation39_spill] sm:$0xff] }
 0x5ab   :  { %5249 = vtanh.f32 %v1771_v63  ;;  %v1779_v18 = vadd.f32 1.0, %v5246_v14  ;;  %v8287_v63 = vld [vmem:[#allocation33_spill] sm:$0xff] }
 0x5ac   :  { %5251 = vrcp.f32 %v1768_v16  ;;  %v8294_v16 = vld [vmem:[#allocation40_spill] sm:$0xff]  ;;  %v8295_v14 = vld [vmem:[#allocation41_spill] sm:$0xff] }
 0x5ad   :  { %5253 = vrcp.f32 %v1779_v18  ;;  %v8299_v18 = vld [vmem:[#allocation45_spill] sm:$0xff] }
 0x5b7   :  { %v5248_v13 = vpop.eup %5247 }
 0x5b8   :  { %v5250_v15 = vpop.eup %5249 }
 0x5b9   :  { %v5252_v12 = vpop.eup %5251  ;;  %v1783_v10 = vmul.f32 %v5250_v15, %v5248_v13  ;;  %v8296_v13 = vld [vmem:[#allocation42_spill] sm:$0xff]  ;;  %v8297_v15 = vld [vmem:[#allocation43_spill] sm:$0xff] }
 0x5ba   :  { %v1782_v26 = vmul.f32 %v5252_v12, %v6553_v20  ;;  %v5254_v33 = vpop.eup %5253  ;;  %v8286_v20 = vld [vmem:[#allocation32_spill] sm:$0xff] }
 0x5bb   :  { %v8298_v12 = vld [vmem:[#allocation44_spill] sm:$0xff] }
 0x5bc   :  { %v6702_v32 = vadd.f32 %v1783_v10, %v1782_v26  ;;  %v8300_v26 = vld [vmem:[#allocation46_spill] sm:$0xff]  ;;  %v8301_v10 = vld [vmem:[#allocation47_spill] sm:$0xff] }
 0x5be   :  { %5255 = vtanh.f32 %v6702_v32 }
 0x5cb   :  { %v5256_v8 = vpop.eup %5255 }
 0x5cc   :  { %v1786_v9 = vmul.f32 %v5256_v8, %v5254_v33  ;;  %v8302_v33 = vld [vmem:[#allocation48_spill] sm:$0xff]  ;;  %v8303_v8 = vld [vmem:[#allocation49_spill] sm:$0xff] }
 0x5ce   :  { %1854 = vmatmul.mubr.f32.vlgmr.msra.gmra.mxu0 %v1786_v9  ;;  %1925 = vmatmul.mubr.f32.vlgmr.msra.gmra.mxu1 %v1786_v9  ;;  %v8304_v9 = vmov 0.0  }
 0x5cf   :  { %1995 = vmatpush1.msra.mxu0 %v6431_v3  ;;  %2066 = vmatpush1.msra.mxu1 %v6434_v61 }
 0x5d0   :  { %1996 = vmatprep.subr.mxu0 %v6437_v5  ;;  %2067 = vmatprep.subr.mxu1 %v6440_v52 }
 0x5d1   :  { %1997 = vmatpush1.msra.mxu0 %v6443_v46  ;;  %2068 = vmatpush1.msra.mxu1 %v6446_v51 }
 0x5d2   :  { %1998 = vmatprep.subr.mxu0 %v6449_v0  ;;  %2069 = vmatprep.subr.mxu1 %v6452_v57 }
 0x5d3   :  { %1999 = vmatpush1.msra.mxu0 %v6455_v49  ;;  %2070 = vmatpush1.msra.mxu1 %v6458_v48 }
 0x5d4   :  { %2000 = vmatprep.subr.mxu0 %v6461_v50  ;;  %2071 = vmatprep.subr.mxu1 %v6464_v2 }
 0x5d5   :  { %2001 = vmatpush1.msra.mxu0 %v6467_v28  ;;  %2072 = vmatpush1.msra.mxu1 %v6470_v29 }
 0x5d6   :  { %2002 = vmatprep.subr.mxu0 %v6473_v30  ;;  %2073 = vmatprep.subr.mxu1 %v6476_v31 }
 0x5d7   :  { %2003 = vmatpush1.msra.mxu0 %v6479_v59  ;;  %2074 = vmatpush1.msra.mxu1 %v8266_v24 }
 0x5d8   :  { %2004 = vmatprep.subr.mxu0 %v6485_v58  ;;  %2075 = vmatprep.subr.mxu1 %v6488_v54 }
 0x5d9   :  { %2005 = vmatpush1.msra.mxu0 %v6491_v60  ;;  %2076 = vmatpush1.msra.mxu1 %v6494_v4 }
 0x5da   :  { %2006 = vmatprep.subr.mxu0 %v6497_v7  ;;  %2077 = vmatprep.subr.mxu1 %v6500_v6 }
 0x5db   :  { %2007 = vmatpush1.msra.mxu0 %v6580_v25  ;;  %2078 = vmatpush1.msra.mxu1 %v6583_v27 }
 0x5dc   :  { %2008 = vmatprep.subr.mxu0 %v6586_v1  ;;  %2079 = vmatprep.subr.mxu1 %v6589_v34 }
 0x5dd   :  { %2009 = vmatpush1.msra.mxu0 %v6592_v35  ;;  %2080 = vmatpush1.msra.mxu1 %v6595_v36 }
 0x5de   :  { %2010 = vmatprep.subr.mxu0 %v6598_v37  ;;  %2081 = vmatprep.subr.mxu1 %v6601_v38 }
 0x5df   :  { %2011 = vmatpush1.msra.mxu0 %v6604_v39  ;;  %2082 = vmatpush1.msra.mxu1 %v6607_v40 }
 0x5e0   :  { %2012 = vmatprep.subr.mxu0 %v6610_v41  ;;  %2083 = vmatprep.subr.mxu1 %v6613_v42 }
 0x5e1   :  { %2013 = vmatpush1.msra.mxu0 %v6616_v43  ;;  %2084 = vmatpush1.msra.mxu1 %v6619_v44 }
 0x5e2   :  { %2014 = vmatprep.subr.mxu0 %v6622_v45  ;;  %2085 = vmatprep.subr.mxu1 %v6625_v53 }
 0x5e3   :  { %2015 = vmatpush1.msra.mxu0 %v6628_v56  ;;  %2086 = vmatpush1.msra.mxu1 %v6631_v55 }
 0x5e4   :  { %2016 = vmatprep.subr.mxu0 %v6634_v62  ;;  %2087 = vmatprep.subr.mxu1 %v8286_v20 }
 0x5e5   :  { %2017 = vmatpush1.msra.mxu0 %v8287_v63  ;;  %2088 = vmatpush1.msra.mxu1 %v8288_v11 }
 0x5e6   :  { %2018 = vmatprep.subr.mxu0 %v8289_v19  ;;  %2089 = vmatprep.subr.mxu1 %v8290_v22 }
 0x5e7   :  { %2019 = vmatpush1.msra.mxu0 %v8291_v23  ;;  %2090 = vmatpush1.msra.mxu1 %v8292_v21 }
 0x5e8   :  { %2020 = vmatprep.subr.mxu0 %v8293_v17  ;;  %2091 = vmatprep.subr.mxu1 %v8294_v16  ;;  %v8305_v16 = vld [vmem:[#allocation50_spill] sm:$0xff] }
 0x5e9   :  { %2021 = vmatpush1.msra.mxu0 %v8295_v14  ;;  %2092 = vmatpush1.msra.mxu1 %v8296_v13  ;;  %v8306_v13 = vld [vmem:[#allocation30_spill] sm:$0xff] }
 0x5ea   :  { %2022 = vmatprep.subr.mxu0 %v8297_v15  ;;  %2093 = vmatprep.subr.mxu1 %v8298_v12  ;;  %v8307_v15 = vld [vmem:[#allocation31_spill] sm:$0xff] }
 0x5eb   :  { %2023 = vmatpush1.msra.mxu0 %v8299_v18  ;;  %2094 = vmatpush1.msra.mxu1 %v8300_v26 }
 0x5ec   :  { %2024 = vmatprep.subr.mxu0 %v8301_v10  ;;  %2095 = vmatprep.subr.mxu1 %v8302_v33 }
 0x5ed   :  { %2025 = vmatpush1.msra.mxu0 %v8303_v8  ;;  %2058 = vmatprep.mubr.f32.mxu0 %v8304_v9 }
 0x5ee   :  { %2096 = vmatpush1.msra.mxu1 %v8305_v16  ;;  %2129 = vmatprep.mubr.f32.mxu1 %v8304_v9  ;;  %v1788_v16 = vld [vmem:[#allocation2 + $0x5] ss:$8 sm:$0xf] }
 0x5ef   :  { %2199 = vmatprep.subr.mxu0 %v8306_v13  ;;  %2270 = vmatprep.subr.mxu1 %v8307_v15 }
 0x68e   :  { %v1855_v12 = vpop.f32.mrf.mxu0  ;;  %v1926_v18 = vpop.f32.mrf.mxu1 }
 0x690   :  { %v1857_v14 = vpop.f32.mrf.mxu0  ;;  %v1928_v26 = vpop.f32.mrf.mxu1 }
 0x691   :  { %v1935_v17 = vcombine.low %v1855_v12, %v1857_v14  ;;  %v1936_v10 = vcombine.low %v1926_v18, %v1928_v26 }
 0x693   :  { %v1943_v33 = vrot.slane %v1935_v17, %v6277_v47  ;;  %v1950_v8 = vrot.slane %v1936_v10, %v6277_v47 }
 0x695   :  { %v1951_v21 = vcombine.low %v1943_v33, %v1950_v8  ;;  %v8311_v33 = vld [vmem:[#allocation35_spill] sm:$0xff]  ;;  %v8312_v8 = vld [vmem:[#allocation36_spill] sm:$0xff] }
 0x697   :  { %v1958_v23 = vrot.slane %v1951_v21, %v6277_v47 }
 0x699   :  { %v1960_v22 = vadd.f32 %v1958_v23, %v1788_v16 }
 0x69b   :  { %v5062_v9 = vmul.f32 -1.442695, %v1960_v22  ;;  %v1968_v19 = vrot.slane %v1960_v22, 1  ;;  %v1979_v15 = vrot.slane %v1960_v22, 3  ;;  %v1976_v20 = vrot.slane %v1960_v22, 2 }
 0x69d   :  { %5257 = vpow2.f32 %v5062_v9  ;;  %v5063_v13 = vmul.f32 -1.442695, %v1968_v19  ;;  %v5064_v11 = vmul.f32 -1.442695, %v1979_v15  ;;  %v8310_v15 = vld [vmem:[#allocation34_spill] sm:$0xff]  ;;  %v8313_v9 = vld [vmem:[#allocation37_spill] sm:$0xff] }
 0x69f   :  { %5259 = vpow2.f32 %v5063_v13 }
 0x6a0   :  { %5261 = vpow2.f32 %v5064_v11 }
 0x6aa   :  { %v5258_v63 = vpop.eup %5257 }
 0x6ab   :  { %v1964_v14 = vadd.f32 1.0, %v5258_v63 }
 0x6ac   :  { %v5260_v12 = vpop.eup %5259 }
 0x6ad   :  { %5263 = vrcp.f32 %v1964_v14  ;;  %v1973_v17 = vadd.f32 1.0, %v5260_v12  ;;  %v5262_v18 = vpop.eup %5261  ;;  %v8314_v14 = vld [vmem:[#allocation38_spill] sm:$0xff]  ;;  %v8315_v12 = vld [vmem:[#allocation39_spill] sm:$0xff] }
 0x6ae   :  { %5265 = vtanh.f32 %v1976_v20  ;;  %v1984_v16 = vadd.f32 1.0, %v5262_v18  ;;  %v8309_v20 = vld [vmem:[#allocation33_spill] sm:$0xff] }
 0x6af   :  { %5267 = vrcp.f32 %v1973_v17  ;;  %v8316_v17 = vld [vmem:[#allocation40_spill] sm:$0xff]  ;;  %v8317_v18 = vld [vmem:[#allocation41_spill] sm:$0xff] }
 0x6b0   :  { %5269 = vrcp.f32 %v1984_v16  ;;  %v8321_v16 = vld [vmem:[#allocation45_spill] sm:$0xff] }
 0x6ba   :  { %v5264_v21 = vpop.eup %5263 }
 0x6bb   :  { %v5266_v26 = vpop.eup %5265 }
 0x6bc   :  { %v5268_v23 = vpop.eup %5267  ;;  %v1988_v19 = vmul.f32 %v5266_v26, %v5264_v21  ;;  %v8318_v21 = vld [vmem:[#allocation42_spill] sm:$0xff]  ;;  %v8319_v26 = vld [vmem:[#allocation43_spill] sm:$0xff] }
 0x6bd   :  { %v1987_v10 = vmul.f32 %v5268_v23, %v6702_v32  ;;  %v5270_v63 = vpop.eup %5269  ;;  %v8308_v32 = vld [vmem:[#allocation32_spill] sm:$0xff] }
 0x6be   :  { %v8320_v23 = vld [vmem:[#allocation44_spill] sm:$0xff] }
 0x6bf   :  { %v6775_v13 = vadd.f32 %v1988_v19, %v1987_v10  ;;  %v8322_v10 = vld [vmem:[#allocation46_spill] sm:$0xff]  ;;  %v8323_v19 = vld [vmem:[#allocation47_spill] sm:$0xff] }
 0x6c1   :  { %5271 = vtanh.f32 %v6775_v13 }
 0x6ce   :  { %v5272_v22 = vpop.eup %5271 }
 0x6cf   :  { %v1991_v11 = vmul.f32 %v5272_v22, %v5270_v63  ;;  %v8324_v63 = vld [vmem:[#allocation48_spill] sm:$0xff]  ;;  %v8325_v22 = vld [vmem:[#allocation49_spill] sm:$0xff] }
 0x6d1   :  { %2059 = vmatmul.mubr.f32.vlgmr.msra.gmra.mxu0 %v1991_v11  ;;  %2130 = vmatmul.mubr.f32.vlgmr.msra.gmra.mxu1 %v1991_v11  ;;  %v8326_v11 = vmov 0.0  }
 0x6d2   :  { %2200 = vmatpush1.msra.mxu0 %v6431_v3  ;;  %2271 = vmatpush1.msra.mxu1 %v6434_v61 }
 0x6d3   :  { %2201 = vmatprep.subr.mxu0 %v6437_v5  ;;  %2272 = vmatprep.subr.mxu1 %v6440_v52 }
 0x6d4   :  { %2202 = vmatpush1.msra.mxu0 %v6443_v46  ;;  %2273 = vmatpush1.msra.mxu1 %v6446_v51 }
 0x6d5   :  { %2203 = vmatprep.subr.mxu0 %v6449_v0  ;;  %2274 = vmatprep.subr.mxu1 %v6452_v57 }
 0x6d6   :  { %2204 = vmatpush1.msra.mxu0 %v6455_v49  ;;  %2275 = vmatpush1.msra.mxu1 %v6458_v48 }
 0x6d7   :  { %2205 = vmatprep.subr.mxu0 %v6461_v50  ;;  %2276 = vmatprep.subr.mxu1 %v6464_v2 }
 0x6d8   :  { %2206 = vmatpush1.msra.mxu0 %v6467_v28  ;;  %2277 = vmatpush1.msra.mxu1 %v6470_v29 }
 0x6d9   :  { %2207 = vmatprep.subr.mxu0 %v6473_v30  ;;  %2278 = vmatprep.subr.mxu1 %v6476_v31 }
 0x6da   :  { %2208 = vmatpush1.msra.mxu0 %v6479_v59  ;;  %2279 = vmatpush1.msra.mxu1 %v8266_v24 }
 0x6db   :  { %2209 = vmatprep.subr.mxu0 %v6485_v58  ;;  %2280 = vmatprep.subr.mxu1 %v6488_v54 }
 0x6dc   :  { %2210 = vmatpush1.msra.mxu0 %v6491_v60  ;;  %2281 = vmatpush1.msra.mxu1 %v6494_v4 }
 0x6dd   :  { %2211 = vmatprep.subr.mxu0 %v6497_v7  ;;  %2282 = vmatprep.subr.mxu1 %v6500_v6 }
 0x6de   :  { %2212 = vmatpush1.msra.mxu0 %v6580_v25  ;;  %2283 = vmatpush1.msra.mxu1 %v6583_v27 }
 0x6df   :  { %2213 = vmatprep.subr.mxu0 %v6586_v1  ;;  %2284 = vmatprep.subr.mxu1 %v6589_v34 }
 0x6e0   :  { %2214 = vmatpush1.msra.mxu0 %v6592_v35  ;;  %2285 = vmatpush1.msra.mxu1 %v6595_v36 }
 0x6e1   :  { %2215 = vmatprep.subr.mxu0 %v6598_v37  ;;  %2286 = vmatprep.subr.mxu1 %v6601_v38 }
 0x6e2   :  { %2216 = vmatpush1.msra.mxu0 %v6604_v39  ;;  %2287 = vmatpush1.msra.mxu1 %v6607_v40 }
 0x6e3   :  { %2217 = vmatprep.subr.mxu0 %v6610_v41  ;;  %2288 = vmatprep.subr.mxu1 %v6613_v42 }
 0x6e4   :  { %2218 = vmatpush1.msra.mxu0 %v6616_v43  ;;  %2289 = vmatpush1.msra.mxu1 %v6619_v44 }
 0x6e5   :  { %2219 = vmatprep.subr.mxu0 %v6622_v45  ;;  %2290 = vmatprep.subr.mxu1 %v6625_v53 }
 0x6e6   :  { %2220 = vmatpush1.msra.mxu0 %v6628_v56  ;;  %2291 = vmatpush1.msra.mxu1 %v6631_v55 }
 0x6e7   :  { %2221 = vmatprep.subr.mxu0 %v6634_v62  ;;  %2292 = vmatprep.subr.mxu1 %v8308_v32 }
 0x6e8   :  { %2222 = vmatpush1.msra.mxu0 %v8309_v20  ;;  %2293 = vmatpush1.msra.mxu1 %v8310_v15 }
 0x6e9   :  { %2223 = vmatprep.subr.mxu0 %v8311_v33  ;;  %2294 = vmatprep.subr.mxu1 %v8312_v8 }
 0x6ea   :  { %2224 = vmatpush1.msra.mxu0 %v8313_v9  ;;  %2295 = vmatpush1.msra.mxu1 %v8314_v14 }
 0x6eb   :  { %2225 = vmatprep.subr.mxu0 %v8315_v12  ;;  %2296 = vmatprep.subr.mxu1 %v8316_v17  ;;  %v8327_v17 = vld [vmem:[#allocation50_spill] sm:$0xff] }
 0x6ec   :  { %2226 = vmatpush1.msra.mxu0 %v8317_v18  ;;  %2297 = vmatpush1.msra.mxu1 %v8318_v21  ;;  %v8328_v21 = vld [vmem:[#allocation30_spill] sm:$0xff] }
 0x6ed   :  { %2227 = vmatprep.subr.mxu0 %v8319_v26  ;;  %2298 = vmatprep.subr.mxu1 %v8320_v23  ;;  %v8329_v26 = vld [vmem:[#allocation31_spill] sm:$0xff] }
 0x6ee   :  { %2228 = vmatpush1.msra.mxu0 %v8321_v16  ;;  %2299 = vmatpush1.msra.mxu1 %v8322_v10 }
 0x6ef   :  { %2229 = vmatprep.subr.mxu0 %v8323_v19  ;;  %2300 = vmatprep.subr.mxu1 %v8324_v63 }
 0x6f0   :  { %2230 = vmatpush1.msra.mxu0 %v8325_v22  ;;  %2263 = vmatprep.mubr.f32.mxu0 %v8326_v11 }
 0x6f1   :  { %2301 = vmatpush1.msra.mxu1 %v8327_v17  ;;  %2334 = vmatprep.mubr.f32.mxu1 %v8326_v11  ;;  %v1993_v17 = vld [vmem:[#allocation2 + $0x6] ss:$8 sm:$0xf] }
 0x6f2   :  { %2404 = vmatprep.subr.mxu0 %v8328_v21  ;;  %2475 = vmatprep.subr.mxu1 %v8329_v26 }
 0x791   :  { %v2060_v23 = vpop.f32.mrf.mxu0  ;;  %v2131_v16 = vpop.f32.mrf.mxu1 }
 0x793   :  { %v2062_v18 = vpop.f32.mrf.mxu0  ;;  %v2133_v10 = vpop.f32.mrf.mxu1 }
 0x794   :  { %v2140_v12 = vcombine.low %v2060_v23, %v2062_v18  ;;  %v2141_v19 = vcombine.low %v2131_v16, %v2133_v10 }
 0x796   :  { %v2148_v63 = vrot.slane %v2140_v12, %v6277_v47  ;;  %v2155_v22 = vrot.slane %v2141_v19, %v6277_v47 }
 0x798   :  { %v2156_v14 = vcombine.low %v2148_v63, %v2155_v22 }
 0x79a   :  { %v2163_v9 = vrot.slane %v2156_v14, %v6277_v47 }
 0x79c   :  { %v2165_v8 = vadd.f32 %v2163_v9, %v1993_v17 }
 0x79e   :  { %v5065_v11 = vmul.f32 -1.442695, %v2165_v8  ;;  %v2173_v33 = vrot.slane %v2165_v8, 1  ;;  %v2184_v26 = vrot.slane %v2165_v8, 3  ;;  %v2181_v32 = vrot.slane %v2165_v8, 2 }
 0x7a0   :  { %5273 = vpow2.f32 %v5065_v11  ;;  %v5066_v21 = vmul.f32 -1.442695, %v2173_v33  ;;  %v5067_v15 = vmul.f32 -1.442695, %v2184_v26 }
 0x7a2   :  { %5275 = vpow2.f32 %v5066_v21 }
 0x7a3   :  { %5277 = vpow2.f32 %v5067_v15 }
 0x7ad   :  { %v5274_v20 = vpop.eup %5273 }
 0x7ae   :  { %v2169_v18 = vadd.f32 1.0, %v5274_v20 }
 0x7af   :  { %v5276_v23 = vpop.eup %5275 }
 0x7b0   :  { %5279 = vrcp.f32 %v2169_v18  ;;  %v2178_v12 = vadd.f32 1.0, %v5276_v23  ;;  %v5278_v16 = vpop.eup %5277 }
 0x7b1   :  { %5281 = vtanh.f32 %v2181_v32  ;;  %v2189_v17 = vadd.f32 1.0, %v5278_v16 }
 0x7b2   :  { %5283 = vrcp.f32 %v2178_v12  ;;  %v2198_v12 = vld [vmem:[#allocation2 + $0x7] ss:$8 sm:$0xf] }
 0x7b3   :  { %5285 = vrcp.f32 %v2189_v17 }
 0x7bd   :  { %v5280_v14 = vpop.eup %5279 }
 0x7be   :  { %v5282_v10 = vpop.eup %5281 }
 0x7bf   :  { %v5284_v9 = vpop.eup %5283  ;;  %v2193_v33 = vmul.f32 %v5282_v10, %v5280_v14 }
 0x7c0   :  { %v2192_v19 = vmul.f32 %v5284_v9, %v6775_v13  ;;  %v5286_v20 = vpop.eup %5285 }
 0x7c2   :  { %v6848_v21 = vadd.f32 %v2193_v33, %v2192_v19 }
 0x7c4   :  { %5287 = vtanh.f32 %v6848_v21 }
 0x7d1   :  { %v5288_v8 = vpop.eup %5287 }
 0x7d2   :  { %v2196_v15 = vmul.f32 %v5288_v8, %v5286_v20 }
 0x7d4   :  { %2264 = vmatmul.mubr.f32.vlgmr.msra.gmra.mxu0 %v2196_v15  ;;  %2335 = vmatmul.mubr.f32.vlgmr.msra.gmra.mxu1 %v2196_v15 }
 0x7d5   :  { %2405 = vmatpush1.msra.mxu0 %v6431_v3  ;;  %2476 = vmatpush1.msra.mxu1 %v6434_v61  ;;  %v8330_v3 = vld [vmem:[#allocation32_spill] sm:$0xff]  ;;  %v8331_v61 = vld [vmem:[#allocation33_spill] sm:$0xff] }
 0x7d6   :  { %2406 = vmatprep.subr.mxu0 %v6437_v5  ;;  %2477 = vmatprep.subr.mxu1 %v6440_v52  ;;  %v8332_v5 = vld [vmem:[#allocation34_spill] sm:$0xff]  ;;  %v8333_v52 = vld [vmem:[#allocation35_spill] sm:$0xff] }
 0x7d7   :  { %2407 = vmatpush1.msra.mxu0 %v6443_v46  ;;  %2478 = vmatpush1.msra.mxu1 %v6446_v51  ;;  %v8334_v46 = vld [vmem:[#allocation36_spill] sm:$0xff]  ;;  %v8335_v51 = vld [vmem:[#allocation37_spill] sm:$0xff] }
 0x7d8   :  { %2408 = vmatprep.subr.mxu0 %v6449_v0  ;;  %2479 = vmatprep.subr.mxu1 %v6452_v57  ;;  %v8336_v0 = vld [vmem:[#allocation38_spill] sm:$0xff]  ;;  %v8337_v57 = vld [vmem:[#allocation39_spill] sm:$0xff] }
 0x7d9   :  { %2409 = vmatpush1.msra.mxu0 %v6455_v49  ;;  %2480 = vmatpush1.msra.mxu1 %v6458_v48  ;;  %v8338_v49 = vld [vmem:[#allocation40_spill] sm:$0xff]  ;;  %v8339_v48 = vld [vmem:[#allocation41_spill] sm:$0xff] }
 0x7da   :  { %2410 = vmatprep.subr.mxu0 %v6461_v50  ;;  %2481 = vmatprep.subr.mxu1 %v6464_v2  ;;  %v8340_v50 = vld [vmem:[#allocation42_spill] sm:$0xff]  ;;  %v8341_v2 = vld [vmem:[#allocation43_spill] sm:$0xff] }
 0x7db   :  { %2411 = vmatpush1.msra.mxu0 %v6467_v28  ;;  %2482 = vmatpush1.msra.mxu1 %v6470_v29  ;;  %v8342_v28 = vld [vmem:[#allocation44_spill] sm:$0xff]  ;;  %v8343_v29 = vld [vmem:[#allocation45_spill] sm:$0xff] }
 0x7dc   :  { %2412 = vmatprep.subr.mxu0 %v6473_v30  ;;  %2483 = vmatprep.subr.mxu1 %v6476_v31  ;;  %v8344_v30 = vld [vmem:[#allocation46_spill] sm:$0xff]  ;;  %v8345_v31 = vld [vmem:[#allocation47_spill] sm:$0xff] }
 0x7dd   :  { %2413 = vmatpush1.msra.mxu0 %v6479_v59  ;;  %2484 = vmatpush1.msra.mxu1 %v8266_v24  ;;  %v8346_v59 = vld [vmem:[#allocation48_spill] sm:$0xff] }
 0x7de   :  { %2414 = vmatprep.subr.mxu0 %v6485_v58  ;;  %2485 = vmatprep.subr.mxu1 %v6488_v54  ;;  %v8348_v58 = vmov 0.0   ;;  %v8349_v54 = vld [vmem:[#allocation50_spill] sm:$0xff] }
 0x7df   :  { %2415 = vmatpush1.msra.mxu0 %v6491_v60  ;;  %2486 = vmatpush1.msra.mxu1 %v6494_v4  ;;  %v8350_v60 = vld [vmem:[#allocation30_spill] sm:$0xff]  ;;  %v8351_v4 = vld [vmem:[#allocation31_spill] sm:$0xff] }
 0x7e0   :  { %2416 = vmatprep.subr.mxu0 %v6497_v7  ;;  %2487 = vmatprep.subr.mxu1 %v6500_v6  ;;  %v8347_v6 = vld [vmem:[#allocation49_spill] sm:$0xff] }
 0x7e1   :  { %2417 = vmatpush1.msra.mxu0 %v6580_v25  ;;  %2488 = vmatpush1.msra.mxu1 %v6583_v27 }
 0x7e2   :  { %2418 = vmatprep.subr.mxu0 %v6586_v1  ;;  %2489 = vmatprep.subr.mxu1 %v6589_v34 }
 0x7e3   :  { %2419 = vmatpush1.msra.mxu0 %v6592_v35  ;;  %2490 = vmatpush1.msra.mxu1 %v6595_v36 }
 0x7e4   :  { %2420 = vmatprep.subr.mxu0 %v6598_v37  ;;  %2491 = vmatprep.subr.mxu1 %v6601_v38 }
 0x7e5   :  { %2421 = vmatpush1.msra.mxu0 %v6604_v39  ;;  %2492 = vmatpush1.msra.mxu1 %v6607_v40 }
 0x7e6   :  { %2422 = vmatprep.subr.mxu0 %v6610_v41  ;;  %2493 = vmatprep.subr.mxu1 %v6613_v42 }
 0x7e7   :  { %2423 = vmatpush1.msra.mxu0 %v6616_v43  ;;  %2494 = vmatpush1.msra.mxu1 %v6619_v44 }
 0x7e8   :  { %2424 = vmatprep.subr.mxu0 %v6622_v45  ;;  %2495 = vmatprep.subr.mxu1 %v6625_v53 }
 0x7e9   :  { %2425 = vmatpush1.msra.mxu0 %v6628_v56  ;;  %2496 = vmatpush1.msra.mxu1 %v6631_v55 }
 0x7ea   :  { %2426 = vmatprep.subr.mxu0 %v6634_v62  ;;  %2497 = vmatprep.subr.mxu1 %v8330_v3 }
 0x7eb   :  { %2427 = vmatpush1.msra.mxu0 %v8331_v61  ;;  %2498 = vmatpush1.msra.mxu1 %v8332_v5 }
 0x7ec   :  { %2428 = vmatprep.subr.mxu0 %v8333_v52  ;;  %2499 = vmatprep.subr.mxu1 %v8334_v46 }
 0x7ed   :  { %2429 = vmatpush1.msra.mxu0 %v8335_v51  ;;  %2500 = vmatpush1.msra.mxu1 %v8336_v0 }
 0x7ee   :  { %2430 = vmatprep.subr.mxu0 %v8337_v57  ;;  %2501 = vmatprep.subr.mxu1 %v8338_v49 }
 0x7ef   :  { %2431 = vmatpush1.msra.mxu0 %v8339_v48  ;;  %2502 = vmatpush1.msra.mxu1 %v8340_v50 }
 0x7f0   :  { %2432 = vmatprep.subr.mxu0 %v8341_v2  ;;  %2503 = vmatprep.subr.mxu1 %v8342_v28 }
 0x7f1   :  { %2433 = vmatpush1.msra.mxu0 %v8343_v29  ;;  %2504 = vmatpush1.msra.mxu1 %v8344_v30 }
 0x7f2   :  { %2434 = vmatprep.subr.mxu0 %v8345_v31  ;;  %2505 = vmatprep.subr.mxu1 %v8346_v59 }
 0x7f3   :  { %2435 = vmatpush1.msra.mxu0 %v8347_v6  ;;  %2468 = vmatprep.mubr.f32.mxu0 %v8348_v58 }
 0x7f4   :  { %2506 = vmatpush1.msra.mxu1 %v8349_v54  ;;  %2539 = vmatprep.mubr.f32.mxu1 %v8348_v58 }
 0x7f5   :  { %2609 = vmatprep.subr.mxu0 %v8350_v60  ;;  %2680 = vmatprep.subr.mxu1 %v8351_v4 }
 0x894   :  { %v2265_v7 = vpop.f32.mrf.mxu0  ;;  %v2336_v24 = vpop.f32.mrf.mxu1 }
 0x896   :  { %v2267_v13 = vpop.f32.mrf.mxu0  ;;  %v2338_v32 = vpop.f32.mrf.mxu1 }
 0x897   :  { %v2345_v26 = vcombine.low %v2265_v7, %v2267_v13  ;;  %v2346_v63 = vcombine.low %v2336_v24, %v2338_v32 }
 0x899   :  { %v2353_v22 = vrot.slane %v2345_v26, %v6277_v47  ;;  %v2360_v11 = vrot.slane %v2346_v63, %v6277_v47 }
 0x89b   :  { %v2361_v18 = vcombine.low %v2353_v22, %v2360_v11 }
 0x89d   :  { %v2368_v23 = vrot.slane %v2361_v18, %v6277_v47 }
 0x89f   :  { %v2370_v16 = vadd.f32 %v2368_v23, %v2198_v12  ;;  %v5569_v12 = vld [vmem:[#allocation10 + $0x1e0] sm:$0xff] }
 0x8a1   :  { %v5068_v14 = vmul.f32 -1.442695, %v2370_v16  ;;  %v2378_v10 = vrot.slane %v2370_v16, 1  ;;  %v2389_v17 = vrot.slane %v2370_v16, 3  ;;  %v2386_v20 = vrot.slane %v2370_v16, 2  ;;  %v5570_v16 = vld [vmem:[#allocation10 + $0x1f0] sm:$0xff] }
 0x8a3   :  { %5289 = vpow2.f32 %v5068_v14  ;;  %v5069_v9 = vmul.f32 -1.442695, %v2378_v10  ;;  %v5070_v19 = vmul.f32 -1.442695, %v2389_v17  ;;  %v5571_v14 = vld [vmem:[#allocation10 + $0x1c8] sm:$0xff]  ;;  %v5572_v10 = vld [vmem:[#allocation10 + $0x1d8] sm:$0xff] }
 0x8a4   :  { %v5575_v17 = vld [vmem:[#allocation10 + $0x1a8] sm:$0xff] }
 0x8a5   :  { %5291 = vpow2.f32 %v5069_v9  ;;  %v5574_v9 = vld [vmem:[#allocation10 + $0x1d0] sm:$0xff] }
 0x8a6   :  { %5293 = vpow2.f32 %v5070_v19  ;;  %v5576_v19 = vld [vmem:[#allocation10 + $0x1b8] sm:$0xff] }
 0x8b0   :  { %v5290_v33 = vpop.eup %5289 }
 0x8b1   :  { %v2374_v8 = vadd.f32 1.0, %v5290_v33  ;;  %v5577_v33 = vld [vmem:[#allocation10 + $0x1a0] sm:$0xff] }
 0x8b2   :  { %v5292_v15 = vpop.eup %5291 }
 0x8b3   :  { %5295 = vrcp.f32 %v2374_v8  ;;  %v2383_v60 = vadd.f32 1.0, %v5292_v15  ;;  %v5294_v4 = vpop.eup %5293  ;;  %v5579_v8 = vld [vmem:[#allocation10 + $0x188] sm:$0xff]  ;;  %v5580_v15 = vld [vmem:[#allocation10 + $0x198] sm:$0xff] }
 0x8b4   :  { %5297 = vtanh.f32 %v2386_v20  ;;  %v2394_v32 = vadd.f32 1.0, %v5294_v4  ;;  %v5578_v20 = vld [vmem:[#allocation10 + $0x1b0] sm:$0xff] }
 0x8b5   :  { %5299 = vrcp.f32 %v2383_v60  ;;  %v5581_v60 = vld [vmem:[#allocation10 + $0x180] sm:$0xff]  ;;  %v5582_v4 = vld [vmem:[#allocation10 + $0x190] sm:$0xff] }
 0x8b6   :  { %5301 = vrcp.f32 %v2394_v32  ;;  %v5586_v32 = vld [vmem:[#allocation10 + $0x170] sm:$0xff] }
 0x8c0   :  { %v5296_v7 = vpop.eup %5295 }
 0x8c1   :  { %v5298_v24 = vpop.eup %5297 }
 0x8c2   :  { %v5300_v13 = vpop.eup %5299  ;;  %v2398_v63 = vmul.f32 %v5298_v24, %v5296_v7  ;;  %v5583_v7 = vld [vmem:[#allocation10 + $0x168] sm:$0xff]  ;;  %v5584_v24 = vld [vmem:[#allocation10 + $0x178] sm:$0xff] }
 0x8c3   :  { %v2397_v26 = vmul.f32 %v5300_v13, %v6848_v21  ;;  %v5302_v11 = vpop.eup %5301  ;;  %v5573_v21 = vld [vmem:[#allocation10 + $0x1c0] sm:$0xff] }
 0x8c4   :  { %v5585_v13 = vld [vmem:[#allocation10 + $0x160] sm:$0xff] }
 0x8c5   :  { %v6921_v22 = vadd.f32 %v2398_v63, %v2397_v26  ;;  %v5587_v26 = vld [vmem:[#allocation10 + $0x148] sm:$0xff]  ;;  %v5588_v63 = vld [vmem:[#allocation10 + $0x158] sm:$0xff] }
 0x8c7   :  { %5303 = vtanh.f32 %v6921_v22 }
 0x8d4   :  { %v5304_v18 = vpop.eup %5303 }
 0x8d5   :  { %v2401_v23 = vmul.f32 %v5304_v18, %v5302_v11  ;;  %v5589_v11 = vld [vmem:[#allocation10 + $0x140] sm:$0xff]  ;;  %v5590_v18 = vld [vmem:[#allocation10 + $0x150] sm:$0xff] }
 0x8d7   :  { %2469 = vmatmul.mubr.f32.vlgmr.msra.gmra.mxu0 %v2401_v23  ;;  %2540 = vmatmul.mubr.f32.vlgmr.msra.gmra.mxu1 %v2401_v23  ;;  %v5591_v23 = vld [vmem:[#allocation10 + $0x128] sm:$0xff] }
 0x8d8   :  { %2610 = vmatpush1.msra.mxu0 %v5569_v12  ;;  %2681 = vmatpush1.msra.mxu1 %v5570_v16  ;;  %v5592_v12 = vld [vmem:[#allocation10 + $0x138] sm:$0xff]  ;;  %v6989_v16 = vld [vmem:[#allocation14 + $0x1c0] sm:$0xff] }
 0x8d9   :  { %2611 = vmatprep.subr.mxu0 %v5571_v14  ;;  %2682 = vmatprep.subr.mxu1 %v5572_v10  ;;  %v6991_v14 = vld [vmem:[#allocation14 + $0x1d0] sm:$0xff]  ;;  %v6993_v10 = vld [vmem:[#allocation14 + $0x1a8] sm:$0xff] }
 0x8da   :  { %2612 = vmatpush1.msra.mxu0 %v5573_v21  ;;  %2683 = vmatpush1.msra.mxu1 %v5574_v9  ;;  %v6997_v21 = vld [vmem:[#allocation14 + $0x1b8] sm:$0xff]  ;;  %v6999_v9 = vld [vmem:[#allocation14 + $0x1a0] sm:$0xff] }
 0x8db   :  { %2613 = vmatprep.subr.mxu0 %v5575_v17  ;;  %2684 = vmatprep.subr.mxu1 %v5576_v19  ;;  %v7001_v17 = vld [vmem:[#allocation14 + $0x1b0] sm:$0xff]  ;;  %v7005_v19 = vld [vmem:[#allocation14 + $0x188] sm:$0xff] }
 0x8dc   :  { %2614 = vmatpush1.msra.mxu0 %v5577_v33  ;;  %2685 = vmatpush1.msra.mxu1 %v5578_v20  ;;  %v7007_v33 = vld [vmem:[#allocation14 + $0x198] sm:$0xff]  ;;  %v7011_v20 = vld [vmem:[#allocation14 + $0x180] sm:$0xff] }
 0x8dd   :  { %2615 = vmatprep.subr.mxu0 %v5579_v8  ;;  %2686 = vmatprep.subr.mxu1 %v5580_v15  ;;  %v7013_v8 = vld [vmem:[#allocation14 + $0x190] sm:$0xff]  ;;  %v7017_v15 = vld [vmem:[#allocation14 + $0x168] sm:$0xff] }
 0x8de   :  { %2616 = vmatpush1.msra.mxu0 %v5581_v60  ;;  %2687 = vmatpush1.msra.mxu1 %v5582_v4  ;;  %v7019_v60 = vld [vmem:[#allocation14 + $0x178] sm:$0xff]  ;;  %v7023_v4 = vld [vmem:[#allocation14 + $0x160] sm:$0xff] }
 0x8df   :  { %2617 = vmatprep.subr.mxu0 %v5583_v7  ;;  %2688 = vmatprep.subr.mxu1 %v5584_v24  ;;  %v7025_v7 = vld [vmem:[#allocation14 + $0x170] sm:$0xff]  ;;  %v7029_v24 = vld [vmem:[#allocation14 + $0x148] sm:$0xff] }
 0x8e0   :  { %2618 = vmatpush1.msra.mxu0 %v5585_v13  ;;  %2689 = vmatpush1.msra.mxu1 %v5586_v32  ;;  %v7031_v13 = vld [vmem:[#allocation14 + $0x158] sm:$0xff]  ;;  %v7035_v32 = vld [vmem:[#allocation14 + $0x140] sm:$0xff] }
 0x8e1   :  { %2619 = vmatprep.subr.mxu0 %v5587_v26  ;;  %2690 = vmatprep.subr.mxu1 %v5588_v63  ;;  %v7037_v26 = vld [vmem:[#allocation14 + $0x150] sm:$0xff]  ;;  %v7041_v63 = vld [vmem:[#allocation14 + $0x128] sm:$0xff] }
 0x8e2   :  { %2620 = vmatpush1.msra.mxu0 %v5589_v11  ;;  %2691 = vmatpush1.msra.mxu1 %v5590_v18  ;;  %v7043_v11 = vld [vmem:[#allocation14 + $0x138] sm:$0xff]  ;;  %v7047_v18 = vld [vmem:[#allocation14 + $0x120] sm:$0xff] }
 0x8e3   :  { %2621 = vmatprep.subr.mxu0 %v5591_v23  ;;  %2692 = vmatprep.subr.mxu1 %v5592_v12  ;;  %v7049_v23 = vld [vmem:[#allocation14 + $0x130] sm:$0xff]  ;;  %v7053_v12 = vld [vmem:[#allocation14 + $0x108] sm:$0xff] }
 0x8e4   :  { %2622 = vmatpush1.msra.mxu0 %v6580_v25  ;;  %2693 = vmatpush1.msra.mxu1 %v6583_v27 }
 0x8e5   :  { %2623 = vmatprep.subr.mxu0 %v6586_v1  ;;  %2694 = vmatprep.subr.mxu1 %v6589_v34 }
 0x8e6   :  { %2624 = vmatpush1.msra.mxu0 %v6592_v35  ;;  %2695 = vmatpush1.msra.mxu1 %v6595_v36 }
 0x8e7   :  { %2625 = vmatprep.subr.mxu0 %v6598_v37  ;;  %2696 = vmatprep.subr.mxu1 %v6601_v38 }
 0x8e8   :  { %2626 = vmatpush1.msra.mxu0 %v6604_v39  ;;  %2697 = vmatpush1.msra.mxu1 %v6607_v40 }
 0x8e9   :  { %2627 = vmatprep.subr.mxu0 %v6610_v41  ;;  %2698 = vmatprep.subr.mxu1 %v6613_v42  ;;  %v2403_v41 = vld [vmem:[#allocation2 + $0x20] ss:$8 sm:$0xf] }
 0x8ea   :  { %2628 = vmatpush1.msra.mxu0 %v6616_v43  ;;  %2699 = vmatpush1.msra.mxu1 %v6619_v44 }
 0x8eb   :  { %2629 = vmatprep.subr.mxu0 %v6622_v45  ;;  %2700 = vmatprep.subr.mxu1 %v6625_v53 }
 0x8ec   :  { %2630 = vmatpush1.msra.mxu0 %v6628_v56  ;;  %2701 = vmatpush1.msra.mxu1 %v6631_v55 }
 0x8ed   :  { %2631 = vmatprep.subr.mxu0 %v6634_v62  ;;  %2702 = vmatprep.subr.mxu1 %v8330_v3 }
 0x8ee   :  { %2632 = vmatpush1.msra.mxu0 %v8331_v61  ;;  %2703 = vmatpush1.msra.mxu1 %v8332_v5 }
 0x8ef   :  { %2633 = vmatprep.subr.mxu0 %v8333_v52  ;;  %2704 = vmatprep.subr.mxu1 %v8334_v46 }
 0x8f0   :  { %2634 = vmatpush1.msra.mxu0 %v8335_v51  ;;  %2705 = vmatpush1.msra.mxu1 %v8336_v0 }
 0x8f1   :  { %2635 = vmatprep.subr.mxu0 %v8337_v57  ;;  %2706 = vmatprep.subr.mxu1 %v8338_v49 }
 0x8f2   :  { %2636 = vmatpush1.msra.mxu0 %v8339_v48  ;;  %2707 = vmatpush1.msra.mxu1 %v8340_v50 }
 0x8f3   :  { %2637 = vmatprep.subr.mxu0 %v8341_v2  ;;  %2708 = vmatprep.subr.mxu1 %v8342_v28 }
 0x8f4   :  { %2638 = vmatpush1.msra.mxu0 %v8343_v29  ;;  %2709 = vmatpush1.msra.mxu1 %v8344_v30  ;;  %v6973_v30 = vld [vmem:[#allocation14 + $0x1e8] sm:$0xff] }
 0x8f5   :  { %2639 = vmatprep.subr.mxu0 %v8345_v31  ;;  %2710 = vmatprep.subr.mxu1 %v8346_v59  ;;  %8352 = vst [vmem:[#allocation51_spill] sm:$0xff] %v6973_v30  ;;  %v6975_v31 = vld [vmem:[#allocation14 + $0x1f8] sm:$0xff]  ;;  %v6977_v59 = vld [vmem:[#allocation14 + $0x1e0] sm:$0xff] }
 0x8f6   :  { %2640 = vmatpush1.msra.mxu0 %v8347_v6  ;;  %2673 = vmatprep.mubr.f32.mxu0 %v8348_v58  ;;  %8353 = vst [vmem:[#allocation52_spill] sm:$0xff] %v6975_v31  ;;  %v6981_v6 = vld [vmem:[#allocation14 + $0x1f0] sm:$0xff] }
 0x8f7   :  { %2711 = vmatpush1.msra.mxu1 %v8349_v54  ;;  %2744 = vmatprep.mubr.f32.mxu1 %v8348_v58  ;;  %v6983_v54 = vld [vmem:[#allocation14 + $0x1c8] sm:$0xff] }
 0x8f8   :  { %2813 = vmatprep.subr.mxu0 %v6973_v30  ;;  %2884 = vmatprep.subr.mxu1 %v6975_v31 }
 0x997   :  { %v2470_v25 = vpop.f32.mrf.mxu0  ;;  %v2541_v27 = vpop.f32.mrf.mxu1 }
 0x999   :  { %v2472_v1 = vpop.f32.mrf.mxu0  ;;  %v2543_v34 = vpop.f32.mrf.mxu1 }
 0x99a   :  { %v2550_v35 = vcombine.low %v2470_v25, %v2472_v1  ;;  %v2551_v36 = vcombine.low %v2541_v27, %v2543_v34  ;;  %v7055_v25 = vld [vmem:[#allocation14 + $0x118] sm:$0xff]  ;;  %v7059_v27 = vld [vmem:[#allocation14 + $0x100] sm:$0xff]  ;;  %v7061_v1 = vld [vmem:[#allocation14 + $0x110] sm:$0xff] }
 0x99b   :  { %v7065_v34 = vld [vmem:[#allocation14 + $0xe8] sm:$0xff] }
 0x99c   :  { %v2558_v37 = vrot.slane %v2550_v35, %v6277_v47  ;;  %v2565_v38 = vrot.slane %v2551_v36, %v6277_v47  ;;  %v7067_v35 = vld [vmem:[#allocation14 + $0xf8] sm:$0xff]  ;;  %v7071_v36 = vld [vmem:[#allocation14 + $0xe0] sm:$0xff] }
 0x99e   :  { %v2566_v39 = vcombine.low %v2558_v37, %v2565_v38  ;;  %v7073_v37 = vld [vmem:[#allocation14 + $0xf0] sm:$0xff]  ;;  %v7077_v38 = vld [vmem:[#allocation14 + $0xc8] sm:$0xff] }
 0x9a0   :  { %v2573_v40 = vrot.slane %v2566_v39, %v6277_v47  ;;  %v7079_v39 = vld [vmem:[#allocation14 + $0xd8] sm:$0xff] }
 0x9a2   :  { %v2575_v42 = vadd.f32 %v2573_v40, %v2403_v41  ;;  %v7083_v40 = vld [vmem:[#allocation14 + $0xc0] sm:$0xff]  ;;  %v7085_v41 = vld [vmem:[#allocation14 + $0xd0] sm:$0xff] }
 0x9a4   :  { %v5071_v43 = vmul.f32 -1.442695, %v2575_v42  ;;  %v2583_v44 = vrot.slane %v2575_v42, 1  ;;  %v2594_v53 = vrot.slane %v2575_v42, 3  ;;  %v2591_v62 = vrot.slane %v2575_v42, 2  ;;  %v7089_v42 = vld [vmem:[#allocation14 + $0xa8] sm:$0xff] }
 0x9a6   :  { %5305 = vpow2.f32 %v5071_v43  ;;  %v5072_v45 = vmul.f32 -1.442695, %v2583_v44  ;;  %v5073_v56 = vmul.f32 -1.442695, %v2594_v53  ;;  %v7091_v43 = vld [vmem:[#allocation14 + $0xb8] sm:$0xff]  ;;  %v7095_v44 = vld [vmem:[#allocation14 + $0xa0] sm:$0xff] }
 0x9a7   :  { %v7101_v53 = vld [vmem:[#allocation14 + $0x88] sm:$0xff] }
 0x9a8   :  { %5307 = vpow2.f32 %v5072_v45  ;;  %v7097_v45 = vld [vmem:[#allocation14 + $0xb0] sm:$0xff] }
 0x9a9   :  { %5309 = vpow2.f32 %v5073_v56  ;;  %v7103_v56 = vld [vmem:[#allocation14 + $0x98] sm:$0xff] }
 0x9aa   :  { %8354 = vst [vmem:[#allocation27_spill] sm:$0xff] %v7103_v56 }
 0x9b3   :  { %v5306_v55 = vpop.eup %5305 }
 0x9b4   :  { %v2579_v3 = vadd.f32 1.0, %v5306_v55  ;;  %v7107_v55 = vld [vmem:[#allocation14 + $0x80] sm:$0xff] }
 0x9b5   :  { %v5308_v61 = vpop.eup %5307  ;;  %8355 = vst [vmem:[#allocation28_spill] sm:$0xff] %v7107_v55 }
 0x9b6   :  { %5311 = vrcp.f32 %v2579_v3  ;;  %v2588_v5 = vadd.f32 1.0, %v5308_v61  ;;  %v5310_v52 = vpop.eup %5309  ;;  %v7113_v3 = vld [vmem:[#allocation14 + $0x68] sm:$0xff]  ;;  %v7115_v61 = vld [vmem:[#allocation14 + $0x78] sm:$0xff] }
 0x9b7   :  { %5313 = vtanh.f32 %v2591_v62  ;;  %v2599_v57 = vadd.f32 1.0, %v5310_v52  ;;  %v7109_v62 = vld [vmem:[#allocation14 + $0x90] sm:$0xff]  ;;  %8357 = vst [vmem:[#allocation32_spill] sm:$0xff] %v7113_v3  ;;  %8358 = vst [vmem:[#allocation33_spill] sm:$0xff] %v7115_v61 }
 0x9b8   :  { %5315 = vrcp.f32 %v2588_v5  ;;  %8356 = vst [vmem:[#allocation29_spill] sm:$0xff] %v7109_v62  ;;  %v7119_v5 = vld [vmem:[#allocation14 + $0x60] sm:$0xff]  ;;  %v7121_v52 = vld [vmem:[#allocation14 + $0x70] sm:$0xff] }
 0x9b9   :  { %5317 = vrcp.f32 %v2599_v57  ;;  %8359 = vst [vmem:[#allocation34_spill] sm:$0xff] %v7119_v5  ;;  %8360 = vst [vmem:[#allocation35_spill] sm:$0xff] %v7121_v52  ;;  %v7133_v57 = vld [vmem:[#allocation14 + $0x50] sm:$0xff] }
 0x9ba   :  { %8364 = vst [vmem:[#allocation39_spill] sm:$0xff] %v7133_v57 }
 0x9c3   :  { %v5312_v46 = vpop.eup %5311 }
 0x9c4   :  { %v5314_v51 = vpop.eup %5313 }
 0x9c5   :  { %v5316_v0 = vpop.eup %5315  ;;  %v2603_v48 = vmul.f32 %v5314_v51, %v5312_v46  ;;  %v7125_v46 = vld [vmem:[#allocation14 + $0x48] sm:$0xff]  ;;  %v7127_v51 = vld [vmem:[#allocation14 + $0x58] sm:$0xff] }
 0x9c6   :  { %v2602_v49 = vmul.f32 %v5316_v0, %v6921_v22  ;;  %v5318_v2 = vpop.eup %5317  ;;  %v6985_v22 = vld [vmem:[#allocation14 + $0x1d8] sm:$0xff]  ;;  %8361 = vst [vmem:[#allocation36_spill] sm:$0xff] %v7125_v46  ;;  %8362 = vst [vmem:[#allocation37_spill] sm:$0xff] %v7127_v51  ;;  %v7131_v0 = vld [vmem:[#allocation14 + $0x40] sm:$0xff] }
 0x9c7   :  { %8363 = vst [vmem:[#allocation38_spill] sm:$0xff] %v7131_v0 }
 0x9c8   :  { %v6968_v50 = vadd.f32 %v2603_v48, %v2602_v49  ;;  %v7137_v49 = vld [vmem:[#allocation14 + $0x28] sm:$0xff]  ;;  %v7139_v48 = vld [vmem:[#allocation14 + $0x38] sm:$0xff] }
 0x9c9   :  { %8365 = vst [vmem:[#allocation40_spill] sm:$0xff] %v7137_v49  ;;  %8366 = vst [vmem:[#allocation41_spill] sm:$0xff] %v7139_v48 }
 0x9ca   :  { %5319 = vtanh.f32 %v6968_v50 }
 0x9d7   :  { %v5320_v28 = vpop.eup %5319 }
 0x9d8   :  { %v2606_v29 = vmul.f32 %v5320_v28, %v5318_v2  ;;  %v7143_v2 = vld [vmem:[#allocation14 + $0x20] sm:$0xff]  ;;  %v7145_v28 = vld [vmem:[#allocation14 + $0x30] sm:$0xff] }
 0x9d9   :  { %8367 = vst [vmem:[#allocation42_spill] sm:$0xff] %v7143_v2  ;;  %8368 = vst [vmem:[#allocation43_spill] sm:$0xff] %v7145_v28 }
 0x9da   :  { %2674 = vmatmul.mubr.f32.vlgmr.msra.gmra.mxu0 %v2606_v29  ;;  %2745 = vmatmul.mubr.f32.vlgmr.msra.gmra.mxu1 %v2606_v29  ;;  %v7149_v29 = vld [vmem:[#allocation14 + $0x8] sm:$0xff] }
 0x9db   :  { %2877 = vmatprep.mubr.f32.mxu0 %v8348_v58  ;;  %2948 = vmatprep.mubr.f32.mxu1 %v8348_v58  ;;  %8369 = vst [vmem:[#allocation44_spill] sm:$0xff] %v7149_v29  ;;  %v7151_v58 = vld [vmem:[#allocation14 + $0x18] sm:$0xff] }
 0x9dc   :  { %2814 = vmatpush1.msra.mxu0 %v6977_v59  ;;  %2885 = vmatpush1.msra.mxu1 %v6981_v6  ;;  %8370 = vst [vmem:[#allocation45_spill] sm:$0xff] %v7151_v58 }
 0x9dd   :  { %2815 = vmatprep.subr.mxu0 %v6983_v54  ;;  %2886 = vmatprep.subr.mxu1 %v6985_v22 }
 0x9de   :  { %2816 = vmatpush1.msra.mxu0 %v6989_v16  ;;  %2887 = vmatpush1.msra.mxu1 %v6991_v14 }
 0x9df   :  { %2817 = vmatprep.subr.mxu0 %v6993_v10  ;;  %2888 = vmatprep.subr.mxu1 %v6997_v21 }
 0x9e0   :  { %2818 = vmatpush1.msra.mxu0 %v6999_v9  ;;  %2889 = vmatpush1.msra.mxu1 %v7001_v17 }
 0x9e1   :  { %2819 = vmatprep.subr.mxu0 %v7005_v19  ;;  %2890 = vmatprep.subr.mxu1 %v7007_v33 }
 0x9e2   :  { %2820 = vmatpush1.msra.mxu0 %v7011_v20  ;;  %2891 = vmatpush1.msra.mxu1 %v7013_v8 }
 0x9e3   :  { %2821 = vmatprep.subr.mxu0 %v7017_v15  ;;  %2892 = vmatprep.subr.mxu1 %v7019_v60 }
 0x9e4   :  { %2822 = vmatpush1.msra.mxu0 %v7023_v4  ;;  %2893 = vmatpush1.msra.mxu1 %v7025_v7 }
 0x9e5   :  { %2823 = vmatprep.subr.mxu0 %v7029_v24  ;;  %2894 = vmatprep.subr.mxu1 %v7031_v13 }
 0x9e6   :  { %2824 = vmatpush1.msra.mxu0 %v7035_v32  ;;  %2895 = vmatpush1.msra.mxu1 %v7037_v26 }
 0x9e7   :  { %2825 = vmatprep.subr.mxu0 %v7041_v63  ;;  %2896 = vmatprep.subr.mxu1 %v7043_v11 }
 0x9e8   :  { %2826 = vmatpush1.msra.mxu0 %v7047_v18  ;;  %2897 = vmatpush1.msra.mxu1 %v7049_v23 }
 0x9e9   :  { %2827 = vmatprep.subr.mxu0 %v7053_v12  ;;  %2898 = vmatprep.subr.mxu1 %v7055_v25 }
 0x9ea   :  { %2828 = vmatpush1.msra.mxu0 %v7059_v27  ;;  %2899 = vmatpush1.msra.mxu1 %v7061_v1 }
 0x9eb   :  { %2829 = vmatprep.subr.mxu0 %v7065_v34  ;;  %2900 = vmatprep.subr.mxu1 %v7067_v35 }
 0x9ec   :  { %2830 = vmatpush1.msra.mxu0 %v7071_v36  ;;  %2901 = vmatpush1.msra.mxu1 %v7073_v37 }
 0x9ed   :  { %2831 = vmatprep.subr.mxu0 %v7077_v38  ;;  %2902 = vmatprep.subr.mxu1 %v7079_v39 }
 0x9ee   :  { %2832 = vmatpush1.msra.mxu0 %v7083_v40  ;;  %2903 = vmatpush1.msra.mxu1 %v7085_v41 }
 0x9ef   :  { %2833 = vmatprep.subr.mxu0 %v7089_v42  ;;  %2904 = vmatprep.subr.mxu1 %v7091_v43 }
 0x9f0   :  { %2834 = vmatpush1.msra.mxu0 %v7095_v44  ;;  %2905 = vmatpush1.msra.mxu1 %v7097_v45 }
 0x9f1   :  { %2835 = vmatprep.subr.mxu0 %v7101_v53  ;;  %2906 = vmatprep.subr.mxu1 %v7103_v56 }
 0x9f2   :  { %2836 = vmatpush1.msra.mxu0 %v7107_v55  ;;  %2907 = vmatpush1.msra.mxu1 %v7109_v62 }
 0x9f3   :  { %2837 = vmatprep.subr.mxu0 %v7113_v3  ;;  %2908 = vmatprep.subr.mxu1 %v7115_v61 }
 0x9f4   :  { %2838 = vmatpush1.msra.mxu0 %v7119_v5  ;;  %2909 = vmatpush1.msra.mxu1 %v7121_v52  ;;  %v7155_v52 = vld [vmem:[#allocation14] sm:$0xff] }
 0x9f5   :  { %2839 = vmatprep.subr.mxu0 %v7125_v46  ;;  %2910 = vmatprep.subr.mxu1 %v7127_v51  ;;  %8371 = vst [vmem:[#allocation46_spill] sm:$0xff] %v7155_v52  ;;  %v7157_v46 = vld [vmem:[#allocation14 + $0x10] sm:$0xff] }
 0x9f6   :  { %2840 = vmatpush1.msra.mxu0 %v7131_v0  ;;  %2911 = vmatpush1.msra.mxu1 %v7133_v57  ;;  %8372 = vst [vmem:[#allocation47_spill] sm:$0xff] %v7157_v46 }
 0x9f7   :  { %2841 = vmatprep.subr.mxu0 %v7137_v49  ;;  %2912 = vmatprep.subr.mxu1 %v7139_v48 }
 0x9f8   :  { %2842 = vmatpush1.msra.mxu0 %v7143_v2  ;;  %2913 = vmatpush1.msra.mxu1 %v7145_v28 }
 0x9f9   :  { %2843 = vmatprep.subr.mxu0 %v7149_v29  ;;  %2914 = vmatprep.subr.mxu1 %v7151_v58 }
 0x9fa   :  { %2844 = vmatpush1.msra.mxu0 %v7155_v52  ;;  %2915 = vmatpush1.msra.mxu1 %v7157_v46  ;;  %v2608_v52 = vld [vmem:[#allocation2 + $0x21] ss:$8 sm:$0xf] }
 0x9fb   :  { %3019 = vmatprep.subr.mxu0 %v6973_v30  ;;  %3090 = vmatprep.subr.mxu1 %v6975_v31 }
 0xa9a   :  { %v2675_v48 = vpop.f32.mrf.mxu0  ;;  %v2746_v49 = vpop.f32.mrf.mxu1 }
 0xa9c   :  { %v2677_v57 = vpop.f32.mrf.mxu0  ;;  %v2748_v0 = vpop.f32.mrf.mxu1 }
 0xa9d   :  { %v2755_v51 = vcombine.low %v2675_v48, %v2677_v57  ;;  %v2756_v2 = vcombine.low %v2746_v49, %v2748_v0 }
 0xa9f   :  { %v2763_v28 = vrot.slane %v2755_v51, %v6277_v47  ;;  %v2770_v29 = vrot.slane %v2756_v2, %v6277_v47  ;;  %v8376_v2 = vld [vmem:[#allocation32_spill] sm:$0xff] }
 0xaa1   :  { %v2771_v5 = vcombine.low %v2763_v28, %v2770_v29  ;;  %v8377_v28 = vld [vmem:[#allocation33_spill] sm:$0xff]  ;;  %v8378_v29 = vld [vmem:[#allocation34_spill] sm:$0xff] }
 0xaa3   :  { %v2778_v58 = vrot.slane %v2771_v5, %v6277_v47 }
 0xaa5   :  { %v2780_v61 = vadd.f32 %v2778_v58, %v2608_v52 }
 0xaa7   :  { %v5074_v46 = vmul.f32 -1.442695, %v2780_v61  ;;  %v2788_v3 = vrot.slane %v2780_v61, 1  ;;  %v2799_v31 = vrot.slane %v2780_v61, 3  ;;  %v2796_v56 = vrot.slane %v2780_v61, 2  ;;  %v8375_v61 = vld [vmem:[#allocation29_spill] sm:$0xff] }
 0xaa9   :  { %5321 = vpow2.f32 %v5074_v46  ;;  %v5075_v30 = vmul.f32 -1.442695, %v2788_v3  ;;  %v5076_v62 = vmul.f32 -1.442695, %v2799_v31 }
 0xaab   :  { %5323 = vpow2.f32 %v5075_v30 }
 0xaac   :  { %5325 = vpow2.f32 %v5076_v62 }
 0xab6   :  { %v5322_v55 = vpop.eup %5321 }
 0xab7   :  { %v2784_v57 = vadd.f32 1.0, %v5322_v55 }
 0xab8   :  { %v5324_v0 = vpop.eup %5323 }
 0xab9   :  { %5327 = vrcp.f32 %v2784_v57  ;;  %v2793_v51 = vadd.f32 1.0, %v5324_v0  ;;  %v5326_v49 = vpop.eup %5325  ;;  %v8379_v57 = vld [vmem:[#allocation35_spill] sm:$0xff]  ;;  %v8380_v0 = vld [vmem:[#allocation36_spill] sm:$0xff] }
 0xaba   :  { %5329 = vtanh.f32 %v2796_v56  ;;  %v2804_v52 = vadd.f32 1.0, %v5326_v49  ;;  %v8374_v56 = vld [vmem:[#allocation28_spill] sm:$0xff]  ;;  %v8382_v49 = vld [vmem:[#allocation38_spill] sm:$0xff] }
 0xabb   :  { %5331 = vrcp.f32 %v2793_v51  ;;  %v8381_v51 = vld [vmem:[#allocation37_spill] sm:$0xff] }
 0xabc   :  { %5333 = vrcp.f32 %v2804_v52  ;;  %v8386_v52 = vld [vmem:[#allocation42_spill] sm:$0xff] }
 0xac6   :  { %v5328_v5 = vpop.eup %5327 }
 0xac7   :  { %v5330_v48 = vpop.eup %5329 }
 0xac8   :  { %v5332_v58 = vpop.eup %5331  ;;  %v2808_v3 = vmul.f32 %v5330_v48, %v5328_v5  ;;  %v8383_v5 = vld [vmem:[#allocation39_spill] sm:$0xff]  ;;  %v8384_v48 = vld [vmem:[#allocation40_spill] sm:$0xff] }
 0xac9   :  { %v2807_v46 = vmul.f32 %v5332_v58, %v6968_v50  ;;  %v5334_v31 = vpop.eup %5333  ;;  %v8373_v50 = vld [vmem:[#allocation27_spill] sm:$0xff]  ;;  %v8385_v58 = vld [vmem:[#allocation41_spill] sm:$0xff] }
 0xacb   :  { %v7171_v30 = vadd.f32 %v2808_v3, %v2807_v46  ;;  %v8387_v46 = vld [vmem:[#allocation43_spill] sm:$0xff]  ;;  %v8388_v3 = vld [vmem:[#allocation44_spill] sm:$0xff] }
 0xacd   :  { %5335 = vtanh.f32 %v7171_v30 }
 0xada   :  { %v5336_v55 = vpop.eup %5335 }
 0xadb   :  { %v2811_v62 = vmul.f32 %v5336_v55, %v5334_v31  ;;  %v8389_v31 = vld [vmem:[#allocation45_spill] sm:$0xff]  ;;  %v8390_v55 = vld [vmem:[#allocation46_spill] sm:$0xff] }
 0xadd   :  { %2878 = vmatmul.mubr.f32.vlgmr.msra.gmra.mxu0 %v2811_v62  ;;  %2949 = vmatmul.mubr.f32.vlgmr.msra.gmra.mxu1 %v2811_v62  ;;  %v8391_v62 = vmov 0.0  }
 0xade   :  { %3020 = vmatpush1.msra.mxu0 %v6977_v59  ;;  %3091 = vmatpush1.msra.mxu1 %v6981_v6 }
 0xadf   :  { %3021 = vmatprep.subr.mxu0 %v6983_v54  ;;  %3092 = vmatprep.subr.mxu1 %v6985_v22 }
 0xae0   :  { %3022 = vmatpush1.msra.mxu0 %v6989_v16  ;;  %3093 = vmatpush1.msra.mxu1 %v6991_v14 }
 0xae1   :  { %3023 = vmatprep.subr.mxu0 %v6993_v10  ;;  %3094 = vmatprep.subr.mxu1 %v6997_v21 }
 0xae2   :  { %3024 = vmatpush1.msra.mxu0 %v6999_v9  ;;  %3095 = vmatpush1.msra.mxu1 %v7001_v17 }
 0xae3   :  { %3025 = vmatprep.subr.mxu0 %v7005_v19  ;;  %3096 = vmatprep.subr.mxu1 %v7007_v33 }
 0xae4   :  { %3026 = vmatpush1.msra.mxu0 %v7011_v20  ;;  %3097 = vmatpush1.msra.mxu1 %v7013_v8 }
 0xae5   :  { %3027 = vmatprep.subr.mxu0 %v7017_v15  ;;  %3098 = vmatprep.subr.mxu1 %v7019_v60 }
 0xae6   :  { %3028 = vmatpush1.msra.mxu0 %v7023_v4  ;;  %3099 = vmatpush1.msra.mxu1 %v7025_v7 }
 0xae7   :  { %3029 = vmatprep.subr.mxu0 %v7029_v24  ;;  %3100 = vmatprep.subr.mxu1 %v7031_v13 }
 0xae8   :  { %3030 = vmatpush1.msra.mxu0 %v7035_v32  ;;  %3101 = vmatpush1.msra.mxu1 %v7037_v26 }
 0xae9   :  { %3031 = vmatprep.subr.mxu0 %v7041_v63  ;;  %3102 = vmatprep.subr.mxu1 %v7043_v11 }
 0xaea   :  { %3032 = vmatpush1.msra.mxu0 %v7047_v18  ;;  %3103 = vmatpush1.msra.mxu1 %v7049_v23 }
 0xaeb   :  { %3033 = vmatprep.subr.mxu0 %v7053_v12  ;;  %3104 = vmatprep.subr.mxu1 %v7055_v25 }
 0xaec   :  { %3034 = vmatpush1.msra.mxu0 %v7059_v27  ;;  %3105 = vmatpush1.msra.mxu1 %v7061_v1 }
 0xaed   :  { %3035 = vmatprep.subr.mxu0 %v7065_v34  ;;  %3106 = vmatprep.subr.mxu1 %v7067_v35 }
 0xaee   :  { %3036 = vmatpush1.msra.mxu0 %v7071_v36  ;;  %3107 = vmatpush1.msra.mxu1 %v7073_v37 }
 0xaef   :  { %3037 = vmatprep.subr.mxu0 %v7077_v38  ;;  %3108 = vmatprep.subr.mxu1 %v7079_v39 }
 0xaf0   :  { %3038 = vmatpush1.msra.mxu0 %v7083_v40  ;;  %3109 = vmatpush1.msra.mxu1 %v7085_v41 }
 0xaf1   :  { %3039 = vmatprep.subr.mxu0 %v7089_v42  ;;  %3110 = vmatprep.subr.mxu1 %v7091_v43 }
 0xaf2   :  { %3040 = vmatpush1.msra.mxu0 %v7095_v44  ;;  %3111 = vmatpush1.msra.mxu1 %v7097_v45 }
 0xaf3   :  { %3041 = vmatprep.subr.mxu0 %v7101_v53  ;;  %3112 = vmatprep.subr.mxu1 %v8373_v50 }
 0xaf4   :  { %3042 = vmatpush1.msra.mxu0 %v8374_v56  ;;  %3113 = vmatpush1.msra.mxu1 %v8375_v61 }
 0xaf5   :  { %3043 = vmatprep.subr.mxu0 %v8376_v2  ;;  %3114 = vmatprep.subr.mxu1 %v8377_v28 }
 0xaf6   :  { %3044 = vmatpush1.msra.mxu0 %v8378_v29  ;;  %3115 = vmatpush1.msra.mxu1 %v8379_v57 }
 0xaf7   :  { %3045 = vmatprep.subr.mxu0 %v8380_v0  ;;  %3116 = vmatprep.subr.mxu1 %v8381_v51  ;;  %v8392_v51 = vld [vmem:[#allocation47_spill] sm:$0xff] }
 0xaf8   :  { %3046 = vmatpush1.msra.mxu0 %v8382_v49  ;;  %3117 = vmatpush1.msra.mxu1 %v8383_v5  ;;  %v8393_v5 = vld [vmem:[#allocation51_spill] sm:$0xff] }
 0xaf9   :  { %3047 = vmatprep.subr.mxu0 %v8384_v48  ;;  %3118 = vmatprep.subr.mxu1 %v8385_v58  ;;  %v8394_v48 = vld [vmem:[#allocation52_spill] sm:$0xff] }
 0xafa   :  { %3048 = vmatpush1.msra.mxu0 %v8386_v52  ;;  %3119 = vmatpush1.msra.mxu1 %v8387_v46 }
 0xafb   :  { %3049 = vmatprep.subr.mxu0 %v8388_v3  ;;  %3120 = vmatprep.subr.mxu1 %v8389_v31 }
 0xafc   :  { %3050 = vmatpush1.msra.mxu0 %v8390_v55  ;;  %3083 = vmatprep.mubr.f32.mxu0 %v8391_v62 }
 0xafd   :  { %3121 = vmatpush1.msra.mxu1 %v8392_v51  ;;  %3154 = vmatprep.mubr.f32.mxu1 %v8391_v62  ;;  %v2812_v51 = vld [vmem:[#allocation3] ss:$8 sm:$0xf] }
 0xafe   :  { %3225 = vmatprep.subr.mxu0 %v8393_v5  ;;  %3296 = vmatprep.subr.mxu1 %v8394_v48 }
 0xb9d   :  { %v2879_v58 = vpop.f32.mrf.mxu0  ;;  %v2950_v52 = vpop.f32.mrf.mxu1 }
 0xb9f   :  { %v2881_v49 = vpop.f32.mrf.mxu0  ;;  %v2952_v46 = vpop.f32.mrf.mxu1 }
 0xba0   :  { %v2959_v0 = vcombine.low %v2879_v58, %v2881_v49  ;;  %v2960_v3 = vcombine.low %v2950_v52, %v2952_v46 }
 0xba2   :  { %v2967_v31 = vrot.slane %v2959_v0, %v6277_v47  ;;  %v2974_v55 = vrot.slane %v2960_v3, %v6277_v47 }
 0xba4   :  { %v2975_v57 = vcombine.low %v2967_v31, %v2974_v55  ;;  %v8398_v31 = vld [vmem:[#allocation32_spill] sm:$0xff]  ;;  %v8399_v55 = vld [vmem:[#allocation33_spill] sm:$0xff] }
 0xba6   :  { %v2982_v29 = vrot.slane %v2975_v57, %v6277_v47 }
 0xba8   :  { %v2984_v28 = vadd.f32 %v2982_v29, %v2812_v51 }
 0xbaa   :  { %v5077_v62 = vmul.f32 -1.442695, %v2984_v28  ;;  %v2992_v2 = vrot.slane %v2984_v28, 1  ;;  %v3003_v48 = vrot.slane %v2984_v28, 3  ;;  %v3000_v50 = vrot.slane %v2984_v28, 2 }
 0xbac   :  { %5337 = vpow2.f32 %v5077_v62  ;;  %v5078_v5 = vmul.f32 -1.442695, %v2992_v2  ;;  %v5079_v61 = vmul.f32 -1.442695, %v3003_v48  ;;  %v8397_v48 = vld [vmem:[#allocation29_spill] sm:$0xff]  ;;  %v8400_v62 = vld [vmem:[#allocation34_spill] sm:$0xff] }
 0xbae   :  { %5339 = vpow2.f32 %v5078_v5 }
 0xbaf   :  { %5341 = vpow2.f32 %v5079_v61 }
 0xbb9   :  { %v5338_v56 = vpop.eup %5337 }
 0xbba   :  { %v2988_v49 = vadd.f32 1.0, %v5338_v56 }
 0xbbb   :  { %v5340_v58 = vpop.eup %5339 }
 0xbbc   :  { %5343 = vrcp.f32 %v2988_v49  ;;  %v2997_v0 = vadd.f32 1.0, %v5340_v58  ;;  %v5342_v52 = vpop.eup %5341  ;;  %v8401_v49 = vld [vmem:[#allocation35_spill] sm:$0xff]  ;;  %v8402_v58 = vld [vmem:[#allocation36_spill] sm:$0xff] }
 0xbbd   :  { %5345 = vtanh.f32 %v3000_v50  ;;  %v3008_v51 = vadd.f32 1.0, %v5342_v52  ;;  %v8396_v50 = vld [vmem:[#allocation28_spill] sm:$0xff]  ;;  %v8404_v52 = vld [vmem:[#allocation38_spill] sm:$0xff] }
 0xbbe   :  { %5347 = vrcp.f32 %v2997_v0  ;;  %v8403_v0 = vld [vmem:[#allocation37_spill] sm:$0xff] }
 0xbbf   :  { %5349 = vrcp.f32 %v3008_v51  ;;  %v8408_v51 = vld [vmem:[#allocation42_spill] sm:$0xff] }
 0xbc9   :  { %v5344_v57 = vpop.eup %5343 }
 0xbca   :  { %v5346_v46 = vpop.eup %5345 }
 0xbcb   :  { %v5348_v29 = vpop.eup %5347  ;;  %v3012_v2 = vmul.f32 %v5346_v46, %v5344_v57  ;;  %v8405_v57 = vld [vmem:[#allocation39_spill] sm:$0xff]  ;;  %v8406_v46 = vld [vmem:[#allocation40_spill] sm:$0xff] }
 0xbcc   :  { %v3011_v3 = vmul.f32 %v5348_v29, %v7171_v30  ;;  %v5350_v56 = vpop.eup %5349  ;;  %v8395_v30 = vld [vmem:[#allocation27_spill] sm:$0xff]  ;;  %v8407_v29 = vld [vmem:[#allocation41_spill] sm:$0xff] }
 0xbce   :  { %v7244_v5 = vadd.f32 %v3012_v2, %v3011_v3  ;;  %v8409_v3 = vld [vmem:[#allocation43_spill] sm:$0xff]  ;;  %v8410_v2 = vld [vmem:[#allocation44_spill] sm:$0xff] }
 0xbd0   :  { %5351 = vtanh.f32 %v7244_v5 }
 0xbdd   :  { %v5352_v28 = vpop.eup %5351 }
 0xbde   :  { %v3015_v61 = vmul.f32 %v5352_v28, %v5350_v56  ;;  %v8411_v56 = vld [vmem:[#allocation45_spill] sm:$0xff]  ;;  %v8412_v28 = vld [vmem:[#allocation46_spill] sm:$0xff] }
 0xbe0   :  { %3016 = vst [vmem:[#allocation4] sm:$0x1] %v3015_v61  ;;  %3084 = vmatmul.mubr.f32.vlgmr.msra.gmra.mxu0 %v3015_v61  ;;  %3155 = vmatmul.mubr.f32.vlgmr.msra.gmra.mxu1 %v3015_v61  ;;  %v8413_v61 = vmov 0.0  }
 0xbe1   :  { %3226 = vmatpush1.msra.mxu0 %v6977_v59  ;;  %3297 = vmatpush1.msra.mxu1 %v6981_v6 }
 0xbe2   :  { %3227 = vmatprep.subr.mxu0 %v6983_v54  ;;  %3298 = vmatprep.subr.mxu1 %v6985_v22 }
 0xbe3   :  { %3228 = vmatpush1.msra.mxu0 %v6989_v16  ;;  %3299 = vmatpush1.msra.mxu1 %v6991_v14 }
 0xbe4   :  { %3229 = vmatprep.subr.mxu0 %v6993_v10  ;;  %3300 = vmatprep.subr.mxu1 %v6997_v21 }
 0xbe5   :  { %3230 = vmatpush1.msra.mxu0 %v6999_v9  ;;  %3301 = vmatpush1.msra.mxu1 %v7001_v17 }
 0xbe6   :  { %3231 = vmatprep.subr.mxu0 %v7005_v19  ;;  %3302 = vmatprep.subr.mxu1 %v7007_v33 }
 0xbe7   :  { %3232 = vmatpush1.msra.mxu0 %v7011_v20  ;;  %3303 = vmatpush1.msra.mxu1 %v7013_v8 }
 0xbe8   :  { %3233 = vmatprep.subr.mxu0 %v7017_v15  ;;  %3304 = vmatprep.subr.mxu1 %v7019_v60 }
 0xbe9   :  { %3234 = vmatpush1.msra.mxu0 %v7023_v4  ;;  %3305 = vmatpush1.msra.mxu1 %v7025_v7 }
 0xbea   :  { %3235 = vmatprep.subr.mxu0 %v7029_v24  ;;  %3306 = vmatprep.subr.mxu1 %v7031_v13 }
 0xbeb   :  { %3236 = vmatpush1.msra.mxu0 %v7035_v32  ;;  %3307 = vmatpush1.msra.mxu1 %v7037_v26 }
 0xbec   :  { %3237 = vmatprep.subr.mxu0 %v7041_v63  ;;  %3308 = vmatprep.subr.mxu1 %v7043_v11 }
 0xbed   :  { %3238 = vmatpush1.msra.mxu0 %v7047_v18  ;;  %3309 = vmatpush1.msra.mxu1 %v7049_v23 }
 0xbee   :  { %3239 = vmatprep.subr.mxu0 %v7053_v12  ;;  %3310 = vmatprep.subr.mxu1 %v7055_v25 }
 0xbef   :  { %3240 = vmatpush1.msra.mxu0 %v7059_v27  ;;  %3311 = vmatpush1.msra.mxu1 %v7061_v1 }
 0xbf0   :  { %3241 = vmatprep.subr.mxu0 %v7065_v34  ;;  %3312 = vmatprep.subr.mxu1 %v7067_v35 }
 0xbf1   :  { %3242 = vmatpush1.msra.mxu0 %v7071_v36  ;;  %3313 = vmatpush1.msra.mxu1 %v7073_v37 }
 0xbf2   :  { %3243 = vmatprep.subr.mxu0 %v7077_v38  ;;  %3314 = vmatprep.subr.mxu1 %v7079_v39 }
 0xbf3   :  { %3244 = vmatpush1.msra.mxu0 %v7083_v40  ;;  %3315 = vmatpush1.msra.mxu1 %v7085_v41 }
 0xbf4   :  { %3245 = vmatprep.subr.mxu0 %v7089_v42  ;;  %3316 = vmatprep.subr.mxu1 %v7091_v43 }
 0xbf5   :  { %3246 = vmatpush1.msra.mxu0 %v7095_v44  ;;  %3317 = vmatpush1.msra.mxu1 %v7097_v45 }
 0xbf6   :  { %3247 = vmatprep.subr.mxu0 %v7101_v53  ;;  %3318 = vmatprep.subr.mxu1 %v8395_v30 }
 0xbf7   :  { %3248 = vmatpush1.msra.mxu0 %v8396_v50  ;;  %3319 = vmatpush1.msra.mxu1 %v8397_v48 }
 0xbf8   :  { %3249 = vmatprep.subr.mxu0 %v8398_v31  ;;  %3320 = vmatprep.subr.mxu1 %v8399_v55 }
 0xbf9   :  { %3250 = vmatpush1.msra.mxu0 %v8400_v62  ;;  %3321 = vmatpush1.msra.mxu1 %v8401_v49 }
 0xbfa   :  { %3251 = vmatprep.subr.mxu0 %v8402_v58  ;;  %3322 = vmatprep.subr.mxu1 %v8403_v0  ;;  %v8414_v0 = vld [vmem:[#allocation47_spill] sm:$0xff] }
 0xbfb   :  { %3252 = vmatpush1.msra.mxu0 %v8404_v52  ;;  %3323 = vmatpush1.msra.mxu1 %v8405_v57  ;;  %v8415_v57 = vld [vmem:[#allocation51_spill] sm:$0xff] }
 0xbfc   :  { %3253 = vmatprep.subr.mxu0 %v8406_v46  ;;  %3324 = vmatprep.subr.mxu1 %v8407_v29  ;;  %v8416_v46 = vld [vmem:[#allocation52_spill] sm:$0xff] }
 0xbfd   :  { %3254 = vmatpush1.msra.mxu0 %v8408_v51  ;;  %3325 = vmatpush1.msra.mxu1 %v8409_v3 }
 0xbfe   :  { %3255 = vmatprep.subr.mxu0 %v8410_v2  ;;  %3326 = vmatprep.subr.mxu1 %v8411_v56 }
 0xbff   :  { %3256 = vmatpush1.msra.mxu0 %v8412_v28  ;;  %3289 = vmatprep.mubr.f32.mxu0 %v8413_v61 }
 0xc00   :  { %3327 = vmatpush1.msra.mxu1 %v8414_v0  ;;  %3360 = vmatprep.mubr.f32.mxu1 %v8413_v61  ;;  %v3018_v0 = vld [vmem:[#allocation3 + $0x1] ss:$8 sm:$0xf] }
 0xc01   :  { %3431 = vmatprep.subr.mxu0 %v8415_v57  ;;  %3502 = vmatprep.subr.mxu1 %v8416_v46 }
 0xca0   :  { %v3085_v29 = vpop.f32.mrf.mxu0  ;;  %v3156_v51 = vpop.f32.mrf.mxu1 }
 0xca2   :  { %v3087_v52 = vpop.f32.mrf.mxu0  ;;  %v3158_v3 = vpop.f32.mrf.mxu1 }
 0xca3   :  { %v3165_v58 = vcombine.low %v3085_v29, %v3087_v52  ;;  %v3166_v2 = vcombine.low %v3156_v51, %v3158_v3 }
 0xca5   :  { %v3173_v56 = vrot.slane %v3165_v58, %v6277_v47  ;;  %v3180_v28 = vrot.slane %v3166_v2, %v6277_v47 }
 0xca7   :  { %v3181_v49 = vcombine.low %v3173_v56, %v3180_v28  ;;  %v8420_v56 = vld [vmem:[#allocation32_spill] sm:$0xff]  ;;  %v8421_v28 = vld [vmem:[#allocation33_spill] sm:$0xff] }
 0xca9   :  { %v3188_v62 = vrot.slane %v3181_v49, %v6277_v47 }
 0xcab   :  { %v3190_v55 = vadd.f32 %v3188_v62, %v3018_v0 }
 0xcad   :  { %v5080_v61 = vmul.f32 -1.442695, %v3190_v55  ;;  %v3198_v31 = vrot.slane %v3190_v55, 1  ;;  %v3209_v46 = vrot.slane %v3190_v55, 3  ;;  %v3206_v30 = vrot.slane %v3190_v55, 2 }
 0xcaf   :  { %5353 = vpow2.f32 %v5080_v61  ;;  %v5081_v57 = vmul.f32 -1.442695, %v3198_v31  ;;  %v5082_v48 = vmul.f32 -1.442695, %v3209_v46  ;;  %v8419_v46 = vld [vmem:[#allocation29_spill] sm:$0xff]  ;;  %v8422_v61 = vld [vmem:[#allocation34_spill] sm:$0xff] }
 0xcb1   :  { %5355 = vpow2.f32 %v5081_v57 }
 0xcb2   :  { %5357 = vpow2.f32 %v5082_v48 }
 0xcbc   :  { %v5354_v50 = vpop.eup %5353 }
 0xcbd   :  { %v3194_v52 = vadd.f32 1.0, %v5354_v50 }
 0xcbe   :  { %v5356_v29 = vpop.eup %5355 }
 0xcbf   :  { %5359 = vrcp.f32 %v3194_v52  ;;  %v3203_v58 = vadd.f32 1.0, %v5356_v29  ;;  %v5358_v51 = vpop.eup %5357  ;;  %v8423_v52 = vld [vmem:[#allocation35_spill] sm:$0xff]  ;;  %v8424_v29 = vld [vmem:[#allocation36_spill] sm:$0xff] }
 0xcc0   :  { %5361 = vtanh.f32 %v3206_v30  ;;  %v3214_v0 = vadd.f32 1.0, %v5358_v51  ;;  %v8418_v30 = vld [vmem:[#allocation28_spill] sm:$0xff]  ;;  %v8426_v51 = vld [vmem:[#allocation38_spill] sm:$0xff] }
 0xcc1   :  { %5363 = vrcp.f32 %v3203_v58  ;;  %v8425_v58 = vld [vmem:[#allocation37_spill] sm:$0xff] }
 0xcc2   :  { %5365 = vrcp.f32 %v3214_v0  ;;  %v8430_v0 = vld [vmem:[#allocation42_spill] sm:$0xff] }
 0xccc   :  { %v5360_v49 = vpop.eup %5359 }
 0xccd   :  { %v5362_v3 = vpop.eup %5361 }
 0xcce   :  { %v5364_v62 = vpop.eup %5363  ;;  %v3218_v31 = vmul.f32 %v5362_v3, %v5360_v49  ;;  %v8427_v49 = vld [vmem:[#allocation39_spill] sm:$0xff]  ;;  %v8428_v3 = vld [vmem:[#allocation40_spill] sm:$0xff] }
 0xccf   :  { %v3217_v2 = vmul.f32 %v5364_v62, %v7244_v5  ;;  %v5366_v50 = vpop.eup %5365  ;;  %v8417_v5 = vld [vmem:[#allocation27_spill] sm:$0xff]  ;;  %v8429_v62 = vld [vmem:[#allocation41_spill] sm:$0xff] }
 0xcd1   :  { %v7317_v57 = vadd.f32 %v3218_v31, %v3217_v2  ;;  %v8431_v2 = vld [vmem:[#allocation43_spill] sm:$0xff]  ;;  %v8432_v31 = vld [vmem:[#allocation44_spill] sm:$0xff] }
 0xcd3   :  { %5367 = vtanh.f32 %v7317_v57 }
 0xce0   :  { %v5368_v55 = vpop.eup %5367 }
 0xce1   :  { %v3221_v48 = vmul.f32 %v5368_v55, %v5366_v50  ;;  %v8433_v50 = vld [vmem:[#allocation45_spill] sm:$0xff]  ;;  %v8434_v55 = vld [vmem:[#allocation46_spill] sm:$0xff] }
 0xce3   :  { %3222 = vst [vmem:[#allocation4 + $0x1] sm:$0x1] %v3221_v48  ;;  %3290 = vmatmul.mubr.f32.vlgmr.msra.gmra.mxu0 %v3221_v48  ;;  %3361 = vmatmul.mubr.f32.vlgmr.msra.gmra.mxu1 %v3221_v48  ;;  %v8435_v48 = vmov 0.0  }
 0xce4   :  { %3432 = vmatpush1.msra.mxu0 %v6977_v59  ;;  %3503 = vmatpush1.msra.mxu1 %v6981_v6 }
 0xce5   :  { %3433 = vmatprep.subr.mxu0 %v6983_v54  ;;  %3504 = vmatprep.subr.mxu1 %v6985_v22 }
 0xce6   :  { %3434 = vmatpush1.msra.mxu0 %v6989_v16  ;;  %3505 = vmatpush1.msra.mxu1 %v6991_v14 }
 0xce7   :  { %3435 = vmatprep.subr.mxu0 %v6993_v10  ;;  %3506 = vmatprep.subr.mxu1 %v6997_v21 }
 0xce8   :  { %3436 = vmatpush1.msra.mxu0 %v6999_v9  ;;  %3507 = vmatpush1.msra.mxu1 %v7001_v17 }
 0xce9   :  { %3437 = vmatprep.subr.mxu0 %v7005_v19  ;;  %3508 = vmatprep.subr.mxu1 %v7007_v33 }
 0xcea   :  { %3438 = vmatpush1.msra.mxu0 %v7011_v20  ;;  %3509 = vmatpush1.msra.mxu1 %v7013_v8 }
 0xceb   :  { %3439 = vmatprep.subr.mxu0 %v7017_v15  ;;  %3510 = vmatprep.subr.mxu1 %v7019_v60 }
 0xcec   :  { %3440 = vmatpush1.msra.mxu0 %v7023_v4  ;;  %3511 = vmatpush1.msra.mxu1 %v7025_v7 }
 0xced   :  { %3441 = vmatprep.subr.mxu0 %v7029_v24  ;;  %3512 = vmatprep.subr.mxu1 %v7031_v13 }
 0xcee   :  { %3442 = vmatpush1.msra.mxu0 %v7035_v32  ;;  %3513 = vmatpush1.msra.mxu1 %v7037_v26 }
 0xcef   :  { %3443 = vmatprep.subr.mxu0 %v7041_v63  ;;  %3514 = vmatprep.subr.mxu1 %v7043_v11 }
 0xcf0   :  { %3444 = vmatpush1.msra.mxu0 %v7047_v18  ;;  %3515 = vmatpush1.msra.mxu1 %v7049_v23 }
 0xcf1   :  { %3445 = vmatprep.subr.mxu0 %v7053_v12  ;;  %3516 = vmatprep.subr.mxu1 %v7055_v25 }
 0xcf2   :  { %3446 = vmatpush1.msra.mxu0 %v7059_v27  ;;  %3517 = vmatpush1.msra.mxu1 %v7061_v1 }
 0xcf3   :  { %3447 = vmatprep.subr.mxu0 %v7065_v34  ;;  %3518 = vmatprep.subr.mxu1 %v7067_v35 }
 0xcf4   :  { %3448 = vmatpush1.msra.mxu0 %v7071_v36  ;;  %3519 = vmatpush1.msra.mxu1 %v7073_v37 }
 0xcf5   :  { %3449 = vmatprep.subr.mxu0 %v7077_v38  ;;  %3520 = vmatprep.subr.mxu1 %v7079_v39 }
 0xcf6   :  { %3450 = vmatpush1.msra.mxu0 %v7083_v40  ;;  %3521 = vmatpush1.msra.mxu1 %v7085_v41 }
 0xcf7   :  { %3451 = vmatprep.subr.mxu0 %v7089_v42  ;;  %3522 = vmatprep.subr.mxu1 %v7091_v43 }
 0xcf8   :  { %3452 = vmatpush1.msra.mxu0 %v7095_v44  ;;  %3523 = vmatpush1.msra.mxu1 %v7097_v45 }
 0xcf9   :  { %3453 = vmatprep.subr.mxu0 %v7101_v53  ;;  %3524 = vmatprep.subr.mxu1 %v8417_v5 }
 0xcfa   :  { %3454 = vmatpush1.msra.mxu0 %v8418_v30  ;;  %3525 = vmatpush1.msra.mxu1 %v8419_v46 }
 0xcfb   :  { %3455 = vmatprep.subr.mxu0 %v8420_v56  ;;  %3526 = vmatprep.subr.mxu1 %v8421_v28 }
 0xcfc   :  { %3456 = vmatpush1.msra.mxu0 %v8422_v61  ;;  %3527 = vmatpush1.msra.mxu1 %v8423_v52 }
 0xcfd   :  { %3457 = vmatprep.subr.mxu0 %v8424_v29  ;;  %3528 = vmatprep.subr.mxu1 %v8425_v58  ;;  %v8436_v58 = vld [vmem:[#allocation47_spill] sm:$0xff] }
 0xcfe   :  { %3458 = vmatpush1.msra.mxu0 %v8426_v51  ;;  %3529 = vmatpush1.msra.mxu1 %v8427_v49  ;;  %v8437_v49 = vld [vmem:[#allocation51_spill] sm:$0xff] }
 0xcff   :  { %3459 = vmatprep.subr.mxu0 %v8428_v3  ;;  %3530 = vmatprep.subr.mxu1 %v8429_v62  ;;  %v8438_v3 = vld [vmem:[#allocation52_spill] sm:$0xff] }
 0xd00   :  { %3460 = vmatpush1.msra.mxu0 %v8430_v0  ;;  %3531 = vmatpush1.msra.mxu1 %v8431_v2 }
 0xd01   :  { %3461 = vmatprep.subr.mxu0 %v8432_v31  ;;  %3532 = vmatprep.subr.mxu1 %v8433_v50 }
 0xd02   :  { %3462 = vmatpush1.msra.mxu0 %v8434_v55  ;;  %3495 = vmatprep.mubr.f32.mxu0 %v8435_v48 }
 0xd03   :  { %3533 = vmatpush1.msra.mxu1 %v8436_v58  ;;  %3566 = vmatprep.mubr.f32.mxu1 %v8435_v48  ;;  %v3224_v58 = vld [vmem:[#allocation3 + $0x2] ss:$8 sm:$0xf] }
 0xd04   :  { %3637 = vmatprep.subr.mxu0 %v8437_v49  ;;  %3708 = vmatprep.subr.mxu1 %v8438_v3 }
 0xda3   :  { %v3291_v62 = vpop.f32.mrf.mxu0  ;;  %v3362_v0 = vpop.f32.mrf.mxu1 }
 0xda5   :  { %v3293_v51 = vpop.f32.mrf.mxu0  ;;  %v3364_v2 = vpop.f32.mrf.mxu1 }
 0xda6   :  { %v3371_v29 = vcombine.low %v3291_v62, %v3293_v51  ;;  %v3372_v31 = vcombine.low %v3362_v0, %v3364_v2 }
 0xda8   :  { %v3379_v50 = vrot.slane %v3371_v29, %v6277_v47  ;;  %v3386_v55 = vrot.slane %v3372_v31, %v6277_v47 }
 0xdaa   :  { %v3387_v52 = vcombine.low %v3379_v50, %v3386_v55 }
 0xdac   :  { %v3394_v61 = vrot.slane %v3387_v52, %v6277_v47 }
 0xdae   :  { %v3396_v28 = vadd.f32 %v3394_v61, %v3224_v58 }
 0xdb0   :  { %v5083_v48 = vmul.f32 -1.442695, %v3396_v28  ;;  %v3404_v56 = vrot.slane %v3396_v28, 1  ;;  %v3415_v3 = vrot.slane %v3396_v28, 3  ;;  %v3412_v5 = vrot.slane %v3396_v28, 2 }
 0xdb2   :  { %5369 = vpow2.f32 %v5083_v48  ;;  %v5084_v49 = vmul.f32 -1.442695, %v3404_v56  ;;  %v5085_v46 = vmul.f32 -1.442695, %v3415_v3 }
 0xdb4   :  { %5371 = vpow2.f32 %v5084_v49 }
 0xdb5   :  { %5373 = vpow2.f32 %v5085_v46 }
 0xdbf   :  { %v5370_v30 = vpop.eup %5369 }
 0xdc0   :  { %v3400_v51 = vadd.f32 1.0, %v5370_v30 }
 0xdc1   :  { %v5372_v62 = vpop.eup %5371 }
 0xdc2   :  { %5375 = vrcp.f32 %v3400_v51  ;;  %v3409_v29 = vadd.f32 1.0, %v5372_v62  ;;  %v5374_v0 = vpop.eup %5373 }
 0xdc3   :  { %5377 = vtanh.f32 %v3412_v5  ;;  %v3420_v58 = vadd.f32 1.0, %v5374_v0 }
 0xdc4   :  { %5379 = vrcp.f32 %v3409_v29 }
 0xdc5   :  { %5381 = vrcp.f32 %v3420_v58  ;;  %v7473_v58 = vld [vmem:[#allocation14 + $0x1f0] sm:$0xff] }
 0xdcf   :  { %v5376_v52 = vpop.eup %5375 }
 0xdd0   :  { %v5378_v2 = vpop.eup %5377 }
 0xdd1   :  { %v5380_v61 = vpop.eup %5379  ;;  %v3424_v56 = vmul.f32 %v5378_v2, %v5376_v52 }
 0xdd2   :  { %v3423_v31 = vmul.f32 %v5380_v61, %v7317_v57  ;;  %v5382_v30 = vpop.eup %5381  ;;  %v7470_v61 = vld [vmem:[#allocation14 + $0x1e0] sm:$0xff] }
 0xdd4   :  { %v7390_v50 = vadd.f32 %v3424_v56, %v3423_v31  ;;  %v7476_v31 = vld [vmem:[#allocation14 + $0x1c8] sm:$0xff]  ;;  %v7479_v56 = vld [vmem:[#allocation14 + $0x1d8] sm:$0xff] }
 0xdd6   :  { %5383 = vtanh.f32 %v7390_v50 }
 0xde3   :  { %v5384_v28 = vpop.eup %5383 }
 0xde4   :  { %v3427_v46 = vmul.f32 %v5384_v28, %v5382_v30  ;;  %v7485_v30 = vld [vmem:[#allocation14 + $0x1d0] sm:$0xff]  ;;  %v7488_v28 = vld [vmem:[#allocation14 + $0x1a8] sm:$0xff] }
 0xde6   :  { %3428 = vst [vmem:[#allocation4 + $0x2] sm:$0x1] %v3427_v46  ;;  %3496 = vmatmul.mubr.f32.vlgmr.msra.gmra.mxu0 %v3427_v46  ;;  %3567 = vmatmul.mubr.f32.vlgmr.msra.gmra.mxu1 %v3427_v46  ;;  %v7491_v46 = vld [vmem:[#allocation14 + $0x1b8] sm:$0xff] }
 0xde7   :  { %3638 = vmatpush1.msra.mxu0 %v6977_v59  ;;  %3709 = vmatpush1.msra.mxu1 %v6981_v6  ;;  %v8439_v59 = vld [vmem:[#allocation27_spill] sm:$0xff]  ;;  %v8440_v6 = vld [vmem:[#allocation28_spill] sm:$0xff] }
 0xde8   :  { %3639 = vmatprep.subr.mxu0 %v6983_v54  ;;  %3710 = vmatprep.subr.mxu1 %v6985_v22  ;;  %v8441_v54 = vld [vmem:[#allocation29_spill] sm:$0xff]  ;;  %v8442_v22 = vld [vmem:[#allocation32_spill] sm:$0xff] }
 0xde9   :  { %3640 = vmatpush1.msra.mxu0 %v6989_v16  ;;  %3711 = vmatpush1.msra.mxu1 %v6991_v14  ;;  %v8443_v16 = vld [vmem:[#allocation33_spill] sm:$0xff]  ;;  %v8444_v14 = vld [vmem:[#allocation34_spill] sm:$0xff] }
 0xdea   :  { %3641 = vmatprep.subr.mxu0 %v6993_v10  ;;  %3712 = vmatprep.subr.mxu1 %v6997_v21  ;;  %v8445_v10 = vld [vmem:[#allocation35_spill] sm:$0xff]  ;;  %v8446_v21 = vld [vmem:[#allocation36_spill] sm:$0xff] }
 0xdeb   :  { %3642 = vmatpush1.msra.mxu0 %v6999_v9  ;;  %3713 = vmatpush1.msra.mxu1 %v7001_v17  ;;  %v8447_v9 = vld [vmem:[#allocation37_spill] sm:$0xff]  ;;  %v8448_v17 = vld [vmem:[#allocation38_spill] sm:$0xff] }
 0xdec   :  { %3643 = vmatprep.subr.mxu0 %v7005_v19  ;;  %3714 = vmatprep.subr.mxu1 %v7007_v33  ;;  %v8449_v19 = vld [vmem:[#allocation39_spill] sm:$0xff]  ;;  %v8450_v33 = vld [vmem:[#allocation40_spill] sm:$0xff] }
 0xded   :  { %3644 = vmatpush1.msra.mxu0 %v7011_v20  ;;  %3715 = vmatpush1.msra.mxu1 %v7013_v8  ;;  %v8451_v20 = vld [vmem:[#allocation41_spill] sm:$0xff]  ;;  %v8452_v8 = vld [vmem:[#allocation42_spill] sm:$0xff] }
 0xdee   :  { %3645 = vmatprep.subr.mxu0 %v7017_v15  ;;  %3716 = vmatprep.subr.mxu1 %v7019_v60  ;;  %v8453_v15 = vld [vmem:[#allocation43_spill] sm:$0xff]  ;;  %v8454_v60 = vld [vmem:[#allocation44_spill] sm:$0xff] }
 0xdef   :  { %3646 = vmatpush1.msra.mxu0 %v7023_v4  ;;  %3717 = vmatpush1.msra.mxu1 %v7025_v7  ;;  %v8455_v4 = vld [vmem:[#allocation45_spill] sm:$0xff]  ;;  %v8456_v7 = vld [vmem:[#allocation46_spill] sm:$0xff] }
 0xdf0   :  { %3647 = vmatprep.subr.mxu0 %v7029_v24  ;;  %3718 = vmatprep.subr.mxu1 %v7031_v13  ;;  %v8457_v24 = vmov 0.0   ;;  %v8458_v13 = vld [vmem:[#allocation47_spill] sm:$0xff] }
 0xdf1   :  { %3648 = vmatpush1.msra.mxu0 %v7035_v32  ;;  %3719 = vmatpush1.msra.mxu1 %v7037_v26  ;;  %v7457_v32 = vld [vmem:[#allocation14 + $0x1e8] sm:$0xff]  ;;  %v7460_v26 = vld [vmem:[#allocation14 + $0x1f8] sm:$0xff] }
 0xdf2   :  { %3649 = vmatprep.subr.mxu0 %v7041_v63  ;;  %3720 = vmatprep.subr.mxu1 %v7043_v11  ;;  %8459 = vst [vmem:[#allocation48_spill] sm:$0xff] %v7457_v32  ;;  %8460 = vst [vmem:[#allocation49_spill] sm:$0xff] %v7460_v26 }
 0xdf3   :  { %3650 = vmatpush1.msra.mxu0 %v7047_v18  ;;  %3721 = vmatpush1.msra.mxu1 %v7049_v23 }
 0xdf4   :  { %3651 = vmatprep.subr.mxu0 %v7053_v12  ;;  %3722 = vmatprep.subr.mxu1 %v7055_v25 }
 0xdf5   :  { %3652 = vmatpush1.msra.mxu0 %v7059_v27  ;;  %3723 = vmatpush1.msra.mxu1 %v7061_v1 }
 0xdf6   :  { %3653 = vmatprep.subr.mxu0 %v7065_v34  ;;  %3724 = vmatprep.subr.mxu1 %v7067_v35 }
 0xdf7   :  { %3654 = vmatpush1.msra.mxu0 %v7071_v36  ;;  %3725 = vmatpush1.msra.mxu1 %v7073_v37  ;;  %v3430_v36 = vld [vmem:[#allocation3 + $0x3] ss:$8 sm:$0xf] }
 0xdf8   :  { %3655 = vmatprep.subr.mxu0 %v7077_v38  ;;  %3726 = vmatprep.subr.mxu1 %v7079_v39 }
 0xdf9   :  { %3656 = vmatpush1.msra.mxu0 %v7083_v40  ;;  %3727 = vmatpush1.msra.mxu1 %v7085_v41 }
 0xdfa   :  { %3657 = vmatprep.subr.mxu0 %v7089_v42  ;;  %3728 = vmatprep.subr.mxu1 %v7091_v43 }
 0xdfb   :  { %3658 = vmatpush1.msra.mxu0 %v7095_v44  ;;  %3729 = vmatpush1.msra.mxu1 %v7097_v45 }
 0xdfc   :  { %3659 = vmatprep.subr.mxu0 %v7101_v53  ;;  %3730 = vmatprep.subr.mxu1 %v8439_v59  ;;  %v7494_v59 = vld [vmem:[#allocation14 + $0x1a0] sm:$0xff] }
 0xdfd   :  { %3660 = vmatpush1.msra.mxu0 %v8440_v6  ;;  %3731 = vmatpush1.msra.mxu1 %v8441_v54  ;;  %v7497_v6 = vld [vmem:[#allocation14 + $0x1b0] sm:$0xff]  ;;  %v7500_v54 = vld [vmem:[#allocation14 + $0x188] sm:$0xff] }
 0xdfe   :  { %3661 = vmatprep.subr.mxu0 %v8442_v22  ;;  %3732 = vmatprep.subr.mxu1 %v8443_v16  ;;  %v7503_v22 = vld [vmem:[#allocation14 + $0x198] sm:$0xff]  ;;  %v7506_v16 = vld [vmem:[#allocation14 + $0x180] sm:$0xff] }
 0xdff   :  { %3662 = vmatpush1.msra.mxu0 %v8444_v14  ;;  %3733 = vmatpush1.msra.mxu1 %v8445_v10  ;;  %v7509_v14 = vld [vmem:[#allocation14 + $0x190] sm:$0xff]  ;;  %v7512_v10 = vld [vmem:[#allocation14 + $0x168] sm:$0xff] }
 0xe00   :  { %3663 = vmatprep.subr.mxu0 %v8446_v21  ;;  %3734 = vmatprep.subr.mxu1 %v8447_v9  ;;  %v7515_v21 = vld [vmem:[#allocation14 + $0x178] sm:$0xff]  ;;  %v7518_v9 = vld [vmem:[#allocation14 + $0x160] sm:$0xff] }
 0xe01   :  { %3664 = vmatpush1.msra.mxu0 %v8448_v17  ;;  %3735 = vmatpush1.msra.mxu1 %v8449_v19  ;;  %v7521_v17 = vld [vmem:[#allocation14 + $0x170] sm:$0xff]  ;;  %v7524_v19 = vld [vmem:[#allocation14 + $0x148] sm:$0xff] }
 0xe02   :  { %3665 = vmatprep.subr.mxu0 %v8450_v33  ;;  %3736 = vmatprep.subr.mxu1 %v8451_v20  ;;  %v7527_v33 = vld [vmem:[#allocation14 + $0x158] sm:$0xff]  ;;  %v7530_v20 = vld [vmem:[#allocation14 + $0x140] sm:$0xff] }
 0xe03   :  { %3666 = vmatpush1.msra.mxu0 %v8452_v8  ;;  %3737 = vmatpush1.msra.mxu1 %v8453_v15  ;;  %v7533_v8 = vld [vmem:[#allocation14 + $0x150] sm:$0xff]  ;;  %v7536_v15 = vld [vmem:[#allocation14 + $0x128] sm:$0xff] }
 0xe04   :  { %3667 = vmatprep.subr.mxu0 %v8454_v60  ;;  %3738 = vmatprep.subr.mxu1 %v8455_v4  ;;  %v7539_v60 = vld [vmem:[#allocation14 + $0x138] sm:$0xff]  ;;  %v7542_v4 = vld [vmem:[#allocation14 + $0x120] sm:$0xff] }
 0xe05   :  { %3668 = vmatpush1.msra.mxu0 %v8456_v7  ;;  %3701 = vmatprep.mubr.f32.mxu0 %v8457_v24  ;;  %v7545_v7 = vld [vmem:[#allocation14 + $0x130] sm:$0xff] }
 0xe06   :  { %3739 = vmatpush1.msra.mxu1 %v8458_v13  ;;  %3772 = vmatprep.mubr.f32.mxu1 %v8457_v24  ;;  %v7548_v13 = vld [vmem:[#allocation14 + $0x108] sm:$0xff] }
 0xe07   :  { %3843 = vmatprep.subr.mxu0 %v7457_v32  ;;  %3914 = vmatprep.subr.mxu1 %v7460_v26 }
 0xea6   :  { %v3497_v63 = vpop.f32.mrf.mxu0  ;;  %v3568_v11 = vpop.f32.mrf.mxu1 }
 0xea8   :  { %v3499_v18 = vpop.f32.mrf.mxu0  ;;  %v3570_v23 = vpop.f32.mrf.mxu1 }
 0xea9   :  { %v3577_v12 = vcombine.low %v3497_v63, %v3499_v18  ;;  %v3578_v25 = vcombine.low %v3568_v11, %v3570_v23  ;;  %v7551_v63 = vld [vmem:[#allocation14 + $0x118] sm:$0xff]  ;;  %v7554_v11 = vld [vmem:[#allocation14 + $0x100] sm:$0xff]  ;;  %v7557_v18 = vld [vmem:[#allocation14 + $0x110] sm:$0xff] }
 0xeaa   :  { %v7560_v23 = vld [vmem:[#allocation14 + $0xe8] sm:$0xff] }
 0xeab   :  { %v3585_v27 = vrot.slane %v3577_v12, %v6277_v47  ;;  %v3592_v1 = vrot.slane %v3578_v25, %v6277_v47  ;;  %v7563_v12 = vld [vmem:[#allocation14 + $0xf8] sm:$0xff]  ;;  %v7566_v25 = vld [vmem:[#allocation14 + $0xe0] sm:$0xff] }
 0xead   :  { %v3593_v34 = vcombine.low %v3585_v27, %v3592_v1  ;;  %v7569_v27 = vld [vmem:[#allocation14 + $0xf0] sm:$0xff]  ;;  %v7572_v1 = vld [vmem:[#allocation14 + $0xc8] sm:$0xff] }
 0xeaf   :  { %v3600_v35 = vrot.slane %v3593_v34, %v6277_v47  ;;  %v7575_v34 = vld [vmem:[#allocation14 + $0xd8] sm:$0xff] }
 0xeb1   :  { %v3602_v37 = vadd.f32 %v3600_v35, %v3430_v36  ;;  %v7578_v35 = vld [vmem:[#allocation14 + $0xc0] sm:$0xff]  ;;  %v7581_v36 = vld [vmem:[#allocation14 + $0xd0] sm:$0xff] }
 0xeb3   :  { %v5086_v38 = vmul.f32 -1.442695, %v3602_v37  ;;  %v3610_v39 = vrot.slane %v3602_v37, 1  ;;  %v3621_v41 = vrot.slane %v3602_v37, 3  ;;  %v3618_v44 = vrot.slane %v3602_v37, 2  ;;  %v7584_v37 = vld [vmem:[#allocation14 + $0xa8] sm:$0xff] }
 0xeb5   :  { %5385 = vpow2.f32 %v5086_v38  ;;  %v5087_v40 = vmul.f32 -1.442695, %v3610_v39  ;;  %v5088_v42 = vmul.f32 -1.442695, %v3621_v41  ;;  %v7587_v38 = vld [vmem:[#allocation14 + $0xb8] sm:$0xff]  ;;  %v7590_v39 = vld [vmem:[#allocation14 + $0xa0] sm:$0xff] }
 0xeb6   :  { %v7596_v41 = vld [vmem:[#allocation14 + $0x88] sm:$0xff] }
 0xeb7   :  { %5387 = vpow2.f32 %v5087_v40  ;;  %v7593_v40 = vld [vmem:[#allocation14 + $0xb0] sm:$0xff] }
 0xeb8   :  { %5389 = vpow2.f32 %v5088_v42  ;;  %v7599_v42 = vld [vmem:[#allocation14 + $0x98] sm:$0xff] }
 0xeb9   :  { %8461 = vst [vmem:[#allocation50_spill] sm:$0xff] %v7599_v42 }
 0xec2   :  { %v5386_v43 = vpop.eup %5385 }
 0xec3   :  { %v3606_v45 = vadd.f32 1.0, %v5386_v43  ;;  %v7602_v43 = vld [vmem:[#allocation14 + $0x80] sm:$0xff] }
 0xec4   :  { %v5388_v53 = vpop.eup %5387  ;;  %8462 = vst [vmem:[#allocation30_spill] sm:$0xff] %v7602_v43 }
 0xec5   :  { %5391 = vrcp.f32 %v3606_v45  ;;  %v3615_v57 = vadd.f32 1.0, %v5388_v53  ;;  %v5390_v5 = vpop.eup %5389  ;;  %v7608_v45 = vld [vmem:[#allocation14 + $0x68] sm:$0xff]  ;;  %v7611_v53 = vld [vmem:[#allocation14 + $0x78] sm:$0xff] }
 0xec6   :  { %5393 = vtanh.f32 %v3618_v44  ;;  %v3626_v3 = vadd.f32 1.0, %v5390_v5  ;;  %v7605_v44 = vld [vmem:[#allocation14 + $0x90] sm:$0xff]  ;;  %8464 = vst [vmem:[#allocation51_spill] sm:$0xff] %v7608_v45  ;;  %8465 = vst [vmem:[#allocation52_spill] sm:$0xff] %v7611_v53 }
 0xec7   :  { %5395 = vrcp.f32 %v3615_v57  ;;  %8463 = vst [vmem:[#allocation31_spill] sm:$0xff] %v7605_v44  ;;  %v7614_v57 = vld [vmem:[#allocation14 + $0x60] sm:$0xff]  ;;  %v7617_v5 = vld [vmem:[#allocation14 + $0x70] sm:$0xff] }
 0xec8   :  { %5397 = vrcp.f32 %v3626_v3  ;;  %8466 = vst [vmem:[#allocation27_spill] sm:$0xff] %v7614_v57  ;;  %8467 = vst [vmem:[#allocation28_spill] sm:$0xff] %v7617_v5  ;;  %v7629_v3 = vld [vmem:[#allocation14 + $0x50] sm:$0xff] }
 0xec9   :  { %8471 = vst [vmem:[#allocation34_spill] sm:$0xff] %v7629_v3 }
 0xed2   :  { %v5392_v55 = vpop.eup %5391 }
 0xed3   :  { %v5394_v48 = vpop.eup %5393 }
 0xed4   :  { %v5396_v49 = vpop.eup %5395  ;;  %v3630_v62 = vmul.f32 %v5394_v48, %v5392_v55  ;;  %v7620_v55 = vld [vmem:[#allocation14 + $0x48] sm:$0xff]  ;;  %v7623_v48 = vld [vmem:[#allocation14 + $0x58] sm:$0xff] }
 0xed5   :  { %v3629_v51 = vmul.f32 %v5396_v49, %v7390_v50  ;;  %v5398_v0 = vpop.eup %5397  ;;  %v7482_v50 = vld [vmem:[#allocation14 + $0x1c0] sm:$0xff]  ;;  %8468 = vst [vmem:[#allocation29_spill] sm:$0xff] %v7620_v55  ;;  %8469 = vst [vmem:[#allocation32_spill] sm:$0xff] %v7623_v48 }
 0xed6   :  { %v7626_v49 = vld [vmem:[#allocation14 + $0x40] sm:$0xff] }
 0xed7   :  { %v7467_v29 = vadd.f32 %v3630_v62, %v3629_v51  ;;  %8470 = vst [vmem:[#allocation33_spill] sm:$0xff] %v7626_v49  ;;  %v7632_v51 = vld [vmem:[#allocation14 + $0x28] sm:$0xff]  ;;  %v7635_v62 = vld [vmem:[#allocation14 + $0x38] sm:$0xff] }
 0xed8   :  { %8472 = vst [vmem:[#allocation35_spill] sm:$0xff] %v7632_v51  ;;  %8473 = vst [vmem:[#allocation36_spill] sm:$0xff] %v7635_v62 }
 0xed9   :  { %5399 = vtanh.f32 %v7467_v29 }
 0xee6   :  { %v5400_v52 = vpop.eup %5399 }
 0xee7   :  { %v3633_v2 = vmul.f32 %v5400_v52, %v5398_v0  ;;  %v7638_v0 = vld [vmem:[#allocation14 + $0x20] sm:$0xff]  ;;  %v7641_v52 = vld [vmem:[#allocation14 + $0x30] sm:$0xff] }
 0xee8   :  { %8474 = vst [vmem:[#allocation37_spill] sm:$0xff] %v7638_v0  ;;  %8475 = vst [vmem:[#allocation38_spill] sm:$0xff] %v7641_v52 }
 0xee9   :  { %3634 = vst [vmem:[#allocation4 + $0x3] sm:$0x1] %v3633_v2  ;;  %3702 = vmatmul.mubr.f32.vlgmr.msra.gmra.mxu0 %v3633_v2  ;;  %3773 = vmatmul.mubr.f32.vlgmr.msra.gmra.mxu1 %v3633_v2  ;;  %v7644_v2 = vld [vmem:[#allocation14 + $0x8] sm:$0xff] }
 0xeea   :  { %3844 = vmatpush1.msra.mxu0 %v7470_v61  ;;  %3915 = vmatpush1.msra.mxu1 %v7473_v58  ;;  %8476 = vst [vmem:[#allocation39_spill] sm:$0xff] %v7644_v2 }
 0xeeb   :  { %3845 = vmatprep.subr.mxu0 %v7476_v31  ;;  %3916 = vmatprep.subr.mxu1 %v7479_v56 }
 0xeec   :  { %3846 = vmatpush1.msra.mxu0 %v7482_v50  ;;  %3917 = vmatpush1.msra.mxu1 %v7485_v30 }
 0xeed   :  { %3847 = vmatprep.subr.mxu0 %v7488_v28  ;;  %3918 = vmatprep.subr.mxu1 %v7491_v46 }
 0xeee   :  { %3848 = vmatpush1.msra.mxu0 %v7494_v59  ;;  %3919 = vmatpush1.msra.mxu1 %v7497_v6 }
 0xeef   :  { %3849 = vmatprep.subr.mxu0 %v7500_v54  ;;  %3920 = vmatprep.subr.mxu1 %v7503_v22 }
 0xef0   :  { %3850 = vmatpush1.msra.mxu0 %v7506_v16  ;;  %3921 = vmatpush1.msra.mxu1 %v7509_v14 }
 0xef1   :  { %3851 = vmatprep.subr.mxu0 %v7512_v10  ;;  %3922 = vmatprep.subr.mxu1 %v7515_v21 }
 0xef2   :  { %3852 = vmatpush1.msra.mxu0 %v7518_v9  ;;  %3923 = vmatpush1.msra.mxu1 %v7521_v17 }
 0xef3   :  { %3853 = vmatprep.subr.mxu0 %v7524_v19  ;;  %3924 = vmatprep.subr.mxu1 %v7527_v33 }
 0xef4   :  { %3854 = vmatpush1.msra.mxu0 %v7530_v20  ;;  %3925 = vmatpush1.msra.mxu1 %v7533_v8 }
 0xef5   :  { %3855 = vmatprep.subr.mxu0 %v7536_v15  ;;  %3926 = vmatprep.subr.mxu1 %v7539_v60 }
 0xef6   :  { %3856 = vmatpush1.msra.mxu0 %v7542_v4  ;;  %3927 = vmatpush1.msra.mxu1 %v7545_v7 }
 0xef7   :  { %3857 = vmatprep.subr.mxu0 %v7548_v13  ;;  %3928 = vmatprep.subr.mxu1 %v7551_v63 }
 0xef8   :  { %3858 = vmatpush1.msra.mxu0 %v7554_v11  ;;  %3929 = vmatpush1.msra.mxu1 %v7557_v18 }
 0xef9   :  { %3859 = vmatprep.subr.mxu0 %v7560_v23  ;;  %3930 = vmatprep.subr.mxu1 %v7563_v12 }
 0xefa   :  { %3860 = vmatpush1.msra.mxu0 %v7566_v25  ;;  %3931 = vmatpush1.msra.mxu1 %v7569_v27 }
 0xefb   :  { %3861 = vmatprep.subr.mxu0 %v7572_v1  ;;  %3932 = vmatprep.subr.mxu1 %v7575_v34 }
 0xefc   :  { %3862 = vmatpush1.msra.mxu0 %v7578_v35  ;;  %3933 = vmatpush1.msra.mxu1 %v7581_v36 }
 0xefd   :  { %3863 = vmatprep.subr.mxu0 %v7584_v37  ;;  %3934 = vmatprep.subr.mxu1 %v7587_v38 }
 0xefe   :  { %3864 = vmatpush1.msra.mxu0 %v7590_v39  ;;  %3935 = vmatpush1.msra.mxu1 %v7593_v40 }
 0xeff   :  { %3865 = vmatprep.subr.mxu0 %v7596_v41  ;;  %3936 = vmatprep.subr.mxu1 %v7599_v42 }
 0xf00   :  { %3866 = vmatpush1.msra.mxu0 %v7602_v43  ;;  %3937 = vmatpush1.msra.mxu1 %v7605_v44 }
 0xf01   :  { %3867 = vmatprep.subr.mxu0 %v7608_v45  ;;  %3938 = vmatprep.subr.mxu1 %v7611_v53 }
 0xf02   :  { %3868 = vmatpush1.msra.mxu0 %v7614_v57  ;;  %3939 = vmatpush1.msra.mxu1 %v7617_v5 }
 0xf03   :  { %3869 = vmatprep.subr.mxu0 %v7620_v55  ;;  %3940 = vmatprep.subr.mxu1 %v7623_v48 }
 0xf04   :  { %3870 = vmatpush1.msra.mxu0 %v7626_v49  ;;  %3941 = vmatpush1.msra.mxu1 %v7629_v3  ;;  %v7647_v3 = vld [vmem:[#allocation14 + $0x18] sm:$0xff] }
 0xf05   :  { %3871 = vmatprep.subr.mxu0 %v7632_v51  ;;  %3942 = vmatprep.subr.mxu1 %v7635_v62  ;;  %8477 = vst [vmem:[#allocation40_spill] sm:$0xff] %v7647_v3  ;;  %v7650_v51 = vld [vmem:[#allocation14] sm:$0xff]  ;;  %v7654_v62 = vld [vmem:[#allocation14 + $0x10] sm:$0xff] }
 0xf06   :  { %3872 = vmatpush1.msra.mxu0 %v7638_v0  ;;  %3943 = vmatpush1.msra.mxu1 %v7641_v52  ;;  %8478 = vst [vmem:[#allocation41_spill] sm:$0xff] %v7650_v51  ;;  %8479 = vst [vmem:[#allocation42_spill] sm:$0xff] %v7654_v62 }
 0xf07   :  { %3873 = vmatprep.subr.mxu0 %v7644_v2  ;;  %3944 = vmatprep.subr.mxu1 %v7647_v3 }
 0xf08   :  { %3874 = vmatpush1.msra.mxu0 %v7650_v51  ;;  %3907 = vmatprep.mubr.f32.mxu0 %v8457_v24 }
 0xf09   :  { %3945 = vmatpush1.msra.mxu1 %v7654_v62  ;;  %3978 = vmatprep.mubr.f32.mxu1 %v8457_v24  ;;  %v3636_v62 = vld [vmem:[#allocation3 + $0x4] ss:$8 sm:$0xf] }
 0xf0a   :  { %4049 = vmatprep.subr.mxu0 %v7457_v32  ;;  %4120 = vmatprep.subr.mxu1 %v7460_v26 }
 0xfa9   :  { %v3703_v2 = vpop.f32.mrf.mxu0  ;;  %v3774_v52 = vpop.f32.mrf.mxu1 }
 0xfab   :  { %v3705_v0 = vpop.f32.mrf.mxu0  ;;  %v3776_v3 = vpop.f32.mrf.mxu1 }
 0xfac   :  { %v3783_v49 = vcombine.low %v3703_v2, %v3705_v0  ;;  %v3784_v48 = vcombine.low %v3774_v52, %v3776_v3  ;;  %v8484_v52 = vld [vmem:[#allocation52_spill] sm:$0xff]  ;;  %v8485_v2 = vld [vmem:[#allocation27_spill] sm:$0xff] }
 0xfae   :  { %v3791_v51 = vrot.slane %v3783_v49, %v6277_v47  ;;  %v3798_v55 = vrot.slane %v3784_v48, %v6277_v47 }
 0xfb0   :  { %v3799_v5 = vcombine.low %v3791_v51, %v3798_v55 }
 0xfb2   :  { %v3806_v57 = vrot.slane %v3799_v5, %v6277_v47 }
 0xfb4   :  { %v3808_v53 = vadd.f32 %v3806_v57, %v3636_v62  ;;  %v8483_v62 = vld [vmem:[#allocation51_spill] sm:$0xff] }
 0xfb6   :  { %v5089_v24 = vmul.f32 -1.442695, %v3808_v53  ;;  %v3816_v45 = vrot.slane %v3808_v53, 1  ;;  %v3827_v26 = vrot.slane %v3808_v53, 3  ;;  %v3824_v42 = vrot.slane %v3808_v53, 2  ;;  %v8482_v53 = vld [vmem:[#allocation31_spill] sm:$0xff] }
 0xfb8   :  { %5401 = vpow2.f32 %v5089_v24  ;;  %v5090_v32 = vmul.f32 -1.442695, %v3816_v45  ;;  %v5091_v44 = vmul.f32 -1.442695, %v3827_v26 }
 0xfba   :  { %5403 = vpow2.f32 %v5090_v32 }
 0xfbb   :  { %5405 = vpow2.f32 %v5091_v44 }
 0xfc5   :  { %v5402_v43 = vpop.eup %5401 }
 0xfc6   :  { %v3812_v0 = vadd.f32 1.0, %v5402_v43 }
 0xfc7   :  { %v5404_v3 = vpop.eup %5403 }
 0xfc8   :  { %5407 = vrcp.f32 %v3812_v0  ;;  %v3821_v49 = vadd.f32 1.0, %v5404_v3  ;;  %v5406_v55 = vpop.eup %5405  ;;  %v8486_v0 = vld [vmem:[#allocation28_spill] sm:$0xff]  ;;  %v8487_v3 = vld [vmem:[#allocation29_spill] sm:$0xff] }
 0xfc9   :  { %5409 = vtanh.f32 %v3824_v42  ;;  %v3832_v51 = vadd.f32 1.0, %v5406_v55  ;;  %v8481_v42 = vld [vmem:[#allocation30_spill] sm:$0xff]  ;;  %v8489_v55 = vld [vmem:[#allocation33_spill] sm:$0xff] }
 0xfca   :  { %5411 = vrcp.f32 %v3821_v49  ;;  %v8488_v49 = vld [vmem:[#allocation32_spill] sm:$0xff] }
 0xfcb   :  { %5413 = vrcp.f32 %v3832_v51  ;;  %v8493_v51 = vld [vmem:[#allocation37_spill] sm:$0xff] }
 0xfd5   :  { %v5408_v5 = vpop.eup %5407 }
 0xfd6   :  { %v5410_v48 = vpop.eup %5409 }
 0xfd7   :  { %v5412_v57 = vpop.eup %5411  ;;  %v3836_v45 = vmul.f32 %v5410_v48, %v5408_v5  ;;  %v8490_v5 = vld [vmem:[#allocation34_spill] sm:$0xff]  ;;  %v8491_v48 = vld [vmem:[#allocation35_spill] sm:$0xff] }
 0xfd8   :  { %v3835_v24 = vmul.f32 %v5412_v57, %v7467_v29  ;;  %v5414_v26 = vpop.eup %5413  ;;  %v8480_v29 = vld [vmem:[#allocation50_spill] sm:$0xff]  ;;  %v8492_v57 = vld [vmem:[#allocation36_spill] sm:$0xff] }
 0xfda   :  { %v7664_v32 = vadd.f32 %v3836_v45, %v3835_v24  ;;  %v8494_v24 = vld [vmem:[#allocation38_spill] sm:$0xff]  ;;  %v8495_v45 = vld [vmem:[#allocation39_spill] sm:$0xff] }
 0xfdc   :  { %5415 = vtanh.f32 %v7664_v32 }
 0xfe9   :  { %v5416_v43 = vpop.eup %5415 }
 0xfea   :  { %v3839_v44 = vmul.f32 %v5416_v43, %v5414_v26  ;;  %v8496_v26 = vld [vmem:[#allocation40_spill] sm:$0xff]  ;;  %v8497_v43 = vld [vmem:[#allocation41_spill] sm:$0xff] }
 0xfec   :  { %3840 = vst [vmem:[#allocation4 + $0x4] sm:$0x1] %v3839_v44  ;;  %3908 = vmatmul.mubr.f32.vlgmr.msra.gmra.mxu0 %v3839_v44  ;;  %3979 = vmatmul.mubr.f32.vlgmr.msra.gmra.mxu1 %v3839_v44  ;;  %v8498_v44 = vmov 0.0  }
 0xfed   :  { %4050 = vmatpush1.msra.mxu0 %v7470_v61  ;;  %4121 = vmatpush1.msra.mxu1 %v7473_v58 }
 0xfee   :  { %4051 = vmatprep.subr.mxu0 %v7476_v31  ;;  %4122 = vmatprep.subr.mxu1 %v7479_v56 }
 0xfef   :  { %4052 = vmatpush1.msra.mxu0 %v7482_v50  ;;  %4123 = vmatpush1.msra.mxu1 %v7485_v30 }
 0xff0   :  { %4053 = vmatprep.subr.mxu0 %v7488_v28  ;;  %4124 = vmatprep.subr.mxu1 %v7491_v46 }
 0xff1   :  { %4054 = vmatpush1.msra.mxu0 %v7494_v59  ;;  %4125 = vmatpush1.msra.mxu1 %v7497_v6 }
 0xff2   :  { %4055 = vmatprep.subr.mxu0 %v7500_v54  ;;  %4126 = vmatprep.subr.mxu1 %v7503_v22 }
 0xff3   :  { %4056 = vmatpush1.msra.mxu0 %v7506_v16  ;;  %4127 = vmatpush1.msra.mxu1 %v7509_v14 }
 0xff4   :  { %4057 = vmatprep.subr.mxu0 %v7512_v10  ;;  %4128 = vmatprep.subr.mxu1 %v7515_v21 }
 0xff5   :  { %4058 = vmatpush1.msra.mxu0 %v7518_v9  ;;  %4129 = vmatpush1.msra.mxu1 %v7521_v17 }
 0xff6   :  { %4059 = vmatprep.subr.mxu0 %v7524_v19  ;;  %4130 = vmatprep.subr.mxu1 %v7527_v33 }
 0xff7   :  { %4060 = vmatpush1.msra.mxu0 %v7530_v20  ;;  %4131 = vmatpush1.msra.mxu1 %v7533_v8 }
 0xff8   :  { %4061 = vmatprep.subr.mxu0 %v7536_v15  ;;  %4132 = vmatprep.subr.mxu1 %v7539_v60 }
 0xff9   :  { %4062 = vmatpush1.msra.mxu0 %v7542_v4  ;;  %4133 = vmatpush1.msra.mxu1 %v7545_v7 }
 0xffa   :  { %4063 = vmatprep.subr.mxu0 %v7548_v13  ;;  %4134 = vmatprep.subr.mxu1 %v7551_v63 }
 0xffb   :  { %4064 = vmatpush1.msra.mxu0 %v7554_v11  ;;  %4135 = vmatpush1.msra.mxu1 %v7557_v18 }
 0xffc   :  { %4065 = vmatprep.subr.mxu0 %v7560_v23  ;;  %4136 = vmatprep.subr.mxu1 %v7563_v12 }
 0xffd   :  { %4066 = vmatpush1.msra.mxu0 %v7566_v25  ;;  %4137 = vmatpush1.msra.mxu1 %v7569_v27 }
 0xffe   :  { %4067 = vmatprep.subr.mxu0 %v7572_v1  ;;  %4138 = vmatprep.subr.mxu1 %v7575_v34 }
 0xfff   :  { %4068 = vmatpush1.msra.mxu0 %v7578_v35  ;;  %4139 = vmatpush1.msra.mxu1 %v7581_v36 }
0x1000   :  { %4069 = vmatprep.subr.mxu0 %v7584_v37  ;;  %4140 = vmatprep.subr.mxu1 %v7587_v38 }
0x1001   :  { %4070 = vmatpush1.msra.mxu0 %v7590_v39  ;;  %4141 = vmatpush1.msra.mxu1 %v7593_v40 }
0x1002   :  { %4071 = vmatprep.subr.mxu0 %v7596_v41  ;;  %4142 = vmatprep.subr.mxu1 %v8480_v29 }
0x1003   :  { %4072 = vmatpush1.msra.mxu0 %v8481_v42  ;;  %4143 = vmatpush1.msra.mxu1 %v8482_v53 }
0x1004   :  { %4073 = vmatprep.subr.mxu0 %v8483_v62  ;;  %4144 = vmatprep.subr.mxu1 %v8484_v52 }
0x1005   :  { %4074 = vmatpush1.msra.mxu0 %v8485_v2  ;;  %4145 = vmatpush1.msra.mxu1 %v8486_v0 }
0x1006   :  { %4075 = vmatprep.subr.mxu0 %v8487_v3  ;;  %4146 = vmatprep.subr.mxu1 %v8488_v49  ;;  %v8499_v49 = vld [vmem:[#allocation42_spill] sm:$0xff] }
0x1007   :  { %4076 = vmatpush1.msra.mxu0 %v8489_v55  ;;  %4147 = vmatpush1.msra.mxu1 %v8490_v5  ;;  %v8500_v5 = vld [vmem:[#allocation48_spill] sm:$0xff] }
0x1008   :  { %4077 = vmatprep.subr.mxu0 %v8491_v48  ;;  %4148 = vmatprep.subr.mxu1 %v8492_v57  ;;  %v8501_v48 = vld [vmem:[#allocation49_spill] sm:$0xff] }
0x1009   :  { %4078 = vmatpush1.msra.mxu0 %v8493_v51  ;;  %4149 = vmatpush1.msra.mxu1 %v8494_v24 }
0x100a   :  { %4079 = vmatprep.subr.mxu0 %v8495_v45  ;;  %4150 = vmatprep.subr.mxu1 %v8496_v26 }
0x100b   :  { %4080 = vmatpush1.msra.mxu0 %v8497_v43  ;;  %4113 = vmatprep.mubr.f32.mxu0 %v8498_v44 }
0x100c   :  { %4151 = vmatpush1.msra.mxu1 %v8499_v49  ;;  %4184 = vmatprep.mubr.f32.mxu1 %v8498_v44  ;;  %v3842_v49 = vld [vmem:[#allocation3 + $0x5] ss:$8 sm:$0xf] }
0x100d   :  { %4255 = vmatprep.subr.mxu0 %v8500_v5  ;;  %4326 = vmatprep.subr.mxu1 %v8501_v48 }
0x10ac   :  { %v3909_v57 = vpop.f32.mrf.mxu0  ;;  %v3980_v51 = vpop.f32.mrf.mxu1 }
0x10ae   :  { %v3911_v55 = vpop.f32.mrf.mxu0  ;;  %v3982_v24 = vpop.f32.mrf.mxu1 }
0x10af   :  { %v3989_v3 = vcombine.low %v3909_v57, %v3911_v55  ;;  %v3990_v45 = vcombine.low %v3980_v51, %v3982_v24 }
0x10b1   :  { %v3997_v26 = vrot.slane %v3989_v3, %v6277_v47  ;;  %v4004_v43 = vrot.slane %v3990_v45, %v6277_v47 }
0x10b3   :  { %v4005_v0 = vcombine.low %v3997_v26, %v4004_v43  ;;  %v8505_v26 = vld [vmem:[#allocation51_spill] sm:$0xff]  ;;  %v8506_v43 = vld [vmem:[#allocation52_spill] sm:$0xff] }
0x10b5   :  { %v4012_v2 = vrot.slane %v4005_v0, %v6277_v47 }
0x10b7   :  { %v4014_v52 = vadd.f32 %v4012_v2, %v3842_v49 }
0x10b9   :  { %v5092_v44 = vmul.f32 -1.442695, %v4014_v52  ;;  %v4022_v62 = vrot.slane %v4014_v52, 1  ;;  %v4033_v48 = vrot.slane %v4014_v52, 3  ;;  %v4030_v29 = vrot.slane %v4014_v52, 2 }
0x10bb   :  { %5417 = vpow2.f32 %v5092_v44  ;;  %v5093_v5 = vmul.f32 -1.442695, %v4022_v62  ;;  %v5094_v53 = vmul.f32 -1.442695, %v4033_v48  ;;  %v8504_v48 = vld [vmem:[#allocation31_spill] sm:$0xff] }
0x10bc   :  { %v8507_v44 = vld [vmem:[#allocation27_spill] sm:$0xff] }
0x10bd   :  { %5419 = vpow2.f32 %v5093_v5 }
0x10be   :  { %5421 = vpow2.f32 %v5094_v53 }
0x10c8   :  { %v5418_v42 = vpop.eup %5417 }
0x10c9   :  { %v4018_v55 = vadd.f32 1.0, %v5418_v42 }
0x10ca   :  { %v5420_v57 = vpop.eup %5419 }
0x10cb   :  { %5423 = vrcp.f32 %v4018_v55  ;;  %v4027_v3 = vadd.f32 1.0, %v5420_v57  ;;  %v5422_v51 = vpop.eup %5421  ;;  %v8508_v55 = vld [vmem:[#allocation28_spill] sm:$0xff]  ;;  %v8509_v57 = vld [vmem:[#allocation29_spill] sm:$0xff] }
0x10cc   :  { %5425 = vtanh.f32 %v4030_v29  ;;  %v4038_v49 = vadd.f32 1.0, %v5422_v51  ;;  %v8503_v29 = vld [vmem:[#allocation30_spill] sm:$0xff]  ;;  %v8511_v51 = vld [vmem:[#allocation33_spill] sm:$0xff] }
0x10cd   :  { %5427 = vrcp.f32 %v4027_v3  ;;  %v8510_v3 = vld [vmem:[#allocation32_spill] sm:$0xff] }
0x10ce   :  { %5429 = vrcp.f32 %v4038_v49  ;;  %v8515_v49 = vld [vmem:[#allocation37_spill] sm:$0xff] }
0x10d8   :  { %v5424_v0 = vpop.eup %5423 }
0x10d9   :  { %v5426_v24 = vpop.eup %5425 }
0x10da   :  { %v5428_v2 = vpop.eup %5427  ;;  %v4042_v62 = vmul.f32 %v5426_v24, %v5424_v0  ;;  %v8512_v0 = vld [vmem:[#allocation34_spill] sm:$0xff]  ;;  %v8513_v24 = vld [vmem:[#allocation35_spill] sm:$0xff] }
0x10db   :  { %v4041_v45 = vmul.f32 %v5428_v2, %v7664_v32  ;;  %v5430_v42 = vpop.eup %5429  ;;  %v8502_v32 = vld [vmem:[#allocation50_spill] sm:$0xff]  ;;  %v8514_v2 = vld [vmem:[#allocation36_spill] sm:$0xff] }
0x10dd   :  { %v7737_v5 = vadd.f32 %v4042_v62, %v4041_v45  ;;  %v8516_v45 = vld [vmem:[#allocation38_spill] sm:$0xff]  ;;  %v8517_v62 = vld [vmem:[#allocation39_spill] sm:$0xff] }
0x10df   :  { %5431 = vtanh.f32 %v7737_v5 }
0x10ec   :  { %v5432_v52 = vpop.eup %5431 }
0x10ed   :  { %v4045_v53 = vmul.f32 %v5432_v52, %v5430_v42  ;;  %v8518_v42 = vld [vmem:[#allocation40_spill] sm:$0xff]  ;;  %v8519_v52 = vld [vmem:[#allocation41_spill] sm:$0xff] }
0x10ef   :  { %4046 = vst [vmem:[#allocation4 + $0x5] sm:$0x1] %v4045_v53  ;;  %4114 = vmatmul.mubr.f32.vlgmr.msra.gmra.mxu0 %v4045_v53  ;;  %4185 = vmatmul.mubr.f32.vlgmr.msra.gmra.mxu1 %v4045_v53  ;;  %v8520_v53 = vmov 0.0  }
0x10f0   :  { %4256 = vmatpush1.msra.mxu0 %v7470_v61  ;;  %4327 = vmatpush1.msra.mxu1 %v7473_v58 }
0x10f1   :  { %4257 = vmatprep.subr.mxu0 %v7476_v31  ;;  %4328 = vmatprep.subr.mxu1 %v7479_v56 }
0x10f2   :  { %4258 = vmatpush1.msra.mxu0 %v7482_v50  ;;  %4329 = vmatpush1.msra.mxu1 %v7485_v30 }
0x10f3   :  { %4259 = vmatprep.subr.mxu0 %v7488_v28  ;;  %4330 = vmatprep.subr.mxu1 %v7491_v46 }
0x10f4   :  { %4260 = vmatpush1.msra.mxu0 %v7494_v59  ;;  %4331 = vmatpush1.msra.mxu1 %v7497_v6 }
0x10f5   :  { %4261 = vmatprep.subr.mxu0 %v7500_v54  ;;  %4332 = vmatprep.subr.mxu1 %v7503_v22 }
0x10f6   :  { %4262 = vmatpush1.msra.mxu0 %v7506_v16  ;;  %4333 = vmatpush1.msra.mxu1 %v7509_v14 }
0x10f7   :  { %4263 = vmatprep.subr.mxu0 %v7512_v10  ;;  %4334 = vmatprep.subr.mxu1 %v7515_v21 }
0x10f8   :  { %4264 = vmatpush1.msra.mxu0 %v7518_v9  ;;  %4335 = vmatpush1.msra.mxu1 %v7521_v17 }
0x10f9   :  { %4265 = vmatprep.subr.mxu0 %v7524_v19  ;;  %4336 = vmatprep.subr.mxu1 %v7527_v33 }
0x10fa   :  { %4266 = vmatpush1.msra.mxu0 %v7530_v20  ;;  %4337 = vmatpush1.msra.mxu1 %v7533_v8 }
0x10fb   :  { %4267 = vmatprep.subr.mxu0 %v7536_v15  ;;  %4338 = vmatprep.subr.mxu1 %v7539_v60 }
0x10fc   :  { %4268 = vmatpush1.msra.mxu0 %v7542_v4  ;;  %4339 = vmatpush1.msra.mxu1 %v7545_v7 }
0x10fd   :  { %4269 = vmatprep.subr.mxu0 %v7548_v13  ;;  %4340 = vmatprep.subr.mxu1 %v7551_v63 }
0x10fe   :  { %4270 = vmatpush1.msra.mxu0 %v7554_v11  ;;  %4341 = vmatpush1.msra.mxu1 %v7557_v18 }
0x10ff   :  { %4271 = vmatprep.subr.mxu0 %v7560_v23  ;;  %4342 = vmatprep.subr.mxu1 %v7563_v12 }
0x1100   :  { %4272 = vmatpush1.msra.mxu0 %v7566_v25  ;;  %4343 = vmatpush1.msra.mxu1 %v7569_v27 }
0x1101   :  { %4273 = vmatprep.subr.mxu0 %v7572_v1  ;;  %4344 = vmatprep.subr.mxu1 %v7575_v34 }
0x1102   :  { %4274 = vmatpush1.msra.mxu0 %v7578_v35  ;;  %4345 = vmatpush1.msra.mxu1 %v7581_v36 }
0x1103   :  { %4275 = vmatprep.subr.mxu0 %v7584_v37  ;;  %4346 = vmatprep.subr.mxu1 %v7587_v38 }
0x1104   :  { %4276 = vmatpush1.msra.mxu0 %v7590_v39  ;;  %4347 = vmatpush1.msra.mxu1 %v7593_v40 }
0x1105   :  { %4277 = vmatprep.subr.mxu0 %v7596_v41  ;;  %4348 = vmatprep.subr.mxu1 %v8502_v32 }
0x1106   :  { %4278 = vmatpush1.msra.mxu0 %v8503_v29  ;;  %4349 = vmatpush1.msra.mxu1 %v8504_v48 }
0x1107   :  { %4279 = vmatprep.subr.mxu0 %v8505_v26  ;;  %4350 = vmatprep.subr.mxu1 %v8506_v43 }
0x1108   :  { %4280 = vmatpush1.msra.mxu0 %v8507_v44  ;;  %4351 = vmatpush1.msra.mxu1 %v8508_v55 }
0x1109   :  { %4281 = vmatprep.subr.mxu0 %v8509_v57  ;;  %4352 = vmatprep.subr.mxu1 %v8510_v3  ;;  %v8521_v3 = vld [vmem:[#allocation42_spill] sm:$0xff] }
0x110a   :  { %4282 = vmatpush1.msra.mxu0 %v8511_v51  ;;  %4353 = vmatpush1.msra.mxu1 %v8512_v0  ;;  %v8522_v0 = vld [vmem:[#allocation48_spill] sm:$0xff] }
0x110b   :  { %4283 = vmatprep.subr.mxu0 %v8513_v24  ;;  %4354 = vmatprep.subr.mxu1 %v8514_v2  ;;  %v8523_v24 = vld [vmem:[#allocation49_spill] sm:$0xff] }
0x110c   :  { %4284 = vmatpush1.msra.mxu0 %v8515_v49  ;;  %4355 = vmatpush1.msra.mxu1 %v8516_v45 }
0x110d   :  { %4285 = vmatprep.subr.mxu0 %v8517_v62  ;;  %4356 = vmatprep.subr.mxu1 %v8518_v42 }
0x110e   :  { %4286 = vmatpush1.msra.mxu0 %v8519_v52  ;;  %4319 = vmatprep.mubr.f32.mxu0 %v8520_v53 }
0x110f   :  { %4357 = vmatpush1.msra.mxu1 %v8521_v3  ;;  %4390 = vmatprep.mubr.f32.mxu1 %v8520_v53  ;;  %v4048_v3 = vld [vmem:[#allocation3 + $0x6] ss:$8 sm:$0xf] }
0x1110   :  { %4461 = vmatprep.subr.mxu0 %v8522_v0  ;;  %4532 = vmatprep.subr.mxu1 %v8523_v24 }
0x11af   :  { %v4115_v2 = vpop.f32.mrf.mxu0  ;;  %v4186_v49 = vpop.f32.mrf.mxu1 }
0x11b1   :  { %v4117_v51 = vpop.f32.mrf.mxu0  ;;  %v4188_v45 = vpop.f32.mrf.mxu1 }
0x11b2   :  { %v4195_v57 = vcombine.low %v4115_v2, %v4117_v51  ;;  %v4196_v62 = vcombine.low %v4186_v49, %v4188_v45 }
0x11b4   :  { %v4203_v42 = vrot.slane %v4195_v57, %v6277_v47  ;;  %v4210_v52 = vrot.slane %v4196_v62, %v6277_v47 }
0x11b6   :  { %v4211_v55 = vcombine.low %v4203_v42, %v4210_v52  ;;  %v8527_v42 = vld [vmem:[#allocation51_spill] sm:$0xff]  ;;  %v8528_v52 = vld [vmem:[#allocation52_spill] sm:$0xff] }
0x11b8   :  { %v4218_v44 = vrot.slane %v4211_v55, %v6277_v47 }
0x11ba   :  { %v4220_v43 = vadd.f32 %v4218_v44, %v4048_v3 }
0x11bc   :  { %v5095_v53 = vmul.f32 -1.442695, %v4220_v43  ;;  %v4228_v26 = vrot.slane %v4220_v43, 1  ;;  %v4239_v24 = vrot.slane %v4220_v43, 3  ;;  %v4236_v32 = vrot.slane %v4220_v43, 2 }
0x11be   :  { %5433 = vpow2.f32 %v5095_v53  ;;  %v5096_v0 = vmul.f32 -1.442695, %v4228_v26  ;;  %v5097_v48 = vmul.f32 -1.442695, %v4239_v24  ;;  %v8526_v24 = vld [vmem:[#allocation31_spill] sm:$0xff] }
0x11bf   :  { %v8529_v53 = vld [vmem:[#allocation27_spill] sm:$0xff] }
0x11c0   :  { %5435 = vpow2.f32 %v5096_v0 }
0x11c1   :  { %5437 = vpow2.f32 %v5097_v48 }
0x11cb   :  { %v5434_v29 = vpop.eup %5433 }
0x11cc   :  { %v4224_v51 = vadd.f32 1.0, %v5434_v29 }
0x11cd   :  { %v5436_v2 = vpop.eup %5435 }
0x11ce   :  { %5439 = vrcp.f32 %v4224_v51  ;;  %v4233_v57 = vadd.f32 1.0, %v5436_v2  ;;  %v5438_v49 = vpop.eup %5437  ;;  %v8530_v51 = vld [vmem:[#allocation28_spill] sm:$0xff]  ;;  %v8531_v2 = vld [vmem:[#allocation29_spill] sm:$0xff] }
0x11cf   :  { %5441 = vtanh.f32 %v4236_v32  ;;  %v4244_v3 = vadd.f32 1.0, %v5438_v49  ;;  %v8525_v32 = vld [vmem:[#allocation30_spill] sm:$0xff]  ;;  %v8533_v49 = vld [vmem:[#allocation33_spill] sm:$0xff] }
0x11d0   :  { %5443 = vrcp.f32 %v4233_v57  ;;  %v8532_v57 = vld [vmem:[#allocation32_spill] sm:$0xff] }
0x11d1   :  { %5445 = vrcp.f32 %v4244_v3  ;;  %v8537_v3 = vld [vmem:[#allocation37_spill] sm:$0xff] }
0x11db   :  { %v5440_v55 = vpop.eup %5439 }
0x11dc   :  { %v5442_v45 = vpop.eup %5441 }
0x11dd   :  { %v5444_v44 = vpop.eup %5443  ;;  %v4248_v26 = vmul.f32 %v5442_v45, %v5440_v55  ;;  %v8534_v55 = vld [vmem:[#allocation34_spill] sm:$0xff]  ;;  %v8535_v45 = vld [vmem:[#allocation35_spill] sm:$0xff] }
0x11de   :  { %v4247_v62 = vmul.f32 %v5444_v44, %v7737_v5  ;;  %v5446_v29 = vpop.eup %5445  ;;  %v8524_v5 = vld [vmem:[#allocation50_spill] sm:$0xff]  ;;  %v8536_v44 = vld [vmem:[#allocation36_spill] sm:$0xff] }
0x11e0   :  { %v7810_v0 = vadd.f32 %v4248_v26, %v4247_v62  ;;  %v8538_v62 = vld [vmem:[#allocation38_spill] sm:$0xff]  ;;  %v8539_v26 = vld [vmem:[#allocation39_spill] sm:$0xff] }
0x11e2   :  { %5447 = vtanh.f32 %v7810_v0 }
0x11ef   :  { %v5448_v43 = vpop.eup %5447 }
0x11f0   :  { %v4251_v48 = vmul.f32 %v5448_v43, %v5446_v29  ;;  %v8540_v29 = vld [vmem:[#allocation40_spill] sm:$0xff]  ;;  %v8541_v43 = vld [vmem:[#allocation41_spill] sm:$0xff] }
0x11f2   :  { %4252 = vst [vmem:[#allocation4 + $0x6] sm:$0x1] %v4251_v48  ;;  %4320 = vmatmul.mubr.f32.vlgmr.msra.gmra.mxu0 %v4251_v48  ;;  %4391 = vmatmul.mubr.f32.vlgmr.msra.gmra.mxu1 %v4251_v48  ;;  %v8542_v48 = vmov 0.0  }
0x11f3   :  { %4462 = vmatpush1.msra.mxu0 %v7470_v61  ;;  %4533 = vmatpush1.msra.mxu1 %v7473_v58 }
0x11f4   :  { %4463 = vmatprep.subr.mxu0 %v7476_v31  ;;  %4534 = vmatprep.subr.mxu1 %v7479_v56 }
0x11f5   :  { %4464 = vmatpush1.msra.mxu0 %v7482_v50  ;;  %4535 = vmatpush1.msra.mxu1 %v7485_v30 }
0x11f6   :  { %4465 = vmatprep.subr.mxu0 %v7488_v28  ;;  %4536 = vmatprep.subr.mxu1 %v7491_v46 }
0x11f7   :  { %4466 = vmatpush1.msra.mxu0 %v7494_v59  ;;  %4537 = vmatpush1.msra.mxu1 %v7497_v6 }
0x11f8   :  { %4467 = vmatprep.subr.mxu0 %v7500_v54  ;;  %4538 = vmatprep.subr.mxu1 %v7503_v22 }
0x11f9   :  { %4468 = vmatpush1.msra.mxu0 %v7506_v16  ;;  %4539 = vmatpush1.msra.mxu1 %v7509_v14 }
0x11fa   :  { %4469 = vmatprep.subr.mxu0 %v7512_v10  ;;  %4540 = vmatprep.subr.mxu1 %v7515_v21 }
0x11fb   :  { %4470 = vmatpush1.msra.mxu0 %v7518_v9  ;;  %4541 = vmatpush1.msra.mxu1 %v7521_v17 }
0x11fc   :  { %4471 = vmatprep.subr.mxu0 %v7524_v19  ;;  %4542 = vmatprep.subr.mxu1 %v7527_v33 }
0x11fd   :  { %4472 = vmatpush1.msra.mxu0 %v7530_v20  ;;  %4543 = vmatpush1.msra.mxu1 %v7533_v8 }
0x11fe   :  { %4473 = vmatprep.subr.mxu0 %v7536_v15  ;;  %4544 = vmatprep.subr.mxu1 %v7539_v60 }
0x11ff   :  { %4474 = vmatpush1.msra.mxu0 %v7542_v4  ;;  %4545 = vmatpush1.msra.mxu1 %v7545_v7 }
0x1200   :  { %4475 = vmatprep.subr.mxu0 %v7548_v13  ;;  %4546 = vmatprep.subr.mxu1 %v7551_v63 }
0x1201   :  { %4476 = vmatpush1.msra.mxu0 %v7554_v11  ;;  %4547 = vmatpush1.msra.mxu1 %v7557_v18 }
0x1202   :  { %4477 = vmatprep.subr.mxu0 %v7560_v23  ;;  %4548 = vmatprep.subr.mxu1 %v7563_v12 }
0x1203   :  { %4478 = vmatpush1.msra.mxu0 %v7566_v25  ;;  %4549 = vmatpush1.msra.mxu1 %v7569_v27 }
0x1204   :  { %4479 = vmatprep.subr.mxu0 %v7572_v1  ;;  %4550 = vmatprep.subr.mxu1 %v7575_v34 }
0x1205   :  { %4480 = vmatpush1.msra.mxu0 %v7578_v35  ;;  %4551 = vmatpush1.msra.mxu1 %v7581_v36 }
0x1206   :  { %4481 = vmatprep.subr.mxu0 %v7584_v37  ;;  %4552 = vmatprep.subr.mxu1 %v7587_v38 }
0x1207   :  { %4482 = vmatpush1.msra.mxu0 %v7590_v39  ;;  %4553 = vmatpush1.msra.mxu1 %v7593_v40 }
0x1208   :  { %4483 = vmatprep.subr.mxu0 %v7596_v41  ;;  %4554 = vmatprep.subr.mxu1 %v8524_v5 }
0x1209   :  { %4484 = vmatpush1.msra.mxu0 %v8525_v32  ;;  %4555 = vmatpush1.msra.mxu1 %v8526_v24 }
0x120a   :  { %4485 = vmatprep.subr.mxu0 %v8527_v42  ;;  %4556 = vmatprep.subr.mxu1 %v8528_v52 }
0x120b   :  { %4486 = vmatpush1.msra.mxu0 %v8529_v53  ;;  %4557 = vmatpush1.msra.mxu1 %v8530_v51 }
0x120c   :  { %4487 = vmatprep.subr.mxu0 %v8531_v2  ;;  %4558 = vmatprep.subr.mxu1 %v8532_v57  ;;  %v8543_v57 = vld [vmem:[#allocation42_spill] sm:$0xff] }
0x120d   :  { %4488 = vmatpush1.msra.mxu0 %v8533_v49  ;;  %4559 = vmatpush1.msra.mxu1 %v8534_v55  ;;  %v8544_v55 = vld [vmem:[#allocation48_spill] sm:$0xff] }
0x120e   :  { %4489 = vmatprep.subr.mxu0 %v8535_v45  ;;  %4560 = vmatprep.subr.mxu1 %v8536_v44  ;;  %v8545_v45 = vld [vmem:[#allocation49_spill] sm:$0xff] }
0x120f   :  { %4490 = vmatpush1.msra.mxu0 %v8537_v3  ;;  %4561 = vmatpush1.msra.mxu1 %v8538_v62 }
0x1210   :  { %4491 = vmatprep.subr.mxu0 %v8539_v26  ;;  %4562 = vmatprep.subr.mxu1 %v8540_v29 }
0x1211   :  { %4492 = vmatpush1.msra.mxu0 %v8541_v43  ;;  %4525 = vmatprep.mubr.f32.mxu0 %v8542_v48 }
0x1212   :  { %4563 = vmatpush1.msra.mxu1 %v8543_v57  ;;  %4596 = vmatprep.mubr.f32.mxu1 %v8542_v48  ;;  %v4254_v57 = vld [vmem:[#allocation3 + $0x7] ss:$8 sm:$0xf] }
0x1213   :  { %4667 = vmatprep.subr.mxu0 %v8544_v55  ;;  %4738 = vmatprep.subr.mxu1 %v8545_v45 }
0x12b2   :  { %v4321_v44 = vpop.f32.mrf.mxu0  ;;  %v4392_v3 = vpop.f32.mrf.mxu1 }
0x12b4   :  { %v4323_v49 = vpop.f32.mrf.mxu0  ;;  %v4394_v62 = vpop.f32.mrf.mxu1 }
0x12b5   :  { %v4401_v2 = vcombine.low %v4321_v44, %v4323_v49  ;;  %v4402_v26 = vcombine.low %v4392_v3, %v4394_v62 }
0x12b7   :  { %v4409_v29 = vrot.slane %v4401_v2, %v6277_v47  ;;  %v4416_v43 = vrot.slane %v4402_v26, %v6277_v47 }
0x12b9   :  { %v4417_v51 = vcombine.low %v4409_v29, %v4416_v43 }
0x12bb   :  { %v4424_v53 = vrot.slane %v4417_v51, %v6277_v47 }
0x12bd   :  { %v4426_v52 = vadd.f32 %v4424_v53, %v4254_v57 }
0x12bf   :  { %v5098_v48 = vmul.f32 -1.442695, %v4426_v52  ;;  %v4434_v42 = vrot.slane %v4426_v52, 1  ;;  %v4445_v45 = vrot.slane %v4426_v52, 3  ;;  %v4442_v5 = vrot.slane %v4426_v52, 2 }
0x12c1   :  { %5449 = vpow2.f32 %v5098_v48  ;;  %v5099_v55 = vmul.f32 -1.442695, %v4434_v42  ;;  %v5100_v24 = vmul.f32 -1.442695, %v4445_v45 }
0x12c3   :  { %5451 = vpow2.f32 %v5099_v55 }
0x12c4   :  { %5453 = vpow2.f32 %v5100_v24 }
0x12ce   :  { %v5450_v32 = vpop.eup %5449 }
0x12cf   :  { %v4430_v49 = vadd.f32 1.0, %v5450_v32 }
0x12d0   :  { %v5452_v44 = vpop.eup %5451 }
0x12d1   :  { %5455 = vrcp.f32 %v4430_v49  ;;  %v4439_v2 = vadd.f32 1.0, %v5452_v44  ;;  %v5454_v3 = vpop.eup %5453 }
0x12d2   :  { %5457 = vtanh.f32 %v4442_v5  ;;  %v4450_v57 = vadd.f32 1.0, %v5454_v3 }
0x12d3   :  { %5459 = vrcp.f32 %v4439_v2 }
0x12d4   :  { %5461 = vrcp.f32 %v4450_v57  ;;  %v4888_v57 = vld [vmem:[#allocation16 + $0x68] sm:$0xff] }
0x12de   :  { %v5456_v51 = vpop.eup %5455 }
0x12df   :  { %v5458_v62 = vpop.eup %5457 }
0x12e0   :  { %v5460_v53 = vpop.eup %5459  ;;  %v4454_v42 = vmul.f32 %v5458_v62, %v5456_v51  ;;  %v4890_v62 = vld [vmem:[#allocation16 + $0x78] sm:$0xff] }
0x12e1   :  { %v4453_v26 = vmul.f32 %v5460_v53, %v7810_v0  ;;  %v5462_v32 = vpop.eup %5461  ;;  %v4889_v53 = vld [vmem:[#allocation16 + $0x70] sm:$0xff] }
0x12e3   :  { %v7883_v29 = vadd.f32 %v4454_v42, %v4453_v26  ;;  %v4887_v26 = vld [vmem:[#allocation16 + $0x60] sm:$0xff]  ;;  %v4886_v42 = vld [vmem:[#allocation16 + $0x58] sm:$0xff] }
0x12e5   :  { %5463 = vtanh.f32 %v7883_v29 }
0x12f2   :  { %v5464_v52 = vpop.eup %5463 }
0x12f3   :  { %v4457_v24 = vmul.f32 %v5464_v52, %v5462_v32  ;;  %v4884_v32 = vld [vmem:[#allocation16 + $0x48] sm:$0xff]  ;;  %v4883_v52 = vld [vmem:[#allocation16 + $0x40] sm:$0xff] }
0x12f5   :  { %4458 = vst [vmem:[#allocation4 + $0x7] sm:$0x1] %v4457_v24  ;;  %4526 = vmatmul.mubr.f32.vlgmr.msra.gmra.mxu0 %v4457_v24  ;;  %4597 = vmatmul.mubr.f32.vlgmr.msra.gmra.mxu1 %v4457_v24  ;;  %v4882_v24 = vld [vmem:[#allocation16 + $0x38] sm:$0xff] }
0x12f6   :  { %4668 = vmatpush1.msra.mxu0 %v7470_v61  ;;  %4739 = vmatpush1.msra.mxu1 %v7473_v58  ;;  %v8546_v61 = vld [vmem:[#allocation50_spill] sm:$0xff] }
0x12f7   :  { %4669 = vmatprep.subr.mxu0 %v7476_v31  ;;  %4740 = vmatprep.subr.mxu1 %v7479_v56  ;;  %v8547_v58 = vld [vmem:[#allocation30_spill] sm:$0xff]  ;;  %v8548_v31 = vld [vmem:[#allocation31_spill] sm:$0xff] }
0x12f8   :  { %4670 = vmatpush1.msra.mxu0 %v7482_v50  ;;  %4741 = vmatpush1.msra.mxu1 %v7485_v30  ;;  %v8549_v56 = vld [vmem:[#allocation51_spill] sm:$0xff]  ;;  %v8550_v50 = vld [vmem:[#allocation52_spill] sm:$0xff] }
0x12f9   :  { %4671 = vmatprep.subr.mxu0 %v7488_v28  ;;  %4742 = vmatprep.subr.mxu1 %v7491_v46  ;;  %v8551_v30 = vld [vmem:[#allocation27_spill] sm:$0xff]  ;;  %v8552_v28 = vld [vmem:[#allocation28_spill] sm:$0xff]  ;;  %v8553_v46 = vld [vmem:[#allocation29_spill] sm:$0xff] }
0x12fa   :  { %4672 = vmatpush1.msra.mxu0 %v7494_v59  ;;  %4743 = vmatpush1.msra.mxu1 %v7497_v6  ;;  %v8554_v59 = vld [vmem:[#allocation32_spill] sm:$0xff]  ;;  %v8555_v6 = vld [vmem:[#allocation33_spill] sm:$0xff] }
0x12fb   :  { %4673 = vmatprep.subr.mxu0 %v7500_v54  ;;  %4744 = vmatprep.subr.mxu1 %v7503_v22  ;;  %v8556_v54 = vld [vmem:[#allocation34_spill] sm:$0xff]  ;;  %v8557_v22 = vld [vmem:[#allocation35_spill] sm:$0xff] }
0x12fc   :  { %4674 = vmatpush1.msra.mxu0 %v7506_v16  ;;  %4745 = vmatpush1.msra.mxu1 %v7509_v14  ;;  %v8558_v16 = vld [vmem:[#allocation36_spill] sm:$0xff]  ;;  %v8559_v14 = vld [vmem:[#allocation37_spill] sm:$0xff]  ;;  %v4873_v51 = vld [vmem:[#allocation4] sm:$0xff] }
0x12fd   :  { %4675 = vmatprep.subr.mxu0 %v7512_v10  ;;  %4746 = vmatprep.subr.mxu1 %v7515_v21  ;;  %v8560_v10 = vld [vmem:[#allocation38_spill] sm:$0xff]  ;;  %v8561_v21 = vld [vmem:[#allocation39_spill] sm:$0xff] }
0x12fe   :  { %4676 = vmatpush1.msra.mxu0 %v7518_v9  ;;  %4747 = vmatpush1.msra.mxu1 %v7521_v17  ;;  %v8562_v9 = vld [vmem:[#allocation40_spill] sm:$0xff]  ;;  %v8563_v17 = vld [vmem:[#allocation41_spill] sm:$0xff] }
0x12ff   :  { %4677 = vmatprep.subr.mxu0 %v7524_v19  ;;  %4748 = vmatprep.subr.mxu1 %v7527_v33  ;;  %v8564_v19 = vmov 0.0   ;;  %v8565_v33 = vld [vmem:[#allocation42_spill] sm:$0xff] }
0x1300   :  { %4678 = vmatpush1.msra.mxu0 %v7530_v20  ;;  %4749 = vmatpush1.msra.mxu1 %v7533_v8 }
0x1301   :  { %4679 = vmatprep.subr.mxu0 %v7536_v15  ;;  %4750 = vmatprep.subr.mxu1 %v7539_v60 }
0x1302   :  { %4680 = vmatpush1.msra.mxu0 %v7542_v4  ;;  %4751 = vmatpush1.msra.mxu1 %v7545_v7 }
0x1303   :  { %4681 = vmatprep.subr.mxu0 %v7548_v13  ;;  %4752 = vmatprep.subr.mxu1 %v7551_v63 }
0x1304   :  { %4682 = vmatpush1.msra.mxu0 %v7554_v11  ;;  %4753 = vmatpush1.msra.mxu1 %v7557_v18 }
0x1305   :  { %4683 = vmatprep.subr.mxu0 %v7560_v23  ;;  %4754 = vmatprep.subr.mxu1 %v7563_v12  ;;  %v4460_v23 = vld [vmem:[#allocation3 + $0x20] ss:$8 sm:$0xf] }
0x1306   :  { %4684 = vmatpush1.msra.mxu0 %v7566_v25  ;;  %4755 = vmatpush1.msra.mxu1 %v7569_v27 }
0x1307   :  { %4685 = vmatprep.subr.mxu0 %v7572_v1  ;;  %4756 = vmatprep.subr.mxu1 %v7575_v34 }
0x1308   :  { %4686 = vmatpush1.msra.mxu0 %v7578_v35  ;;  %4757 = vmatpush1.msra.mxu1 %v7581_v36 }
0x1309   :  { %4687 = vmatprep.subr.mxu0 %v7584_v37  ;;  %4758 = vmatprep.subr.mxu1 %v7587_v38 }
0x130a   :  { %4688 = vmatpush1.msra.mxu0 %v7590_v39  ;;  %4759 = vmatpush1.msra.mxu1 %v7593_v40 }
0x130b   :  { %4689 = vmatprep.subr.mxu0 %v7596_v41  ;;  %4760 = vmatprep.subr.mxu1 %v8546_v61  ;;  %v4881_v61 = vld [vmem:[#allocation16 + $0x30] sm:$0xff] }
0x130c   :  { %4690 = vmatpush1.msra.mxu0 %v8547_v58  ;;  %4761 = vmatpush1.msra.mxu1 %v8548_v31  ;;  %v4880_v58 = vld [vmem:[#allocation16 + $0x28] sm:$0xff]  ;;  %v4879_v31 = vld [vmem:[#allocation16 + $0x20] sm:$0xff] }
0x130d   :  { %4691 = vmatprep.subr.mxu0 %v8549_v56  ;;  %4762 = vmatprep.subr.mxu1 %v8550_v50  ;;  %v4878_v56 = vld [vmem:[#allocation16 + $0x18] sm:$0xff]  ;;  %v4877_v50 = vld [vmem:[#allocation16 + $0x10] sm:$0xff] }
0x130e   :  { %4692 = vmatpush1.msra.mxu0 %v8551_v30  ;;  %4763 = vmatpush1.msra.mxu1 %v8552_v28  ;;  %v4876_v30 = vld [vmem:[#allocation16 + $0x8] sm:$0xff]  ;;  %v4875_v28 = vld [vmem:[#allocation16] sm:$0xff] }
0x130f   :  { %4693 = vmatprep.subr.mxu0 %v8553_v46  ;;  %4764 = vmatprep.subr.mxu1 %v8554_v59 }
0x1310   :  { %4694 = vmatpush1.msra.mxu0 %v8555_v6  ;;  %4765 = vmatpush1.msra.mxu1 %v8556_v54 }
0x1311   :  { %4695 = vmatprep.subr.mxu0 %v8557_v22  ;;  %4766 = vmatprep.subr.mxu1 %v8558_v16 }
0x1312   :  { %4696 = vmatpush1.msra.mxu0 %v8559_v14  ;;  %4767 = vmatpush1.msra.mxu1 %v8560_v10 }
0x1313   :  { %4697 = vmatprep.subr.mxu0 %v8561_v21  ;;  %4768 = vmatprep.subr.mxu1 %v8562_v9 }
0x1314   :  { %4698 = vmatpush1.msra.mxu0 %v8563_v17  ;;  %4731 = vmatprep.mubr.f32.mxu0 %v8564_v19  ;;  %v4666_v17 = vld [vmem:[#allocation3 + $0x21] ss:$8 sm:$0xf] }
0x1315   :  { %4769 = vmatpush1.msra.mxu1 %v8565_v33  ;;  %4802 = vmatprep.mubr.f32.mxu1 %v8564_v19 }
0x1316   :  { %5126 = vmatprep.subr.mxu0 %v4890_v62 }
0x13b5   :  { %v4527_v20 = vpop.f32.mrf.mxu0  ;;  %v4598_v8 = vpop.f32.mrf.mxu1 }
0x13b7   :  { %v4529_v15 = vpop.f32.mrf.mxu0  ;;  %v4600_v60 = vpop.f32.mrf.mxu1 }
0x13b8   :  { %v4607_v4 = vcombine.low %v4527_v20, %v4529_v15  ;;  %v4608_v7 = vcombine.low %v4598_v8, %v4600_v60 }
0x13ba   :  { %v4615_v13 = vrot.slane %v4607_v4, %v6277_v47  ;;  %v4622_v63 = vrot.slane %v4608_v7, %v6277_v47 }
0x13bc   :  { %v4623_v11 = vcombine.low %v4615_v13, %v4622_v63 }
0x13be   :  { %v4630_v18 = vrot.slane %v4623_v11, %v6277_v47 }
0x13c0   :  { %v4632_v12 = vadd.f32 %v4630_v18, %v4460_v23 }
0x13c2   :  { %v5101_v25 = vmul.f32 -1.442695, %v4632_v12  ;;  %v4640_v27 = vrot.slane %v4632_v12, 1  ;;  %v4651_v34 = vrot.slane %v4632_v12, 3  ;;  %v4648_v37 = vrot.slane %v4632_v12, 2 }
0x13c4   :  { %5465 = vpow2.f32 %v5101_v25  ;;  %v5102_v1 = vmul.f32 -1.442695, %v4640_v27  ;;  %v5103_v35 = vmul.f32 -1.442695, %v4651_v34 }
0x13c6   :  { %5467 = vpow2.f32 %v5102_v1 }
0x13c7   :  { %5469 = vpow2.f32 %v5103_v35 }
0x13d1   :  { %v5466_v36 = vpop.eup %5465 }
0x13d2   :  { %v4636_v38 = vadd.f32 1.0, %v5466_v36 }
0x13d3   :  { %v5468_v39 = vpop.eup %5467 }
0x13d4   :  { %5471 = vrcp.f32 %v4636_v38  ;;  %v4645_v40 = vadd.f32 1.0, %v5468_v39  ;;  %v5470_v41 = vpop.eup %5469  ;;  %v5107_v39 = vld [vmem:[%s7987_s9] ss:$0 sm:$0xff]  ;;  %s5882_s9 = smov [#allocation18]  }
0x13d5   :  { %5473 = vtanh.f32 %v4648_v37  ;;  %v4656_v48 = vadd.f32 1.0, %v5470_v41  ;;  %s5018_s22 = sshll.u32 %s5882_s9, 4  ;;  %s5019_s22 = int_to_ptr.vmem [resolvable:$true] %s5018_s22 }
0x13d6   :  { %5475 = vrcp.f32 %v4645_v40  ;;  %s5797_s23 = scalar_lea.vmem %s5019_s22, 16  ;;  %s5801_s4 = scalar_lea.vmem %s5019_s22, 32 }
0x13d7   :  { %5477 = vrcp.f32 %v4656_v48  ;;  %p5798_p7 = scmp.ne.s32.totalorder %s5019_s22, %s5797_s23  ;;  %p5802_p8 = scmp.lt.s32.totalorder %s5019_s22, %s5019_s22 }
0x13d8   :  { %p5803_p9 = scmp.lt.s32.totalorder %s5801_s4, %s5797_s23 }
0x13da   :  { %p5804_p10 = por %p5803_p9, %p5802_p8 }
0x13dc   :  { %p5805_p11 = pnand %p5804_p10, %p5798_p7 }
0x13e1   :  { %v5472_v0 = vpop.eup %5471 }
0x13e2   :  { %v5474_v5 = vpop.eup %5473 }
0x13e3   :  { %v5476_v43 = vpop.eup %5475  ;;  %v4660_v45 = vmul.f32 %v5474_v5, %v5472_v0 }
0x13e4   :  { %v4659_v55 = vmul.f32 %v5476_v43, %v7883_v29  ;;  %v5478_v44 = vpop.eup %5477  ;;  %v4885_v29 = vld [vmem:[#allocation16 + $0x50] sm:$0xff] }
0x13e6   :  { %v7954_v49 = vadd.f32 %v4660_v45, %v4659_v55 }
0x13e8   :  { %5479 = vtanh.f32 %v7954_v49 }
0x13f5   :  { %v5480_v2 = vpop.eup %5479 }
0x13f6   :  { %v4663_v3 = vmul.f32 %v5480_v2, %v5478_v44 }
0x13f8   :  { %4664 = vst [vmem:[#allocation4 + $0x8] sm:$0x1] %v4663_v3  ;;  %4732 = vmatmul.mubr.f32.vlgmr.msra.gmra.mxu0 %v4663_v3  ;;  %4803 = vmatmul.mubr.f32.vlgmr.msra.gmra.mxu1 %v4663_v3 }
0x13f9   :  { %5158 = vmatprep.mubr.f32.mxu0 %v4873_v51  ;;  %5127 = vmatpush3.msra.mxu0 %v4890_v62 }
0x13fa   :  { %5128 = vmatprep.subr.mxu0 %v4889_v53 }
0x13fb   :  { %5129 = vmatpush3.msra.mxu0 %v4889_v53 }
0x13fc   :  { %5130 = vmatprep.subr.mxu0 %v4888_v57 }
0x13fd   :  { %5131 = vmatpush3.msra.mxu0 %v4888_v57 }
0x13fe   :  { %5132 = vmatprep.subr.mxu0 %v4887_v26 }
0x13ff   :  { %5133 = vmatpush3.msra.mxu0 %v4887_v26 }
0x1400   :  { %5134 = vmatprep.subr.mxu0 %v4886_v42 }
0x1401   :  { %5135 = vmatpush3.msra.mxu0 %v4886_v42 }
0x1402   :  { %5136 = vmatprep.subr.mxu0 %v4885_v29 }
0x1403   :  { %5137 = vmatpush3.msra.mxu0 %v4885_v29 }
0x1404   :  { %5138 = vmatprep.subr.mxu0 %v4884_v32 }
0x1405   :  { %5139 = vmatpush3.msra.mxu0 %v4884_v32 }
0x1406   :  { %5140 = vmatprep.subr.mxu0 %v4883_v52 }
0x1407   :  { %5141 = vmatpush3.msra.mxu0 %v4883_v52 }
0x1408   :  { %5142 = vmatprep.subr.mxu0 %v4882_v24 }
0x1409   :  { %5143 = vmatpush3.msra.mxu0 %v4882_v24 }
0x140a   :  { %5144 = vmatprep.subr.mxu0 %v4881_v61 }
0x140b   :  { %5145 = vmatpush3.msra.mxu0 %v4881_v61 }
0x140c   :  { %5146 = vmatprep.subr.mxu0 %v4880_v58 }
0x140d   :  { %5147 = vmatpush3.msra.mxu0 %v4880_v58 }
0x140e   :  { %5148 = vmatprep.subr.mxu0 %v4879_v31 }
0x140f   :  { %5149 = vmatpush3.msra.mxu0 %v4879_v31 }
0x1410   :  { %5150 = vmatprep.subr.mxu0 %v4878_v56 }
0x1411   :  { %5151 = vmatpush3.msra.mxu0 %v4878_v56 }
0x1412   :  { %5152 = vmatprep.subr.mxu0 %v4877_v50 }
0x1413   :  { %5153 = vmatpush3.msra.mxu0 %v4877_v50 }
0x1414   :  { %5154 = vmatprep.subr.mxu0 %v4876_v30 }
0x1415   :  { %5155 = vmatpush3.msra.mxu0 %v4876_v30 }
0x1416   :  { %5156 = vmatprep.subr.mxu0 %v4875_v28 }
0x1417   :  { %5157 = vmatpush3.msra.mxu0 %v4875_v28 }
0x14b8   :  { %v4733_v46 = vpop.f32.mrf.mxu0  ;;  %v4804_v59 = vpop.f32.mrf.mxu1 }
0x14ba   :  { %v4735_v6 = vpop.f32.mrf.mxu0  ;;  %v4806_v54 = vpop.f32.mrf.mxu1 }
0x14bb   :  { %v4813_v22 = vcombine.low %v4733_v46, %v4735_v6  ;;  %v4814_v16 = vcombine.low %v4804_v59, %v4806_v54 }
0x14bd   :  { %v4821_v14 = vrot.slane %v4813_v22, %v6277_v47  ;;  %v4828_v10 = vrot.slane %v4814_v16, %v6277_v47 }
0x14bf   :  { %v4829_v21 = vcombine.low %v4821_v14, %v4828_v10 }
0x14c1   :  { %v4836_v9 = vrot.slane %v4829_v21, %v6277_v47 }
0x14c3   :  { %v4838_v19 = vadd.f32 %v4836_v9, %v4666_v17 }
0x14c5   :  { %v5104_v33 = vmul.f32 -1.442695, %v4838_v19  ;;  %v4846_v20 = vrot.slane %v4838_v19, 1  ;;  %v4857_v15 = vrot.slane %v4838_v19, 3  ;;  %v4854_v7 = vrot.slane %v4838_v19, 2 }
0x14c7   :  { %5481 = vpow2.f32 %v5104_v33  ;;  %v5105_v8 = vmul.f32 -1.442695, %v4846_v20  ;;  %v5106_v60 = vmul.f32 -1.442695, %v4857_v15 }
0x14c9   :  { %5483 = vpow2.f32 %v5105_v8 }
0x14ca   :  { %5485 = vpow2.f32 %v5106_v60 }
0x14d4   :  { %v5482_v4 = vpop.eup %5481 }
0x14d5   :  { %v4842_v13 = vadd.f32 1.0, %v5482_v4 }
0x14d6   :  { %v5484_v63 = vpop.eup %5483 }
0x14d7   :  { %5487 = vrcp.f32 %v4842_v13  ;;  %v4851_v11 = vadd.f32 1.0, %v5484_v63  ;;  %v5486_v18 = vpop.eup %5485 }
0x14d8   :  { %5489 = vtanh.f32 %v4854_v7  ;;  %v4862_v25 = vadd.f32 1.0, %v5486_v18 }
0x14d9   :  { %5491 = vrcp.f32 %v4851_v11 }
0x14da   :  { %5493 = vrcp.f32 %v4862_v25 }
0x14e4   :  { %v5488_v47 = vpop.eup %5487 }
0x14e5   :  { %v5490_v23 = vpop.eup %5489 }
0x14e6   :  { %v5492_v12 = vpop.eup %5491  ;;  %v4866_v1 = vmul.f32 %v5490_v23, %v5488_v47 }
0x14e7   :  { %v4865_v27 = vmul.f32 %v5492_v12, %v7954_v49  ;;  %v5494_v35 = vpop.eup %5493 }
0x14e9   :  { %v4867_v34 = vadd.f32 %v4866_v1, %v4865_v27 }
0x14eb   :  { %5495 = vtanh.f32 %v4867_v34  ;;  %4872 = vst [vmem:[#allocation20] sm:$0x1] %v4867_v34 }
0x14f8   :  { %v5496_v36 = vpop.eup %5495 }
0x14f9   :  { %v4869_v37 = vmul.f32 %v5496_v36, %v5494_v35 }
0x14fb   :  { %4870 = vst [vmem:[#allocation4 + $0x9] sm:$0x1] %v4869_v37  ;;  %4871 = vst [vmem:[#allocation18] sm:$0x1] %v4869_v37 }
0x1502   :  { %v4874_v38 = vld [vmem:[#allocation4 + $0x8] sm:$0x3] }
0x1503   :  { %5159 = vmatmul.mubr.f32.vlgmr.msra.gmra.mxu0 %v4874_v38 }
0x15c3   :  { %v5160_v40 = vpop.f32.mrf.mxu0 }
0x15c4   :  { %v4970_v41 = vadd.f32 %v5160_v40, %v5107_v39 }
0x15c5   :  { %v4964_v0 = vpop.f32.mrf.mxu0 }
0x15c6   :  { %v4976_v5 = vsel %vm4975_vm0, %v4970_v41, -inf  ;;  %v4965_v43 = vadd.f32 %v5107_v39, %v4964_v0 }
0x15c7   :  { %4977 = vmax.xlane.f32.xlu0 %v4976_v5 }
0x15cb   :  { %4973 = vmax.xlane.f32.xlu0 %v4965_v43 }
0x1650   :  { %v4978_v48 = vpop.xlane.xlu0 %4977 }
0x1651   :  { %v4980_v55 = vsub.f32 %v4970_v41, %v4978_v48 }
0x1653   :  { %v4983_v44 = vmul.f32 1.442695, %v4980_v55 }
0x1654   :  { %v4974_v45 = vpop.xlane.xlu0 %4973 }
0x1655   :  { %v4979_v49 = vsub.f32 %v4965_v43, %v4974_v45 }
0x1657   :  { %v4981_v2 = vmul.f32 1.442695, %v4979_v49 }
0x1659   :  { %5497 = vpow2.f32 %v4981_v2 }
0x165a   :  { %5499 = vpow2.f32 %v4983_v44 }
0x1666   :  { %v5498_v3 = vpop.eup %5497 }
0x1667   :  { %v5500_v51 = vpop.eup %5499  ;;  %4985 = vadd.xlane.f32.xlu1 %v5498_v3 }
0x1668   :  { %v4987_v62 = vsel %vm4975_vm0, %v5500_v51, 0.0 }
0x166b   :  { %4988 = vadd.xlane.f32.xlu1 %v4987_v62 }
0x166c   :  { %5808 = shalt.err (!%p5805_p11)
}
0x166d   :  { %5021 = dma.vmem_to_hbm [thread:$0]  %s5019_s22, 16, %s7989_s11, [#allocation19]  }
0x166e   :  { %s5883_s28 = smov [#allocation20]  }
0x166f   :  { %s5028_s6 = sshll.u32 %s5883_s28, 4  ;;  %s5029_s6 = int_to_ptr.vmem [resolvable:$true] %s5028_s6 }
0x1670   :  { %s5817_s29 = scalar_lea.vmem %s5029_s6, 16  ;;  %s5821_s30 = scalar_lea.vmem %s5029_s6, 32 }
0x1671   :  { %p5818_p12 = scmp.ne.s32.totalorder %s5029_s6, %s5817_s29  ;;  %p5822_p13 = scmp.lt.s32.totalorder %s5029_s6, %s5029_s6 }
0x1672   :  { %p5823_p0 = scmp.lt.s32.totalorder %s5821_s30, %s5817_s29 }
0x1674   :  { %p5824_p1 = por %p5823_p0, %p5822_p13 }
0x1676   :  { %p5825_p2 = pnand %p5824_p1, %p5818_p12 }
0x1678   :  { %5828 = shalt.err (!%p5825_p2)
}
0x1679   :  { %5031 = dma.vmem_to_hbm [thread:$0]  %s5029_s6, 16, %s7990_s12, [#allocation19]  }
0x167a   :  { %s5884_s11 = smov [#allocation17]  }
0x167b   :  { %s5005_s17 = sshll.u32 %s5884_s11, 4  ;;  %s5006_s17 = int_to_ptr.vmem [resolvable:$true] %s5005_s17 }
0x167c   :  { %s5837_s0 = scalar_lea.vmem %s5006_s17, 256  ;;  %p5842_p4 = scmp.lt.s32.totalorder %s5006_s17, %s5006_s17 }
0x167d   :  { %p5838_p3 = scmp.ne.s32.totalorder %s5006_s17, %s5837_s0  ;;  %p5843_p5 = scmp.lt.s32.totalorder %s5837_s0, %s5837_s0 }
0x167f   :  { %p5844_p6 = por %p5843_p5, %p5842_p4 }
0x1681   :  { %p5845_p7 = pnand %p5844_p6, %p5838_p3 }
0x16f0   :  { %v4986_v53 = vpop.xlane.xlu1 %4985 }
0x16f1   :  { %5501 = vlog2.f32 %v4986_v53 }
0x16f4   :  { %v4989_v57 = vpop.xlane.xlu1 %4988 }
0x16f5   :  { %5503 = vlog2.f32 %v4989_v57 }
0x16fe   :  { %v5502_v26 = vpop.eup %5501 }
0x16ff   :  { %v4991_v42 = vmul.f32 0.6931472, %v5502_v26 }
0x1701   :  { %v4994_v29 = vadd.f32 %v4991_v42, %v4974_v45 }
0x1702   :  { %v5504_v32 = vpop.eup %5503 }
0x1703   :  { %v4993_v52 = vmul.f32 0.6931472, %v5504_v32  ;;  %v4996_v24 = vsub.f32 %v4965_v43, %v4994_v29 }
0x1705   :  { %v4995_v61 = vadd.f32 %v4993_v52, %v4978_v48  ;;  %4998 = vst [vmem:[#allocation17] sm:$0xff] %v4996_v24 }
0x1707   :  { %v4997_v58 = vsub.f32 %v4970_v41, %v4995_v61 }
0x1709   :  { %4999 = vst [vmem:[#allocation17 + $0x8] sm:$0x3] %v4997_v58 }
0x170a   :  { %5848 = shalt.err (!%p5845_p7)
}
0x170b   :  { %5011 = dma.vmem_to_hbm [thread:$0]  %s5006_s17, 256, %s7988_s10, [#allocation7], %s5874_s15, %s5874_s15, %s5875_s16  }
0x170c   :  { %5865 = dma.done.wait [#allocation7], 256  }
0x170d   :  { %5866 = vsyncadd [#allocation7], 4294967040 }
0x170e   :  { %5867 = dma.done.wait [#allocation19], 32  }
0x170f   :  { %5868 = vsyncadd [#allocation19], 4294967264 }
0x1710   :  { %5041 = vsyncpa [#allocation6], 1 }
0x1711   :  { %5042 = vsyncpa [#allocation9], 1 }
0x1712   :  { %5043 = vsyncpa [#allocation12], 1 }
0x1713   :  { %5044 = vsyncpa [#allocation15], 1 }
0x1714   :  { %5045 = vsyncpa [#allocation7], 1 }
0x1715   :  { %5046 = vsyncpa [#allocation19], 1 }

</bundles_post_ra>
